<compile_context>
chip_gen: v7x
topology: tpu7x:2x2x1
jax: 0.10.0
libtpu: 0.0.40
codegen_flags: <defaults>
</compile_context>

<pallas_src>
import functools

import jax
import jax.numpy as jnp
from jax.experimental import pallas as pl
from jax.experimental.pallas import tpu as pltpu

LANE = 128
HIDDEN = 750
HIDDEN_PAD = 768  # 750 rounded up to a lane multiple


def _round_up(x, m):
    return (x + m - 1) // m * m


def _vae_kernel(max_action, l_pad,
                sa_ref, state_ref, noise_ref,
                we1_ref, be1_ref,
                we2_ref, be2_ref,
                wmls_ref, bmls_ref,
                wd1s_ref, wd1z_ref, bd1_ref,
                wd2_ref, bd2_ref,
                wd3_ref, bd3_ref,
                u_ref, mean_ref, std_ref):
    bf16 = jnp.bfloat16

    sa = sa_ref[...].astype(bf16)       # (TB, S+A) — cat([state, action])
    s = state_ref[...].astype(bf16)     # (TB, S)

    # Encoder.
    h = jnp.dot(sa, we1_ref[...], preferred_element_type=jnp.float32)
    h = jnp.maximum(h + be1_ref[...], 0.0)
    h = jnp.dot(h.astype(bf16), we2_ref[...], preferred_element_type=jnp.float32)
    h = jnp.maximum(h + be2_ref[...], 0.0)

    # Fused mean | log_std head: one 2*l_pad-wide matmul, lane-aligned split.
    head = jnp.dot(h.astype(bf16), wmls_ref[...],
                   preferred_element_type=jnp.float32) + bmls_ref[...]
    mean = head[:, :l_pad]
    log_std = jnp.clip(head[:, l_pad:], -4.0, 15.0)
    std = jnp.exp(log_std)

    # Reparameterization with externally supplied standard-normal noise.
    # Padded z columns are neutralized by the zero rows of wd1_z.
    z = mean + std * noise_ref[...]

    # Decoder: cat([state, z]) @ Wd1 as two MXU pushes into one f32 acc.
    d = jnp.dot(s, wd1s_ref[...], preferred_element_type=jnp.float32)
    d = d + jnp.dot(z.astype(bf16), wd1z_ref[...],
                    preferred_element_type=jnp.float32)
    d = jnp.maximum(d + bd1_ref[...], 0.0)
    d = jnp.dot(d.astype(bf16), wd2_ref[...], preferred_element_type=jnp.float32)
    d = jnp.maximum(d + bd2_ref[...], 0.0)
    u = jnp.dot(d.astype(bf16), wd3_ref[...],
                preferred_element_type=jnp.float32) + bd3_ref[...]
    u = max_action * jnp.tanh(u)

    u_ref[...] = u.astype(u_ref.dtype)
    mean_ref[...] = mean.astype(mean_ref.dtype)
    std_ref[...] = std.astype(std_ref.dtype)


def prepare_kernel_params(params, state_dim, action_dim, latent_dim):
    """Lane-pad, bf16-cast (weights only) and fuse/split layers for the kernel.

    Zero padding is exact: padded hidden columns come out as ReLU(0)=0, and
    padded weight rows are 0, so they contribute nothing to real outputs.
    Biases stay f32 so the bias-add/activation path is full precision.
    """
    a_pad = _round_up(action_dim, LANE)
    l_pad = _round_up(latent_dim, LANE)

    def padw(w, rows, cols):
        w = jnp.pad(w, ((0, rows - w.shape[0]), (0, cols - w.shape[1])))
        return w.astype(jnp.bfloat16)

    def padb(b, cols):
        return jnp.pad(b, ((0, 0), (0, cols - b.shape[1])))  # f32

    we1, wd1 = params["we1"], params["wd1"]

    # Fused mean|log_std head weight / bias.
    wm_p = jnp.pad(params["wm"],
                   ((0, HIDDEN_PAD - HIDDEN), (0, l_pad - latent_dim)))
    wls_p = jnp.pad(params["wls"],
                    ((0, HIDDEN_PAD - HIDDEN), (0, l_pad - latent_dim)))
    bm_p = jnp.pad(params["bm"], ((0, 0), (0, l_pad - latent_dim)))
    bls_p = jnp.pad(params["bls"], ((0, 0), (0, l_pad - latent_dim)))

    return {
        "we1": padw(we1, state_dim + action_dim, HIDDEN_PAD),
        "be1": padb(params["be1"], HIDDEN_PAD),
        "we2": padw(params["we2"], HIDDEN_PAD, HIDDEN_PAD),
        "be2": padb(params["be2"], HIDDEN_PAD),
        "wmls": jnp.concatenate([wm_p, wls_p], axis=1).astype(jnp.bfloat16),
        "bmls": jnp.concatenate([bm_p, bls_p], axis=1),
        "wd1_s": padw(wd1[:state_dim], state_dim, HIDDEN_PAD),
        "wd1_z": padw(wd1[state_dim:], l_pad, HIDDEN_PAD),
        "bd1": padb(params["bd1"], HIDDEN_PAD),
        "wd2": padw(params["wd2"], HIDDEN_PAD, HIDDEN_PAD),
        "bd2": padb(params["bd2"], HIDDEN_PAD),
        "wd3": padw(params["wd3"], HIDDEN_PAD, a_pad),
        "bd3": padb(params["bd3"], a_pad),
    }


def vae_forward(state, action, noise, params, *, max_action):
    """Pallas implementation of VAE.forward.

    state:  [B, state_dim]   f32
    action: [B, action_dim]  f32
    noise:  [B, latent_dim]  f32 standard-normal reparameterization noise
    params: dict of unpadded [in, out] weights / [1, out] biases (f32).
    Returns (u [B, action_dim], mean [B, latent_dim], std [B, latent_dim]).
    """
    B, S = state.shape
    A = action.shape[1]
    L = noise.shape[1]
    a_pad = _round_up(A, LANE)
    l_pad = _round_up(L, LANE)

    kp = prepare_kernel_params(params, S, A, L)

    # Batch tile: for B > 8 always produce >=2 grid steps so v7x's two
    # TensorCores both get work; cap at 512 rows (amortizes per-step
    # overhead on v5e/v6e, stays well inside v7x's 64 MiB VMEM with bf16
    # single-buffered weights).
    TB = min(512, max(8, _round_up((B + 1) // 2, 8)))
    B_pad = _round_up(B, TB)
    nb = B_pad // TB

    sa = jnp.concatenate([state, action], axis=1)           # folded cat()
    sa_p = jnp.pad(sa, ((0, B_pad - B), (0, 0)))
    state_p = jnp.pad(state, ((0, B_pad - B), (0, 0)))
    noise_p = jnp.pad(noise, ((0, B_pad - B), (0, l_pad - L)))

    def row_spec(cols):
        return pl.BlockSpec((TB, cols), lambda i: (i, 0))

    def const_spec(arr):
        # Weights/biases: same block every grid step -> fetched once,
        # VMEM-resident, single-buffered (no point double-buffering a
        # constant block).
        return pl.BlockSpec(arr.shape, lambda i: (0, 0),
                            pipeline_mode=pl.Buffered(buffer_count=1))

    weight_order = ["we1", "be1", "we2", "be2", "wmls", "bmls",
                    "wd1_s", "wd1_z", "bd1", "wd2", "bd2", "wd3", "bd3"]
    weights = [kp[k] for k in weight_order]

    in_specs = ([row_spec(S + A), row_spec(S), row_spec(l_pad)]
                + [const_spec(w) for w in weights])
    out_specs = (row_spec(a_pad), row_spec(l_pad), row_spec(l_pad))
    out_shape = (
        jax.ShapeDtypeStruct((B_pad, a_pad), jnp.float32),
        jax.ShapeDtypeStruct((B_pad, l_pad), jnp.float32),
        jax.ShapeDtypeStruct((B_pad, l_pad), jnp.float32),
    )

    weight_bytes = sum(int(w.size) * w.dtype.itemsize for w in weights)
    io_bytes = (int(sa_p.size) + int(state_p.size) + int(noise_p.size)
                + B_pad * (a_pad + 2 * l_pad)) * 4
    flops = 2 * B_pad * ((S + A) * HIDDEN_PAD
                         + HIDDEN_PAD * HIDDEN_PAD
                         + HIDDEN_PAD * 2 * l_pad
                         + S * HIDDEN_PAD + l_pad * HIDDEN_PAD
                         + HIDDEN_PAD * HIDDEN_PAD
                         + HIDDEN_PAD * a_pad)
    cost = pl.CostEstimate(flops=flops,
                           transcendentals=B_pad * (l_pad + a_pad),
                           bytes_accessed=weight_bytes + io_bytes)

    kernel = functools.partial(_vae_kernel, float(max_action), l_pad)
    u, mean, std = pl.pallas_call(
        kernel,
        grid=(nb,),
        in_specs=in_specs,
        out_specs=out_specs,
        out_shape=out_shape,
        compiler_params=pltpu.CompilerParams(
            dimension_semantics=("parallel",),
            vmem_limit_bytes=48 * 1024 * 1024),
        cost_estimate=cost,
    )(sa_p, state_p, noise_p, *weights)

    return u[:B, :A], mean[:B, :L], std[:B, :L]


def init_vae_params(key, state_dim, action_dim, latent_dim, hidden=HIDDEN):
    """Synthetic parameters matching the nn.Linear layers.

    Stored as [in, out] (transpose of PyTorch's [out, in]), biases [1, out].
    """
    keys = jax.random.split(key, 14)

    def linear(kw, kb, fan_in, fan_out):
        s = 1.0 / (fan_in ** 0.5)
        w = jax.random.uniform(kw, (fan_in, fan_out), jnp.float32, -s, s)
        b = jax.random.uniform(kb, (1, fan_out), jnp.float32, -s, s)
        return w, b

    we1, be1 = linear(keys[0], keys[1], state_dim + action_dim, hidden)
    we2, be2 = linear(keys[2], keys[3], hidden, hidden)
    wm, bm = linear(keys[4], keys[5], hidden, latent_dim)
    wls, bls = linear(keys[6], keys[7], hidden, latent_dim)
    wd1, bd1 = linear(keys[8], keys[9], state_dim + latent_dim, hidden)
    wd2, bd2 = linear(keys[10], keys[11], hidden, hidden)
    wd3, bd3 = linear(keys[12], keys[13], hidden, action_dim)
    return dict(we1=we1, be1=be1, we2=we2, be2=be2, wm=wm, bm=bm,
                wls=wls, bls=bls, wd1=wd1, bd1=bd1, wd2=wd2, bd2=bd2,
                wd3=wd3, bd3=bd3)


def vae_reference(state, action, noise, params, *, max_action):
    """Pure-JAX f32 reference for the correctness check (same noise)."""
    x = jnp.concatenate([state, action], axis=1)
    h = jnp.maximum(x @ params["we1"] + params["be1"], 0.0)
    h = jnp.maximum(h @ params["we2"] + params["be2"], 0.0)
    mean = h @ params["wm"] + params["bm"]
    log_std = jnp.clip(h @ params["wls"] + params["bls"], -4.0, 15.0)
    std = jnp.exp(log_std)
    z = mean + std * noise
    xz = jnp.concatenate([state, z], axis=1)
    d = jnp.maximum(xz @ params["wd1"] + params["bd1"], 0.0)
    d = jnp.maximum(d @ params["wd2"] + params["bd2"], 0.0)
    u = max_action * jnp.tanh(d @ params["wd3"] + params["bd3"])
    return u, mean, std


if __name__ == "__main__":
    key = jax.random.PRNGKey(0)
    k_params, k_state, k_action, k_noise = jax.random.split(key, 4)

    batch = 2
    state_dim = 16
    action_dim = 4
    latent_dim = 8
    max_action = 1.0

    params = init_vae_params(k_params, state_dim, action_dim, latent_dim)
    state = jax.random.normal(k_state, (batch, state_dim), jnp.float32)
    action = jax.random.uniform(k_action, (batch, action_dim), jnp.float32,
                                -max_action, max_action)
    # Reparameterization noise (torch.randn_like equivalent), generated
    # outside the kernel so kernel and reference are comparable.
    noise = jax.random.normal(k_noise, (batch, latent_dim), jnp.float32)

    u, mean, std = vae_forward(state, action, noise, params,
                               max_action=max_action)
    u, mean, std = jax.block_until_ready((u, mean, std))

    u_ref, mean_ref, std_ref = vae_reference(state, action, noise, params,
                                             max_action=max_action)

    assert u.shape == (batch, action_dim)
    assert mean.shape == (batch, latent_dim)
    assert std.shape == (batch, latent_dim)
    # bf16 matmul operands (f32 accumulation) -> slightly looser tolerance
    # than the pure-f32 version.
    assert jnp.allclose(u, u_ref, atol=2e-2, rtol=2e-2), "u mismatch"
    assert jnp.allclose(mean, mean_ref, atol=2e-2, rtol=2e-2), "mean mismatch"
    assert jnp.allclose(std, std_ref, atol=2e-2, rtol=2e-2), "std mismatch"

    print("KERNEL_OK")
</pallas_src>

<mosaic_0001>
module attributes {stable_mosaic.version = 11 : i64} {
  func.func @_vae_kernel(%arg0: i32, %arg1: memref<8x20xf32, #tpu.memory_space<vmem>>, %arg2: memref<8x16xf32, #tpu.memory_space<vmem>>, %arg3: memref<8x128xf32, #tpu.memory_space<vmem>>, %arg4: memref<20x768xbf16, #tpu.memory_space<vmem>>, %arg5: memref<1x768xf32, #tpu.memory_space<vmem>>, %arg6: memref<768x768xbf16, #tpu.memory_space<vmem>>, %arg7: memref<1x768xf32, #tpu.memory_space<vmem>>, %arg8: memref<768x256xbf16, #tpu.memory_space<vmem>>, %arg9: memref<1x256xf32, #tpu.memory_space<vmem>>, %arg10: memref<16x768xbf16, #tpu.memory_space<vmem>>, %arg11: memref<128x768xbf16, #tpu.memory_space<vmem>>, %arg12: memref<1x768xf32, #tpu.memory_space<vmem>>, %arg13: memref<768x768xbf16, #tpu.memory_space<vmem>>, %arg14: memref<1x768xf32, #tpu.memory_space<vmem>>, %arg15: memref<768x128xbf16, #tpu.memory_space<vmem>>, %arg16: memref<1x128xf32, #tpu.memory_space<vmem>>, %arg17: memref<8x128xf32, #tpu.memory_space<vmem>>, %arg18: memref<8x128xf32, #tpu.memory_space<vmem>>, %arg19: memref<8x128xf32, #tpu.memory_space<vmem>>) attributes {dimension_semantics = [#tpu.dimension_semantics<parallel>], iteration_bounds = array<i64: 1>, scalar_prefetch = 0 : i64, scratch_operands = 0 : i64, tpu.core_type = #tpu.core_type<tc>, window_params = [{transform_indices = @transform_0, window_bounds = array<i64: 8, 20>}, {transform_indices = @transform_1, window_bounds = array<i64: 8, 16>}, {transform_indices = @transform_2, window_bounds = array<i64: 8, 128>}, {pipeline_mode = #tpu.pipeline_mode<synchronous>, transform_indices = @transform_3, window_bounds = array<i64: 20, 768>}, {pipeline_mode = #tpu.pipeline_mode<synchronous>, transform_indices = @transform_4, window_bounds = array<i64: 1, 768>}, {pipeline_mode = #tpu.pipeline_mode<synchronous>, transform_indices = @transform_5, window_bounds = array<i64: 768, 768>}, {pipeline_mode = #tpu.pipeline_mode<synchronous>, transform_indices = @transform_6, window_bounds = array<i64: 1, 768>}, {pipeline_mode = #tpu.pipeline_mode<synchronous>, transform_indices = @transform_7, window_bounds = array<i64: 768, 256>}, {pipeline_mode = #tpu.pipeline_mode<synchronous>, transform_indices = @transform_8, window_bounds = array<i64: 1, 256>}, {pipeline_mode = #tpu.pipeline_mode<synchronous>, transform_indices = @transform_9, window_bounds = array<i64: 16, 768>}, {pipeline_mode = #tpu.pipeline_mode<synchronous>, transform_indices = @transform_10, window_bounds = array<i64: 128, 768>}, {pipeline_mode = #tpu.pipeline_mode<synchronous>, transform_indices = @transform_11, window_bounds = array<i64: 1, 768>}, {pipeline_mode = #tpu.pipeline_mode<synchronous>, transform_indices = @transform_12, window_bounds = array<i64: 768, 768>}, {pipeline_mode = #tpu.pipeline_mode<synchronous>, transform_indices = @transform_13, window_bounds = array<i64: 1, 768>}, {pipeline_mode = #tpu.pipeline_mode<synchronous>, transform_indices = @transform_14, window_bounds = array<i64: 768, 128>}, {pipeline_mode = #tpu.pipeline_mode<synchronous>, transform_indices = @transform_15, window_bounds = array<i64: 1, 128>}, {transform_indices = @transform_16, window_bounds = array<i64: 8, 128>}, {transform_indices = @transform_17, window_bounds = array<i64: 8, 128>}, {transform_indices = @transform_18, window_bounds = array<i64: 8, 128>}]} {
    %c0 = arith.constant 0 : index
    %c0_0 = arith.constant 0 : index
    %0 = vector.load %arg1[%c0, %c0_0] : memref<8x20xf32, #tpu.memory_space<vmem>>, vector<8x20xf32>
    %1 = arith.truncf %0 : vector<8x20xf32> to vector<8x20xbf16>
    %c0_1 = arith.constant 0 : index
    %c0_2 = arith.constant 0 : index
    %2 = vector.load %arg2[%c0_1, %c0_2] : memref<8x16xf32, #tpu.memory_space<vmem>>, vector<8x16xf32>
    %3 = arith.truncf %2 : vector<8x16xf32> to vector<8x16xbf16>
    %c0_3 = arith.constant 0 : index
    %c0_4 = arith.constant 0 : index
    %4 = vector.load %arg4[%c0_3, %c0_4] : memref<20x768xbf16, #tpu.memory_space<vmem>>, vector<20x768xbf16>
    %cst = arith.constant dense<0.000000e+00> : vector<8x768xf32>
    %5 = tpu.matmul %1, %4, %cst {dimension_numbers = #tpu.dot_dimension_numbers<[1], [0], [0], [1], [0, 0, 1, 1], [], []>} : vector<8x20xbf16>, vector<20x768xbf16>, vector<8x768xf32> -> vector<8x768xf32>
    %c0_5 = arith.constant 0 : index
    %c0_6 = arith.constant 0 : index
    %6 = vector.load %arg5[%c0_5, %c0_6] : memref<1x768xf32, #tpu.memory_space<vmem>>, vector<1x768xf32>
    %7 = vector.broadcast %6 : vector<1x768xf32> to vector<8x768xf32>
    %8 = arith.addf %5, %7 : vector<8x768xf32>
    %cst_7 = arith.constant 0.000000e+00 : f32
    %9 = vector.broadcast %cst_7 : f32 to vector<8x768xf32>
    %10 = arith.maximumf %8, %9 : vector<8x768xf32>
    %11 = arith.truncf %10 : vector<8x768xf32> to vector<8x768xbf16>
    %c0_8 = arith.constant 0 : index
    %c0_9 = arith.constant 0 : index
    %12 = vector.load %arg6[%c0_8, %c0_9] : memref<768x768xbf16, #tpu.memory_space<vmem>>, vector<768x768xbf16>
    %cst_10 = arith.constant dense<0.000000e+00> : vector<8x768xf32>
    %13 = tpu.matmul %11, %12, %cst_10 {dimension_numbers = #tpu.dot_dimension_numbers<[1], [0], [0], [1], [0, 0, 1, 1], [], []>} : vector<8x768xbf16>, vector<768x768xbf16>, vector<8x768xf32> -> vector<8x768xf32>
    %c0_11 = arith.constant 0 : index
    %c0_12 = arith.constant 0 : index
    %14 = vector.load %arg7[%c0_11, %c0_12] : memref<1x768xf32, #tpu.memory_space<vmem>>, vector<1x768xf32>
    %15 = vector.broadcast %14 : vector<1x768xf32> to vector<8x768xf32>
    %16 = arith.addf %13, %15 : vector<8x768xf32>
    %cst_13 = arith.constant 0.000000e+00 : f32
    %17 = vector.broadcast %cst_13 : f32 to vector<8x768xf32>
    %18 = arith.maximumf %16, %17 : vector<8x768xf32>
    %19 = arith.truncf %18 : vector<8x768xf32> to vector<8x768xbf16>
    %c0_14 = arith.constant 0 : index
    %c0_15 = arith.constant 0 : index
    %20 = vector.load %arg8[%c0_14, %c0_15] : memref<768x256xbf16, #tpu.memory_space<vmem>>, vector<768x256xbf16>
    %cst_16 = arith.constant dense<0.000000e+00> : vector<8x256xf32>
    %21 = tpu.matmul %19, %20, %cst_16 {dimension_numbers = #tpu.dot_dimension_numbers<[1], [0], [0], [1], [0, 0, 1, 1], [], []>} : vector<8x768xbf16>, vector<768x256xbf16>, vector<8x256xf32> -> vector<8x256xf32>
    %c0_17 = arith.constant 0 : index
    %c0_18 = arith.constant 0 : index
    %22 = vector.load %arg9[%c0_17, %c0_18] : memref<1x256xf32, #tpu.memory_space<vmem>>, vector<1x256xf32>
    %23 = vector.broadcast %22 : vector<1x256xf32> to vector<8x256xf32>
    %24 = arith.addf %21, %23 : vector<8x256xf32>
    %25 = vector.extract_strided_slice %24 {offsets = [0, 0], sizes = [8, 128], strides = [1, 1]} : vector<8x256xf32> to vector<8x128xf32>
    %26 = vector.extract_strided_slice %24 {offsets = [0, 128], sizes = [8, 128], strides = [1, 1]} : vector<8x256xf32> to vector<8x128xf32>
    %cst_19 = arith.constant -4.000000e+00 : f32
    %cst_20 = arith.constant 1.500000e+01 : f32
    %27 = vector.broadcast %cst_19 : f32 to vector<8x128xf32>
    %28 = arith.maximumf %27, %26 : vector<8x128xf32>
    %29 = vector.broadcast %cst_20 : f32 to vector<8x128xf32>
    %30 = arith.minimumf %29, %28 : vector<8x128xf32>
    %31 = math.exp %30 : vector<8x128xf32>
    %c0_21 = arith.constant 0 : index
    %c0_22 = arith.constant 0 : index
    %32 = vector.load %arg3[%c0_21, %c0_22] : memref<8x128xf32, #tpu.memory_space<vmem>>, vector<8x128xf32>
    %33 = arith.mulf %31, %32 : vector<8x128xf32>
    %34 = arith.addf %25, %33 : vector<8x128xf32>
    %c0_23 = arith.constant 0 : index
    %c0_24 = arith.constant 0 : index
    %35 = vector.load %arg10[%c0_23, %c0_24] : memref<16x768xbf16, #tpu.memory_space<vmem>>, vector<16x768xbf16>
    %cst_25 = arith.constant dense<0.000000e+00> : vector<8x768xf32>
    %36 = tpu.matmul %3, %35, %cst_25 {dimension_numbers = #tpu.dot_dimension_numbers<[1], [0], [0], [1], [0, 0, 1, 1], [], []>} : vector<8x16xbf16>, vector<16x768xbf16>, vector<8x768xf32> -> vector<8x768xf32>
    %37 = arith.truncf %34 : vector<8x128xf32> to vector<8x128xbf16>
    %c0_26 = arith.constant 0 : index
    %c0_27 = arith.constant 0 : index
    %38 = vector.load %arg11[%c0_26, %c0_27] : memref<128x768xbf16, #tpu.memory_space<vmem>>, vector<128x768xbf16>
    %cst_28 = arith.constant dense<0.000000e+00> : vector<8x768xf32>
    %39 = tpu.matmul %37, %38, %cst_28 {dimension_numbers = #tpu.dot_dimension_numbers<[1], [0], [0], [1], [0, 0, 1, 1], [], []>} : vector<8x128xbf16>, vector<128x768xbf16>, vector<8x768xf32> -> vector<8x768xf32>
    %40 = arith.addf %36, %39 : vector<8x768xf32>
    %c0_29 = arith.constant 0 : index
    %c0_30 = arith.constant 0 : index
    %41 = vector.load %arg12[%c0_29, %c0_30] : memref<1x768xf32, #tpu.memory_space<vmem>>, vector<1x768xf32>
    %42 = vector.broadcast %41 : vector<1x768xf32> to vector<8x768xf32>
    %43 = arith.addf %40, %42 : vector<8x768xf32>
    %cst_31 = arith.constant 0.000000e+00 : f32
    %44 = vector.broadcast %cst_31 : f32 to vector<8x768xf32>
    %45 = arith.maximumf %43, %44 : vector<8x768xf32>
    %46 = arith.truncf %45 : vector<8x768xf32> to vector<8x768xbf16>
    %c0_32 = arith.constant 0 : index
    %c0_33 = arith.constant 0 : index
    %47 = vector.load %arg13[%c0_32, %c0_33] : memref<768x768xbf16, #tpu.memory_space<vmem>>, vector<768x768xbf16>
    %cst_34 = arith.constant dense<0.000000e+00> : vector<8x768xf32>
    %48 = tpu.matmul %46, %47, %cst_34 {dimension_numbers = #tpu.dot_dimension_numbers<[1], [0], [0], [1], [0, 0, 1, 1], [], []>} : vector<8x768xbf16>, vector<768x768xbf16>, vector<8x768xf32> -> vector<8x768xf32>
    %c0_35 = arith.constant 0 : index
    %c0_36 = arith.constant 0 : index
    %49 = vector.load %arg14[%c0_35, %c0_36] : memref<1x768xf32, #tpu.memory_space<vmem>>, vector<1x768xf32>
    %50 = vector.broadcast %49 : vector<1x768xf32> to vector<8x768xf32>
    %51 = arith.addf %48, %50 : vector<8x768xf32>
    %cst_37 = arith.constant 0.000000e+00 : f32
    %52 = vector.broadcast %cst_37 : f32 to vector<8x768xf32>
    %53 = arith.maximumf %51, %52 : vector<8x768xf32>
    %54 = arith.truncf %53 : vector<8x768xf32> to vector<8x768xbf16>
    %c0_38 = arith.constant 0 : index
    %c0_39 = arith.constant 0 : index
    %55 = vector.load %arg15[%c0_38, %c0_39] : memref<768x128xbf16, #tpu.memory_space<vmem>>, vector<768x128xbf16>
    %cst_40 = arith.constant dense<0.000000e+00> : vector<8x128xf32>
    %56 = tpu.matmul %54, %55, %cst_40 {dimension_numbers = #tpu.dot_dimension_numbers<[1], [0], [0], [1], [0, 0, 1, 1], [], []>} : vector<8x768xbf16>, vector<768x128xbf16>, vector<8x128xf32> -> vector<8x128xf32>
    %c0_41 = arith.constant 0 : index
    %c0_42 = arith.constant 0 : index
    %57 = vector.load %arg16[%c0_41, %c0_42] : memref<1x128xf32, #tpu.memory_space<vmem>>, vector<1x128xf32>
    %58 = vector.broadcast %57 : vector<1x128xf32> to vector<8x128xf32>
    %59 = arith.addf %56, %58 : vector<8x128xf32>
    %60 = math.tanh %59 : vector<8x128xf32>
    %cst_43 = arith.constant 1.000000e+00 : f32
    %61 = vector.broadcast %cst_43 : f32 to vector<8x128xf32>
    %62 = arith.mulf %61, %60 : vector<8x128xf32>
    %c0_44 = arith.constant 0 : index
    %c0_45 = arith.constant 0 : index
    %63 = vector.load %arg17[%c0_44, %c0_45] : memref<8x128xf32, #tpu.memory_space<vmem>>, vector<8x128xf32>
    tpu.vector_store %arg17[%c0_44, %c0_45], %62 {strides = array<i32>} : memref<8x128xf32, #tpu.memory_space<vmem>>, vector<8x128xf32>,
    %c0_46 = arith.constant 0 : index
    %c0_47 = arith.constant 0 : index
    %64 = vector.load %arg18[%c0_46, %c0_47] : memref<8x128xf32, #tpu.memory_space<vmem>>, vector<8x128xf32>
    tpu.vector_store %arg18[%c0_46, %c0_47], %25 {strides = array<i32>} : memref<8x128xf32, #tpu.memory_space<vmem>>, vector<8x128xf32>,
    %c0_48 = arith.constant 0 : index
    %c0_49 = arith.constant 0 : index
    %65 = vector.load %arg19[%c0_48, %c0_49] : memref<8x128xf32, #tpu.memory_space<vmem>>, vector<8x128xf32>
    tpu.vector_store %arg19[%c0_48, %c0_49], %31 {strides = array<i32>} : memref<8x128xf32, #tpu.memory_space<vmem>>, vector<8x128xf32>,
    return
  }
  func.func @transform_0(%arg0: i32) -> (i32, i32) {
    %c0_i32 = arith.constant 0 : i32
    %c0_i32_0 = arith.constant 0 : i32
    return %arg0, %c0_i32 : i32, i32
  }
  func.func @transform_1(%arg0: i32) -> (i32, i32) {
    %c0_i32 = arith.constant 0 : i32
    %c0_i32_0 = arith.constant 0 : i32
    return %arg0, %c0_i32 : i32, i32
  }
  func.func @transform_2(%arg0: i32) -> (i32, i32) {
    %c0_i32 = arith.constant 0 : i32
    %c0_i32_0 = arith.constant 0 : i32
    return %arg0, %c0_i32 : i32, i32
  }
  func.func @transform_3(%arg0: i32) -> (i32, i32) {
    %c0_i32 = arith.constant 0 : i32
    %c0_i32_0 = arith.constant 0 : i32
    %c0_i32_1 = arith.constant 0 : i32
    return %c0_i32, %c0_i32_0 : i32, i32
  }
  func.func @transform_4(%arg0: i32) -> (i32, i32) {
    %c0_i32 = arith.constant 0 : i32
    %c0_i32_0 = arith.constant 0 : i32
    %c0_i32_1 = arith.constant 0 : i32
    return %c0_i32, %c0_i32_0 : i32, i32
  }
  func.func @transform_5(%arg0: i32) -> (i32, i32) {
    %c0_i32 = arith.constant 0 : i32
    %c0_i32_0 = arith.constant 0 : i32
    %c0_i32_1 = arith.constant 0 : i32
    return %c0_i32, %c0_i32_0 : i32, i32
  }
  func.func @transform_6(%arg0: i32) -> (i32, i32) {
    %c0_i32 = arith.constant 0 : i32
    %c0_i32_0 = arith.constant 0 : i32
    %c0_i32_1 = arith.constant 0 : i32
    return %c0_i32, %c0_i32_0 : i32, i32
  }
  func.func @transform_7(%arg0: i32) -> (i32, i32) {
    %c0_i32 = arith.constant 0 : i32
    %c0_i32_0 = arith.constant 0 : i32
    %c0_i32_1 = arith.constant 0 : i32
    return %c0_i32, %c0_i32_0 : i32, i32
  }
  func.func @transform_8(%arg0: i32) -> (i32, i32) {
    %c0_i32 = arith.constant 0 : i32
    %c0_i32_0 = arith.constant 0 : i32
    %c0_i32_1 = arith.constant 0 : i32
    return %c0_i32, %c0_i32_0 : i32, i32
  }
  func.func @transform_9(%arg0: i32) -> (i32, i32) {
    %c0_i32 = arith.constant 0 : i32
    %c0_i32_0 = arith.constant 0 : i32
    %c0_i32_1 = arith.constant 0 : i32
    return %c0_i32, %c0_i32_0 : i32, i32
  }
  func.func @transform_10(%arg0: i32) -> (i32, i32) {
    %c0_i32 = arith.constant 0 : i32
    %c0_i32_0 = arith.constant 0 : i32
    %c0_i32_1 = arith.constant 0 : i32
    return %c0_i32, %c0_i32_0 : i32, i32
  }
  func.func @transform_11(%arg0: i32) -> (i32, i32) {
    %c0_i32 = arith.constant 0 : i32
    %c0_i32_0 = arith.constant 0 : i32
    %c0_i32_1 = arith.constant 0 : i32
    return %c0_i32, %c0_i32_0 : i32, i32
  }
  func.func @transform_12(%arg0: i32) -> (i32, i32) {
    %c0_i32 = arith.constant 0 : i32
    %c0_i32_0 = arith.constant 0 : i32
    %c0_i32_1 = arith.constant 0 : i32
    return %c0_i32, %c0_i32_0 : i32, i32
  }
  func.func @transform_13(%arg0: i32) -> (i32, i32) {
    %c0_i32 = arith.constant 0 : i32
    %c0_i32_0 = arith.constant 0 : i32
    %c0_i32_1 = arith.constant 0 : i32
    return %c0_i32, %c0_i32_0 : i32, i32
  }
  func.func @transform_14(%arg0: i32) -> (i32, i32) {
    %c0_i32 = arith.constant 0 : i32
    %c0_i32_0 = arith.constant 0 : i32
    %c0_i32_1 = arith.constant 0 : i32
    return %c0_i32, %c0_i32_0 : i32, i32
  }
  func.func @transform_15(%arg0: i32) -> (i32, i32) {
    %c0_i32 = arith.constant 0 : i32
    %c0_i32_0 = arith.constant 0 : i32
    %c0_i32_1 = arith.constant 0 : i32
    return %c0_i32, %c0_i32_0 : i32, i32
  }
  func.func @transform_16(%arg0: i32) -> (i32, i32) {
    %c0_i32 = arith.constant 0 : i32
    %c0_i32_0 = arith.constant 0 : i32
    return %arg0, %c0_i32 : i32, i32
  }
  func.func @transform_17(%arg0: i32) -> (i32, i32) {
    %c0_i32 = arith.constant 0 : i32
    %c0_i32_0 = arith.constant 0 : i32
    return %arg0, %c0_i32 : i32, i32
  }
  func.func @transform_18(%arg0: i32) -> (i32, i32) {
    %c0_i32 = arith.constant 0 : i32
    %c0_i32_0 = arith.constant 0 : i32
    return %arg0, %c0_i32 : i32, i32
  }
}

</mosaic_0001>

<bundles_post_ra>
// kernel: tpu_custom_call.1
= control target key start
LH: loop header
LB: loop body
LE: loop exit
PB: predicated region body
PF: predicated region fallthrough
CT: control target
= control target key end

     0   :  { %s9815_s0 = inlined_call_operand.hbm [shape: f32[8,20], index: 0, kind: input, shape index: {}]   ;;  %s9816_s1 = inlined_call_operand.hbm [shape: f32[8,16], index: 1, kind: input, shape index: {}]   ;;  %s9817_s2 = inlined_call_operand.hbm [shape: f32[8,128], index: 2, kind: input, shape index: {}]   ;;  %s9818_s3 = inlined_call_operand.hbm [shape: bf16[20,768], index: 3, kind: input, shape index: {}]   ;;  %s9819_s4 = inlined_call_operand.hbm [shape: f32[1,768], index: 4, kind: input, shape index: {}]   ;;  %s9820_s5 = inlined_call_operand.hbm [shape: bf16[768,768], index: 5, kind: input, shape index: {}]   ;;  %s9821_s6 = inlined_call_operand.hbm [shape: f32[1,768], index: 6, kind: input, shape index: {}]   ;;  %s9822_s7 = inlined_call_operand.hbm [shape: bf16[768,256], index: 7, kind: input, shape index: {}]   ;;  %s9823_s8 = inlined_call_operand.hbm [shape: f32[1,256], index: 8, kind: input, shape index: {}]   ;;  %s9824_s9 = inlined_call_operand.hbm [shape: bf16[16,768], index: 9, kind: input, shape index: {}]   ;;  %s9825_s10 = inlined_call_operand.hbm [shape: bf16[128,768], index: 10, kind: input, shape index: {}]   ;;  %s9826_s11 = inlined_call_operand.hbm [shape: f32[1,768], index: 11, kind: input, shape index: {}]   ;;  %s9827_s12 = inlined_call_operand.hbm [shape: bf16[768,768], index: 12, kind: input, shape index: {}]   ;;  %s9828_s13 = inlined_call_operand.hbm [shape: f32[1,768], index: 13, kind: input, shape index: {}]   ;;  %s9829_s14 = inlined_call_operand.hbm [shape: bf16[768,128], index: 14, kind: input, shape index: {}]   ;;  %s9830_s15 = inlined_call_operand.hbm [shape: f32[1,128], index: 15, kind: input, shape index: {}]   ;;  %s9831_s16 = inlined_call_operand.hbm [shape: f32[8,128], index: 16, kind: output, shape index: {0}]   ;;  %s9832_s17 = inlined_call_operand.hbm [shape: f32[8,128], index: 17, kind: output, shape index: {1}]   ;;  %s9833_s18 = inlined_call_operand.hbm [shape: f32[8,128], index: 18, kind: output, shape index: {2}]  }
   0x1   :  { %9838 = sst [smem:[#allocation43_spill]] %s9815_s0 }
   0x2   :  { %9839 = sst [smem:[#allocation44_spill]] %s9816_s1 }
   0x3   :  { %9840 = sst [smem:[#allocation45_spill]] %s9817_s2 }
   0x4   :  { %9841 = sst [smem:[#allocation46_spill]] %s9831_s16 }
   0x5   :  { %24 = vsyncpa [#allocation3], 0 }
   0x6   :  { %25 = vsyncpa [#allocation6], 0 }
   0x7   :  { %26 = vsyncpa [#allocation9], 0 }
   0x8   :  { %27 = vsyncpa [#allocation12], 0 }
   0x9   :  { %28 = vsyncpa [#allocation15], 0 }
   0xa   :  { %29 = vsyncpa [#allocation18], 0 }
   0xb   :  { %30 = vsyncpa [#allocation21], 0 }
   0xc   :  { %31 = vsyncpa [#allocation24], 0 }
   0xd   :  { %32 = vsyncpa [#allocation27], 0 }
   0xe   :  { %33 = vsyncpa [#allocation4], 0 }
   0xf   :  { %34 = vsyncpa [#allocation30], 0  ;;  %s9248_s27 = smov [#allocation5]   ;;  %s9249_s29 = smov [#allocation8]  }
  0x10   :  { %s51_s28 = sshll.u32 %s9248_s27, 4  ;;  %s70_s30 = sshll.u32 %s9249_s29, 4  ;;  %s52_s28 = int_to_ptr.vmem [resolvable:$true] %s51_s28  ;;  %s9369_s30 = int_to_ptr.vmem [resolvable:$true] %s70_s30 }
  0x11   :  { %s9842_s1 = sld [smem:[#allocation44_spill]] }
  0x17   :  { %s8808_s20 = scalar_lea.hbm %s9842_s1, 128 }
  0x18   :  { %p8809_p0 = scmp.ne.s32.totalorder %s9842_s1, %s8808_s20  ;;  %p8812_p1 = scmp.lt.u32.totalorder %s8808_s20, %s9842_s1 }
  0x1a   :  { %p8814_p2 = pnand %p8812_p1, %p8809_p0 }
  0x1c   :  { %8817 = shalt.err (!%p8814_p2)
}
  0x1d   :  { %s8818_s24 = scalar_lea.vmem %s52_s28, 128  ;;  %p8823_p4 = scmp.lt.s32.totalorder %s52_s28, %s52_s28 }
  0x1e   :  { %p8819_p3 = scmp.ne.s32.totalorder %s52_s28, %s8818_s24  ;;  %p8824_p5 = scmp.lt.s32.totalorder %s8818_s24, %s8818_s24 }
  0x20   :  { %p8825_p6 = por %p8824_p5, %p8823_p4 }
  0x22   :  { %p8826_p7 = pnand %p8825_p6, %p8819_p3 }
  0x24   :  { %8829 = shalt.err (!%p8826_p7)
}
  0x25   :  { %54 = dma.hbm_to_vmem [thread:$0]  %s9842_s1, 128, %s52_s28, [#allocation6]  }
  0x26   :  { %s8830_s0 = scalar_lea.hbm %s9818_s3, 1152 }
  0x27   :  { %p8831_p8 = scmp.ne.s32.totalorder %s9818_s3, %s8830_s0  ;;  %p8834_p9 = scmp.lt.u32.totalorder %s8830_s0, %s9818_s3 }
  0x29   :  { %p8836_p10 = pnand %p8834_p9, %p8831_p8 }
  0x2b   :  { %8839 = shalt.err (!%p8836_p10)
}
  0x2c   :  { %s8840_s2 = scalar_lea.vmem %s9369_s30, 1152  ;;  %p8845_p12 = scmp.lt.s32.totalorder %s9369_s30, %s9369_s30 }
  0x2d   :  { %p8841_p11 = scmp.ne.s32.totalorder %s9369_s30, %s8840_s2  ;;  %p8846_p13 = scmp.lt.s32.totalorder %s8840_s2, %s8840_s2 }
  0x2f   :  { %p8847_p0 = por %p8846_p13, %p8845_p12 }
  0x31   :  { %p8848_p1 = pnand %p8847_p0, %p8841_p11 }
  0x33   :  { %8851 = shalt.err (!%p8848_p1)
}
  0x34   :  { %s9250_s28 = smov 384   ;;  %s9251_s1 = smov 24  }
  0x35   :  { %76 = dma.hbm_to_vmem [thread:$0]  %s9818_s3, 1152, %s9369_s30, [#allocation9], %s9250_s28, %s9250_s28, %s9251_s1  }
  0x36   :  { %s9252_s25 = smov [#allocation11]   ;;  %s9253_s27 = smov [#allocation14]  }
  0x37   :  { %s92_s26 = sshll.u32 %s9252_s25, 4  ;;  %s114_s29 = sshll.u32 %s9253_s27, 4  ;;  %s93_s26 = int_to_ptr.vmem [resolvable:$true] %s92_s26  ;;  %s9403_s29 = int_to_ptr.vmem [resolvable:$true] %s114_s29 }
  0x38   :  { %s8852_s21 = scalar_lea.hbm %s9820_s5, 36864 }
  0x39   :  { %p8853_p2 = scmp.ne.s32.totalorder %s9820_s5, %s8852_s21  ;;  %p8856_p3 = scmp.lt.u32.totalorder %s8852_s21, %s9820_s5 }
  0x3b   :  { %p8858_p4 = pnand %p8856_p3, %p8853_p2 }
  0x3d   :  { %8861 = shalt.err (!%p8858_p4)
}
  0x3e   :  { %s8862_s3 = scalar_lea.vmem %s93_s26, 36864  ;;  %p8867_p6 = scmp.lt.s32.totalorder %s93_s26, %s93_s26 }
  0x3f   :  { %p8863_p5 = scmp.ne.s32.totalorder %s93_s26, %s8862_s3  ;;  %p8868_p7 = scmp.lt.s32.totalorder %s8862_s3, %s8862_s3 }
  0x41   :  { %p8869_p8 = por %p8868_p7, %p8867_p6 }
  0x43   :  { %p8870_p9 = pnand %p8869_p8, %p8863_p5 }
  0x45   :  { %8873 = shalt.err (!%p8870_p9)
}
  0x46   :  { %98 = dma.hbm_to_vmem [thread:$0]  %s9820_s5, 36864, %s93_s26, [#allocation12], %s9250_s28, %s9250_s28, %s9251_s1  }
  0x47   :  { %s8874_s16 = scalar_lea.hbm %s9822_s7, 12288 }
  0x48   :  { %p8875_p10 = scmp.ne.s32.totalorder %s9822_s7, %s8874_s16  ;;  %p8878_p11 = scmp.lt.u32.totalorder %s8874_s16, %s9822_s7 }
  0x4a   :  { %p8880_p12 = pnand %p8878_p11, %p8875_p10 }
  0x4c   :  { %8883 = shalt.err (!%p8880_p12)
}
  0x4d   :  { %s8884_s20 = scalar_lea.vmem %s9403_s29, 12288  ;;  %p8889_p0 = scmp.lt.s32.totalorder %s9403_s29, %s9403_s29 }
  0x4e   :  { %p8885_p13 = scmp.ne.s32.totalorder %s9403_s29, %s8884_s20  ;;  %p8890_p1 = scmp.lt.s32.totalorder %s8884_s20, %s8884_s20 }
  0x50   :  { %p8891_p2 = por %p8890_p1, %p8889_p0 }
  0x52   :  { %p8892_p3 = pnand %p8891_p2, %p8885_p13 }
  0x54   :  { %8895 = shalt.err (!%p8892_p3)
}
  0x55   :  { %s9254_s5 = smov 128   ;;  %s9255_s26 = smov 8  }
  0x56   :  { %120 = dma.hbm_to_vmem [thread:$0]  %s9822_s7, 12288, %s9403_s29, [#allocation15], %s9254_s5, %s9254_s5, %s9255_s26  }
  0x57   :  { %s9256_s3 = smov [#allocation17]   ;;  %s9257_s23 = smov [#allocation20]  }
  0x58   :  { %s136_s30 = sshll.u32 %s9256_s3, 4  ;;  %s161_s24 = sshll.u32 %s9257_s23, 4  ;;  %s137_s30 = int_to_ptr.vmem [resolvable:$true] %s136_s30  ;;  %s162_s24 = int_to_ptr.vmem [resolvable:$true] %s161_s24 }
  0x59   :  { %s8896_s27 = scalar_lea.hbm %s9824_s9, 768 }
  0x5a   :  { %p8897_p4 = scmp.ne.s32.totalorder %s9824_s9, %s8896_s27  ;;  %p8900_p5 = scmp.lt.u32.totalorder %s8896_s27, %s9824_s9 }
  0x5c   :  { %p8902_p6 = pnand %p8900_p5, %p8897_p4 }
  0x5e   :  { %8905 = shalt.err (!%p8902_p6)
}
  0x5f   :  { %s8906_s7 = scalar_lea.vmem %s137_s30, 768  ;;  %p8911_p8 = scmp.lt.s32.totalorder %s137_s30, %s137_s30 }
  0x60   :  { %p8907_p7 = scmp.ne.s32.totalorder %s137_s30, %s8906_s7  ;;  %p8912_p9 = scmp.lt.s32.totalorder %s8906_s7, %s8906_s7 }
  0x62   :  { %p8913_p10 = por %p8912_p9, %p8911_p8 }
  0x64   :  { %p8914_p11 = pnand %p8913_p10, %p8907_p7 }
  0x66   :  { %8917 = shalt.err (!%p8914_p11)
}
  0x67   :  { %142 = dma.hbm_to_vmem [thread:$0]  %s9824_s9, 768, %s137_s30, [#allocation18], %s9250_s28, %s9250_s28, %s9251_s1  }
  0x68   :  { %s8918_s2 = scalar_lea.hbm %s9826_s11, 96 }
  0x69   :  { %p8919_p12 = scmp.ne.s32.totalorder %s9826_s11, %s8918_s2  ;;  %p8922_p13 = scmp.lt.u32.totalorder %s8918_s2, %s9826_s11 }
  0x6b   :  { %p8924_p0 = pnand %p8922_p13, %p8919_p12 }
  0x6d   :  { %8927 = shalt.err (!%p8924_p0)
}
  0x6e   :  { %s8928_s27 = scalar_lea.vmem %s162_s24, 96  ;;  %p8933_p2 = scmp.lt.s32.totalorder %s162_s24, %s162_s24 }
  0x6f   :  { %p8929_p1 = scmp.ne.s32.totalorder %s162_s24, %s8928_s27  ;;  %p8934_p3 = scmp.lt.s32.totalorder %s8928_s27, %s8928_s27 }
  0x71   :  { %p8935_p4 = por %p8934_p3, %p8933_p2 }
  0x73   :  { %p8936_p5 = pnand %p8935_p4, %p8929_p1 }
  0x75   :  { %8939 = shalt.err (!%p8936_p5)
}
  0x76   :  { %164 = dma.hbm_to_vmem [thread:$0]  %s9826_s11, 96, %s162_s24, [#allocation21]  }
  0x77   :  { %s9258_s0 = smov [#allocation23]   ;;  %s9259_s21 = smov [#allocation2]  }
  0x78   :  { %s183_s19 = sshll.u32 %s9258_s0, 4  ;;  %s41_s20 = sshll.u32 %s9259_s21, 4  ;;  %s184_s19 = int_to_ptr.vmem [resolvable:$true] %s183_s19  ;;  %s42_s20 = int_to_ptr.vmem [resolvable:$true] %s41_s20 }
  0x79   :  { %s8940_s5 = scalar_lea.hbm %s9828_s13, 96 }
  0x7a   :  { %p8941_p6 = scmp.ne.s32.totalorder %s9828_s13, %s8940_s5  ;;  %p8944_p7 = scmp.lt.u32.totalorder %s8940_s5, %s9828_s13 }
  0x7c   :  { %p8946_p8 = pnand %p8944_p7, %p8941_p6 }
  0x7e   :  { %8949 = shalt.err (!%p8946_p8)
}
  0x7f   :  { %s8950_s11 = scalar_lea.vmem %s184_s19, 96  ;;  %p8955_p10 = scmp.lt.s32.totalorder %s184_s19, %s184_s19 }
  0x80   :  { %p8951_p9 = scmp.ne.s32.totalorder %s184_s19, %s8950_s11  ;;  %p8956_p11 = scmp.lt.s32.totalorder %s8950_s11, %s8950_s11 }
  0x82   :  { %p8957_p12 = por %p8956_p11, %p8955_p10 }
  0x84   :  { %p8958_p13 = pnand %p8957_p12, %p8951_p9 }
  0x86   :  { %8961 = shalt.err (!%p8958_p13)
}
  0x87   :  { %186 = dma.hbm_to_vmem [thread:$0]  %s9828_s13, 96, %s184_s19, [#allocation24]  }
  0x88   :  { %s9843_s27 = sld [smem:[#allocation43_spill]] }
  0x8e   :  { %s8962_s9 = scalar_lea.hbm %s9843_s27, 128 }
  0x8f   :  { %p8963_p0 = scmp.ne.s32.totalorder %s9843_s27, %s8962_s9  ;;  %p8966_p1 = scmp.lt.u32.totalorder %s8962_s9, %s9843_s27 }
  0x91   :  { %p8968_p2 = pnand %p8966_p1, %p8963_p0 }
  0x93   :  { %8971 = shalt.err (!%p8968_p2)
}
  0x94   :  { %s8972_s29 = scalar_lea.vmem %s42_s20, 128  ;;  %p8977_p4 = scmp.lt.s32.totalorder %s42_s20, %s42_s20 }
  0x95   :  { %p8973_p3 = scmp.ne.s32.totalorder %s42_s20, %s8972_s29  ;;  %p8978_p5 = scmp.lt.s32.totalorder %s8972_s29, %s8972_s29 }
  0x97   :  { %p8979_p6 = por %p8978_p5, %p8977_p4 }
  0x99   :  { %p8980_p7 = pnand %p8979_p6, %p8973_p3 }
  0x9b   :  { %8983 = shalt.err (!%p8980_p7)
}
  0x9c   :  { %44 = dma.hbm_to_vmem [thread:$0]  %s9843_s27, 128, %s42_s20, [#allocation3]  }
  0x9d   :  { %s9260_s5 = smov [#allocation7]   ;;  %s9261_s22 = smov [#allocation10]  }
  0x9e   :  { %s61_s26 = sshll.u32 %s9260_s5, 4  ;;  %s83_s2 = sshll.u32 %s9261_s22, 4  ;;  %s62_s26 = int_to_ptr.vmem [resolvable:$true] %s61_s26  ;;  %s84_s2 = int_to_ptr.vmem [resolvable:$true] %s83_s2 }
  0x9f   :  { %s9844_s24 = sld [smem:[#allocation45_spill]] }
  0xa5   :  { %s8984_s23 = scalar_lea.hbm %s9844_s24, 128 }
  0xa6   :  { %p8985_p8 = scmp.ne.s32.totalorder %s9844_s24, %s8984_s23  ;;  %p8988_p9 = scmp.lt.u32.totalorder %s8984_s23, %s9844_s24 }
  0xa8   :  { %p8990_p10 = pnand %p8988_p9, %p8985_p8 }
  0xaa   :  { %8993 = shalt.err (!%p8990_p10)
}
  0xab   :  { %s8994_s20 = scalar_lea.vmem %s62_s26, 128  ;;  %p8999_p12 = scmp.lt.s32.totalorder %s62_s26, %s62_s26 }
  0xac   :  { %p8995_p11 = scmp.ne.s32.totalorder %s62_s26, %s8994_s20  ;;  %p9000_p13 = scmp.lt.s32.totalorder %s8994_s20, %s8994_s20 }
  0xae   :  { %p9001_p0 = por %p9000_p13, %p8999_p12 }
  0xb0   :  { %p9002_p1 = pnand %p9001_p0, %p8995_p11 }
  0xb2   :  { %9005 = shalt.err (!%p9002_p1)
}
  0xb3   :  { %64 = dma.hbm_to_vmem [thread:$0]  %s9844_s24, 128, %s62_s26, [#allocation6]  }
  0xb4   :  { %s9006_s29 = scalar_lea.hbm %s9819_s4, 96 }
  0xb5   :  { %p9007_p2 = scmp.ne.s32.totalorder %s9819_s4, %s9006_s29  ;;  %p9010_p3 = scmp.lt.u32.totalorder %s9006_s29, %s9819_s4 }
  0xb7   :  { %p9012_p4 = pnand %p9010_p3, %p9007_p2 }
  0xb9   :  { %9015 = shalt.err (!%p9012_p4)
}
  0xba   :  { %s9016_s3 = scalar_lea.vmem %s84_s2, 96  ;;  %p9021_p6 = scmp.lt.s32.totalorder %s84_s2, %s84_s2 }
  0xbb   :  { %p9017_p5 = scmp.ne.s32.totalorder %s84_s2, %s9016_s3  ;;  %p9022_p7 = scmp.lt.s32.totalorder %s9016_s3, %s9016_s3 }
  0xbd   :  { %p9023_p8 = por %p9022_p7, %p9021_p6 }
  0xbf   :  { %p9024_p9 = pnand %p9023_p8, %p9017_p5 }
  0xc1   :  { %9027 = shalt.err (!%p9024_p9)
}
  0xc2   :  { %86 = dma.hbm_to_vmem [thread:$0]  %s9819_s4, 96, %s84_s2, [#allocation9]  }
  0xc3   :  { %s9262_s24 = smov [#allocation13]   ;;  %s9263_s25 = smov [#allocation16]  }
  0xc4   :  { %s105_s23 = sshll.u32 %s9262_s24, 4  ;;  %s127_s16 = sshll.u32 %s9263_s25, 4  ;;  %s106_s23 = int_to_ptr.vmem [resolvable:$true] %s105_s23  ;;  %s128_s16 = int_to_ptr.vmem [resolvable:$true] %s127_s16 }
  0xc5   :  { %s9028_s20 = scalar_lea.hbm %s9821_s6, 96 }
  0xc6   :  { %p9029_p10 = scmp.ne.s32.totalorder %s9821_s6, %s9028_s20  ;;  %p9032_p11 = scmp.lt.u32.totalorder %s9028_s20, %s9821_s6 }
  0xc8   :  { %p9034_p12 = pnand %p9032_p11, %p9029_p10 }
  0xca   :  { %9037 = shalt.err (!%p9034_p12)
}
  0xcb   :  { %s9038_s4 = scalar_lea.vmem %s106_s23, 96  ;;  %p9043_p0 = scmp.lt.s32.totalorder %s106_s23, %s106_s23 }
  0xcc   :  { %p9039_p13 = scmp.ne.s32.totalorder %s106_s23, %s9038_s4  ;;  %p9044_p1 = scmp.lt.s32.totalorder %s9038_s4, %s9038_s4 }
  0xce   :  { %p9045_p2 = por %p9044_p1, %p9043_p0 }
  0xd0   :  { %p9046_p3 = pnand %p9045_p2, %p9039_p13 }
  0xd2   :  { %9049 = shalt.err (!%p9046_p3)
}
  0xd3   :  { %108 = dma.hbm_to_vmem [thread:$0]  %s9821_s6, 96, %s106_s23, [#allocation12]  }
  0xd4   :  { %s9050_s5 = scalar_lea.hbm %s9823_s8, 32 }
  0xd5   :  { %p9051_p4 = scmp.ne.s32.totalorder %s9823_s8, %s9050_s5  ;;  %p9054_p5 = scmp.lt.u32.totalorder %s9050_s5, %s9823_s8 }
  0xd7   :  { %p9056_p6 = pnand %p9054_p5, %p9051_p4 }
  0xd9   :  { %9059 = shalt.err (!%p9056_p6)
}
  0xda   :  { %s9060_s24 = scalar_lea.vmem %s128_s16, 32  ;;  %p9065_p8 = scmp.lt.s32.totalorder %s128_s16, %s128_s16 }
  0xdb   :  { %p9061_p7 = scmp.ne.s32.totalorder %s128_s16, %s9060_s24  ;;  %p9066_p9 = scmp.lt.s32.totalorder %s9060_s24, %s9060_s24 }
  0xdd   :  { %p9067_p10 = por %p9066_p9, %p9065_p8 }
  0xdf   :  { %p9068_p11 = pnand %p9067_p10, %p9061_p7 }
  0xe1   :  { %9071 = shalt.err (!%p9068_p11)
}
  0xe2   :  { %130 = dma.hbm_to_vmem [thread:$0]  %s9823_s8, 32, %s128_s16, [#allocation15]  }
  0xe3   :  { %s9264_s25 = smov [#allocation19]   ;;  %s9265_s30 = smov [#allocation22]  }
  0xe4   :  { %s148_s9 = sshll.u32 %s9264_s25, 4  ;;  %s170_s20 = sshll.u32 %s9265_s30, 4  ;;  %s149_s9 = int_to_ptr.vmem [resolvable:$true] %s148_s9  ;;  %s9536_s20 = int_to_ptr.vmem [resolvable:$true] %s170_s20 }
  0xe5   :  { %s9072_s21 = scalar_lea.hbm %s9825_s10, 6144 }
  0xe6   :  { %p9073_p12 = scmp.ne.s32.totalorder %s9825_s10, %s9072_s21  ;;  %p9076_p13 = scmp.lt.u32.totalorder %s9072_s21, %s9825_s10 }
  0xe8   :  { %p9078_p0 = pnand %p9076_p13, %p9073_p12 }
  0xea   :  { %9081 = shalt.err (!%p9078_p0)
}
  0xeb   :  { %s9082_s8 = scalar_lea.vmem %s149_s9, 6144  ;;  %p9087_p2 = scmp.lt.s32.totalorder %s149_s9, %s149_s9 }
  0xec   :  { %p9083_p1 = scmp.ne.s32.totalorder %s149_s9, %s9082_s8  ;;  %p9088_p3 = scmp.lt.s32.totalorder %s9082_s8, %s9082_s8 }
  0xee   :  { %p9089_p4 = por %p9088_p3, %p9087_p2 }
  0xf0   :  { %p9090_p5 = pnand %p9089_p4, %p9083_p1 }
  0xf2   :  { %9093 = shalt.err (!%p9090_p5)
}
  0xf3   :  { %154 = dma.hbm_to_vmem [thread:$0]  %s9825_s10, 6144, %s149_s9, [#allocation18], %s9250_s28, %s9250_s28, %s9251_s1  }
  0xf4   :  { %s9094_s22 = scalar_lea.hbm %s9827_s12, 36864 }
  0xf5   :  { %p9095_p6 = scmp.ne.s32.totalorder %s9827_s12, %s9094_s22  ;;  %p9098_p7 = scmp.lt.u32.totalorder %s9094_s22, %s9827_s12 }
  0xf7   :  { %p9100_p8 = pnand %p9098_p7, %p9095_p6 }
  0xf9   :  { %9103 = shalt.err (!%p9100_p8)
}
  0xfa   :  { %s9104_s6 = scalar_lea.vmem %s9536_s20, 36864  ;;  %p9109_p10 = scmp.lt.s32.totalorder %s9536_s20, %s9536_s20 }
  0xfb   :  { %p9105_p9 = scmp.ne.s32.totalorder %s9536_s20, %s9104_s6  ;;  %p9110_p11 = scmp.lt.s32.totalorder %s9104_s6, %s9104_s6 }
  0xfd   :  { %p9111_p12 = por %p9110_p11, %p9109_p10 }
  0xff   :  { %p9112_p13 = pnand %p9111_p12, %p9105_p9 }
 0x101   :  { %9115 = shalt.err (!%p9112_p13)
}
 0x102   :  { %176 = dma.hbm_to_vmem [thread:$0]  %s9827_s12, 36864, %s9536_s20, [#allocation21], %s9250_s28, %s9250_s28, %s9251_s1  }
 0x103   :  { %s9266_s25 = smov [#allocation25]   ;;  %s9116_s0 = scalar_lea.hbm %s9829_s14, 6144 }
 0x104   :  { %s192_s9 = sshll.u32 %s9266_s25, 4  ;;  %p9117_p0 = scmp.ne.s32.totalorder %s9829_s14, %s9116_s0  ;;  %s193_s9 = int_to_ptr.vmem [resolvable:$true] %s192_s9 }
 0x105   :  { %p9120_p1 = scmp.lt.u32.totalorder %s9116_s0, %s9829_s14 }
 0x107   :  { %p9122_p2 = pnand %p9120_p1, %p9117_p0 }
 0x109   :  { %9125 = shalt.err (!%p9122_p2)
}
 0x10a   :  { %s9126_s29 = scalar_lea.vmem %s193_s9, 6144  ;;  %p9131_p4 = scmp.lt.s32.totalorder %s193_s9, %s193_s9 }
 0x10b   :  { %p9127_p3 = scmp.ne.s32.totalorder %s193_s9, %s9126_s29  ;;  %p9132_p5 = scmp.lt.s32.totalorder %s9126_s29, %s9126_s29 }
 0x10d   :  { %p9133_p6 = por %p9132_p5, %p9131_p4 }
 0x10f   :  { %p9134_p7 = pnand %p9133_p6, %p9127_p3 }
 0x111   :  { %9137 = shalt.err (!%p9134_p7)
}
 0x112   :  { %s9267_s12 = smov 64   ;;  %s9268_s28 = smov 4  }
 0x113   :  { %198 = dma.hbm_to_vmem [thread:$0]  %s9829_s14, 6144, %s193_s9, [#allocation24], %s9267_s12, %s9267_s12, %s9268_s28  }
 0x114   :  { %s9269_s8 = smov [#allocation26]   ;;  %s9138_s5 = scalar_lea.hbm %s9830_s15, 16 }
 0x115   :  { %s205_s16 = sshll.u32 %s9269_s8, 4  ;;  %p9139_p8 = scmp.ne.s32.totalorder %s9830_s15, %s9138_s5  ;;  %s206_s16 = int_to_ptr.vmem [resolvable:$true] %s205_s16 }
 0x116   :  { %p9142_p9 = scmp.lt.u32.totalorder %s9138_s5, %s9830_s15 }
 0x118   :  { %p9144_p10 = pnand %p9142_p9, %p9139_p8 }
 0x11a   :  { %9147 = shalt.err (!%p9144_p10)
}
 0x11b   :  { %s9148_s24 = scalar_lea.vmem %s206_s16, 16  ;;  %s9152_s14 = scalar_lea.vmem %s206_s16, 32 }
 0x11c   :  { %p9149_p11 = scmp.ne.s32.totalorder %s206_s16, %s9148_s24  ;;  %p9153_p12 = scmp.lt.s32.totalorder %s206_s16, %s206_s16 }
 0x11d   :  { %p9154_p13 = scmp.lt.s32.totalorder %s9152_s14, %s9148_s24 }
 0x11f   :  { %p9155_p0 = por %p9154_p13, %p9153_p12 }
 0x121   :  { %p9156_p1 = pnand %p9155_p0, %p9149_p11 }
 0x123   :  { %9159 = shalt.err (!%p9156_p1)
}
 0x124   :  { %208 = dma.hbm_to_vmem [thread:$0]  %s9830_s15, 16, %s206_s16, [#allocation27]  }
 0x125   :  { %9226 = dma.done.wait [#allocation3], 128  }
 0x126   :  { %9227 = vsyncadd [#allocation3], 4294967168 }
 0x127   :  { %9228 = dma.done.wait [#allocation6], 256  }
 0x128   :  { %9229 = vsyncadd [#allocation6], 4294967040 }
 0x129   :  { %9230 = dma.done.wait [#allocation9], 1248  }
 0x12a   :  { %9231 = vsyncadd [#allocation9], 4294966048 }
 0x12b   :  { %9232 = dma.done.wait [#allocation12], 36960  }
 0x12c   :  { %9233 = vsyncadd [#allocation12], 4294930336 }
 0x12d   :  { %9234 = dma.done.wait [#allocation15], 12320  }
 0x12e   :  { %9235 = vsyncadd [#allocation15], 4294954976 }
 0x12f   :  { %9236 = dma.done.wait [#allocation18], 6912  }
 0x130   :  { %9237 = vsyncadd [#allocation18], 4294960384 }
 0x131   :  { %9238 = dma.done.wait [#allocation21], 36960  }
 0x132   :  { %9239 = vsyncadd [#allocation21], 4294930336 }
 0x133   :  { %9240 = dma.done.wait [#allocation24], 6240  }
 0x134   :  { %9241 = vsyncadd [#allocation24], 4294961056 }
 0x135   :  { %9242 = dma.done.wait [#allocation27], 16  }
 0x136   :  { %9243 = vsyncadd [#allocation27], 4294967280  ;;  %v9270_v0 = vmov 0   ;;  %v7652_v1 = vld [vmem:[#allocation8 + $0x4] ss:$24 sps:$4 sm:$0xff]   ;;  %vm352_vm0 = vcmask 1041408  }
 0x137   :  { %403 = vmatprep.mubr.bf16.mxu0 %v9270_v0  ;;  %v7654_v2 = vld [vmem:[#allocation8] ss:$24 sps:$4 sm:$0xff]   ;;  %v268_v3 = vld [vmem:[#allocation8 + $0x30] sm:$0x33]  ;;  %371 = vmatprep.subr.bf16.mxu0 %v7652_v1  ;;  %v258_v6 = vld [vmem:[#allocation2] sm:$0xff]  ;;  %vm348_vm1 = vcmask 162816  }
 0x138   :  { %v6703_v4 = vcombine.high %v268_v3, %v268_v3  ;;  %v6702_v5 = vcombine.low %v268_v3, %v268_v3  ;;  %372 = vmatpush1.bf16.msra.mxu0 %v7654_v2  ;;  %v7659_v8 = vld [vmem:[#allocation8 + $0xc] ss:$24 sps:$4 sm:$0xff]   ;;  %v269_v9 = vld [vmem:[#allocation8 + $0x38] sm:$0x33]  ;;  %v259_v10 = vpack.c.bf16 %v258_v6, %v258_v6  ;;  %v7657_v13 = vld [vmem:[#allocation8 + $0x8] ss:$24 sps:$4 sm:$0xff]  }
 0x139   :  { %v7667_v11 = vld [vmem:[#allocation11 + $0x4] ss:$24 sps:$4 sm:$0xff]   ;;  %v7669_v12 = vld [vmem:[#allocation11] ss:$24 sps:$4 sm:$0xff]   ;;  %v7670_v14 = vld [vmem:[#allocation11 + $0x34] ss:$24 sps:$4 sm:$0xff]   ;;  %v6705_v15 = vcombine.high %v269_v9, %v269_v9  ;;  %v6704_v16 = vcombine.low %v269_v9, %v269_v9 }
 0x13a   :  { %6708 = vmatprep.subr.msk.bf16.mxu0 %vm352_vm0, %v6703_v4  ;;  %v354_v7 = vsel %vm352_vm0, %v6702_v5, 0  ;;  %2266 = vmatprep.subr.bf16.mxu1 %v7667_v11  ;;  %v7672_v17 = vld [vmem:[#allocation11 + $0x30] ss:$24 sps:$4 sm:$0xff]   ;;  %v7673_v18 = vld [vmem:[#allocation11 + $0x64] ss:$24 sps:$4 sm:$0xff]   ;;  %vm3813_vm2 = vcmask 130048  }
 0x13b   :  { %2267 = vmatpush1.bf16.msra.mxu1 %v7669_v12  ;;  %v360_v19 = vsel %vm352_vm0, %v6704_v16, 0  ;;  %v7664_v20 = vld [vmem:[#allocation8 + $0x14] ss:$24 sps:$4 sm:$0xff]   ;;  %v270_v21 = vld [vmem:[#allocation8 + $0x40] sm:$0x33]  ;;  %s9271_s15 = smov [#allocation29]  }
 0x13c   :  { %374 = vmatpush1.bf16.msra.mxu0 %v354_v7  ;;  %2268 = vmatprep.subr.bf16.mxu1 %v7670_v14  ;;  %v7678_v22 = vld [vmem:[#allocation11 + $0x60] ss:$24 sps:$4 sm:$0xff]   ;;  %v7679_v23 = vld [vmem:[#allocation11 + $0x94] ss:$24 sps:$4 sm:$0xff]   ;;  %v6707_v25 = vcombine.high %v270_v21, %v270_v21  ;;  %v6706_v26 = vcombine.low %v270_v21, %v270_v21  ;;  %v7684_v27 = vld [vmem:[#allocation11 + $0x90] ss:$24 sps:$4 sm:$0xff]  }
 0x13d   :  { %412 = vmatprep.subr.bf16.mxu0 %v7659_v8  ;;  %v7662_v24 = vld [vmem:[#allocation8 + $0x10] ss:$24 sps:$4 sm:$0xff]   ;;  %v7691_v32 = vld [vmem:[#allocation11 + $0xf4] ss:$24 sps:$4 sm:$0xff]   ;;  %v7696_v35 = vld [vmem:[#allocation11 + $0xf0] ss:$24 sps:$4 sm:$0xff]  }
 0x13e   :  { %v7685_v28 = vld [vmem:[#allocation11 + $0xc4] ss:$24 sps:$4 sm:$0xff]   ;;  %v366_v29 = vsel %vm352_vm0, %v6706_v26, 0  ;;  %v7690_v31 = vld [vmem:[#allocation11 + $0xc0] ss:$24 sps:$4 sm:$0xff]   ;;  %s6662_s23 = sshll.u32 %s9271_s15, 4  ;;  %s6663_s23 = int_to_ptr.vmem [resolvable:$true] %s6662_s23 }
 0x13f   :  { %6709 = vmatmul.mubr.msk.bf16.vlgmr.msra.gmra.mrb[0].mxu0 %vm348_vm1, %v259_v10  ;;  %2269 = vmatpush1.bf16.msra.mxu1 %v7672_v17  ;;  %v7677_v30 = vld [vmem:[#allocation11 + $0x30c] ss:$24 sps:$4 sm:$0xff]   ;;  %v7675_v33 = vld [vmem:[#allocation11 + $0x308] ss:$24 sps:$4 sm:$0xff]   ;;  %v7683_v34 = vld [vmem:[#allocation11 + $0x33c] ss:$24 sps:$4 sm:$0xff]   ;;  %p9165_p3 = scmp.lt.s32.totalorder %s6663_s23, %s6663_s23 }
 0x140   :  { %413 = vmatpush1.bf16.msra.mxu0 %v7657_v13  ;;  %444 = vmatprep.mubr.bf16.mxu0 %v9270_v0  ;;  %v7697_v36 = vld [vmem:[#allocation11 + $0x124] ss:$24 sps:$4 sm:$0xff]   ;;  %v7681_v37 = vld [vmem:[#allocation11 + $0x338] ss:$24 sps:$4 sm:$0xff]   ;;  %v7703_v40 = vld [vmem:[#allocation11 + $0x154] ss:$24 sps:$4 sm:$0xff]  }
 0x141   :  { %6710 = vmatprep.subr.msk.bf16.mxu0 %vm352_vm0, %v6705_v15  ;;  %2270 = vmatprep.subr.bf16.mxu1 %v7673_v18  ;;  %v7689_v38 = vld [vmem:[#allocation11 + $0x36c] ss:$24 sps:$4 sm:$0xff]   ;;  %v7702_v39 = vld [vmem:[#allocation11 + $0x120] ss:$24 sps:$4 sm:$0xff]   ;;  %v7695_v42 = vld [vmem:[#allocation11 + $0x39c] ss:$24 sps:$4 sm:$0xff]  }
 0x142   :  { %v7687_v41 = vld [vmem:[#allocation11 + $0x368] ss:$24 sps:$4 sm:$0xff]   ;;  %v7709_v44 = vld [vmem:[#allocation11 + $0x184] ss:$24 sps:$4 sm:$0xff]   ;;  %v7693_v45 = vld [vmem:[#allocation11 + $0x398] ss:$24 sps:$4 sm:$0xff]  }
 0x143   :  { %2271 = vmatpush1.bf16.msra.mxu1 %v7678_v22  ;;  %v7708_v43 = vld [vmem:[#allocation11 + $0x150] ss:$24 sps:$4 sm:$0xff]   ;;  %v7701_v46 = vld [vmem:[#allocation11 + $0x3cc] ss:$24 sps:$4 sm:$0xff]   ;;  %v7714_v47 = vld [vmem:[#allocation11 + $0x180] ss:$24 sps:$4 sm:$0xff]  }
 0x144   :  { %415 = vmatpush1.bf16.msra.mxu0 %v360_v19  ;;  %2272 = vmatprep.subr.bf16.mxu1 %v7679_v23  ;;  %v7715_v48 = vld [vmem:[#allocation11 + $0x1b4] ss:$24 sps:$4 sm:$0xff]   ;;  %v7699_v49 = vld [vmem:[#allocation11 + $0x3c8] ss:$24 sps:$4 sm:$0xff]   ;;  %v7721_v52 = vld [vmem:[#allocation11 + $0x1e4] ss:$24 sps:$4 sm:$0xff]  }
 0x145   :  { %453 = vmatprep.subr.bf16.mxu0 %v7664_v20  ;;  %v7707_v50 = vld [vmem:[#allocation11 + $0x3fc] ss:$24 sps:$4 sm:$0xff]   ;;  %v7720_v51 = vld [vmem:[#allocation11 + $0x1b0] ss:$24 sps:$4 sm:$0xff]   ;;  %v7713_v54 = vld [vmem:[#allocation11 + $0x42c] ss:$24 sps:$4 sm:$0xff]  }
 0x146   :  { %v7705_v53 = vld [vmem:[#allocation11 + $0x3f8] ss:$24 sps:$4 sm:$0xff]   ;;  %v7727_v56 = vld [vmem:[#allocation11 + $0x214] ss:$24 sps:$4 sm:$0xff]   ;;  %v7711_v57 = vld [vmem:[#allocation11 + $0x428] ss:$24 sps:$4 sm:$0xff]  }
 0x147   :  { %6711 = vmatmul.mubr.msk.bf16.vlgmr.msra.gmra.mrb[4].mxu0 %vm348_vm1, %v259_v10  ;;  %2273 = vmatpush1.bf16.msra.mxu1 %v7684_v27  ;;  %v7726_v55 = vld [vmem:[#allocation11 + $0x1e0] ss:$24 sps:$4 sm:$0xff]   ;;  %v7719_v58 = vld [vmem:[#allocation11 + $0x45c] ss:$24 sps:$4 sm:$0xff]   ;;  %v7732_v59 = vld [vmem:[#allocation11 + $0x210] ss:$24 sps:$4 sm:$0xff]  }
 0x148   :  { %454 = vmatpush1.bf16.msra.mxu0 %v7662_v24  ;;  %485 = vmatprep.mubr.bf16.mxu0 %v9270_v0  ;;  %v7733_v60 = vld [vmem:[#allocation11 + $0x244] ss:$24 sps:$4 sm:$0xff]   ;;  %v7717_v61 = vld [vmem:[#allocation11 + $0x458] ss:$24 sps:$4 sm:$0xff]   ;;  %v7739_v1 = vld [vmem:[#allocation11 + $0x274] ss:$24 sps:$4 sm:$0xff]   ;;  %v273_v24 = vlaneseq }
 0x149   :  { %6712 = vmatprep.subr.msk.bf16.mxu0 %vm352_vm0, %v6707_v25  ;;  %2274 = vmatprep.subr.bf16.mxu1 %v7685_v28  ;;  %v7725_v62 = vld [vmem:[#allocation11 + $0x48c] ss:$24 sps:$4 sm:$0xff]   ;;  %v7738_v63 = vld [vmem:[#allocation11 + $0x240] ss:$24 sps:$4 sm:$0xff]   ;;  %v7731_v3 = vld [vmem:[#allocation11 + $0x4bc] ss:$24 sps:$4 sm:$0xff]  }
 0x14a   :  { %v7723_v2 = vld [vmem:[#allocation11 + $0x488] ss:$24 sps:$4 sm:$0xff]   ;;  %v7729_v5 = vld [vmem:[#allocation11 + $0x4b8] ss:$24 sps:$4 sm:$0xff]   ;;  %v7737_v6 = vld [vmem:[#allocation11 + $0x4ec] ss:$24 sps:$4 sm:$0xff]  }
 0x14b   :  { %2275 = vmatpush1.bf16.msra.mxu1 %v7690_v31  ;;  %v7744_v4 = vld [vmem:[#allocation11 + $0x270] ss:$24 sps:$4 sm:$0xff]   ;;  %v7743_v8 = vld [vmem:[#allocation11 + $0x51c] ss:$24 sps:$4 sm:$0xff]   ;;  %v7749_v11 = vld [vmem:[#allocation11 + $0x54c] ss:$24 sps:$4 sm:$0xff]  }
 0x14c   :  { %456 = vmatpush1.bf16.msra.mxu0 %v366_v29  ;;  %2276 = vmatprep.subr.bf16.mxu1 %v7691_v32  ;;  %v7735_v7 = vld [vmem:[#allocation11 + $0x4e8] ss:$24 sps:$4 sm:$0xff]   ;;  %v7741_v9 = vld [vmem:[#allocation11 + $0x518] ss:$24 sps:$4 sm:$0xff]   ;;  %v7751_v14 = vld [vmem:[#allocation11 + $0x2d4] ss:$24 sps:$4 sm:$0xff]  }
 0x14d   :  { %2430 = vmatprep.subr.bf16.mxu0 %v7677_v30  ;;  %v7747_v12 = vld [vmem:[#allocation11 + $0x548] ss:$24 sps:$4 sm:$0xff]   ;;  %v7755_v15 = vld [vmem:[#allocation11 + $0x57c] ss:$24 sps:$4 sm:$0xff]   ;;  %v7753_v16 = vld [vmem:[#allocation11 + $0x578] ss:$24 sps:$4 sm:$0xff]  }
 0x14e   :  { %v7750_v13 = vld [vmem:[#allocation11 + $0x2a0] ss:$24 sps:$4 sm:$0xff]   ;;  %v7756_v17 = vld [vmem:[#allocation11 + $0x2d0] ss:$24 sps:$4 sm:$0xff]   ;;  %v7759_v18 = vld [vmem:[#allocation11 + $0x304] ss:$24 sps:$4 sm:$0xff]  }
 0x14f   :  { %6713 = vmatmul.mubr.msk.bf16.vlgmr.msra.gmra.mrb[8].mxu0 %vm348_vm1, %v259_v10  ;;  %2277 = vmatpush1.bf16.msra.mxu1 %v7696_v35  ;;  %v7745_v10 = vld [vmem:[#allocation11 + $0x2a4] ss:$24 sps:$4 sm:$0xff]   ;;  %v7760_v20 = vld [vmem:[#allocation11 + $0x5a8] ss:$24 sps:$4 sm:$0xff]   ;;  %v7766_v22 = vld [vmem:[#allocation11 + $0x5d8] ss:$24 sps:$4 sm:$0xff]  }
 0x150   :  { %2431 = vmatpush1.bf16.msra.mxu0 %v7675_v33  ;;  %2278 = vmatprep.subr.bf16.mxu1 %v7697_v36  ;;  %v7762_v19 = vld [vmem:[#allocation11 + $0x5ac] ss:$24 sps:$4 sm:$0xff]   ;;  %v7768_v21 = vld [vmem:[#allocation11 + $0x5dc] ss:$24 sps:$4 sm:$0xff]   ;;  %v9609_v25 = vshrl.u32 %v273_v24, 7  ;;  %s9160_s25 = scalar_lea.vmem %s6663_s23, 128 }
 0x151   :  { %2432 = vmatprep.subr.bf16.mxu0 %v7683_v34  ;;  %v7774_v23 = vld [vmem:[#allocation11 + $0x60c] ss:$24 sps:$4 sm:$0xff]   ;;  %v9614_v27 = vld [vmem:[#allocation10] sm:$0x3f]  ;;  %p9161_p2 = scmp.ne.s32.totalorder %s6663_s23, %s9160_s25  ;;  %p9166_p4 = scmp.lt.s32.totalorder %s9160_s25, %s9160_s25 }
 0x152   :  { %v9612_v26 = vsub.s32 0, %v9609_v25  ;;  %v9617_v28 = vsub.s32 1, %v9609_v25  ;;  %v9624_v34 = vsub.s32 2, %v9609_v25  ;;  %v7804_v24 = vld [vmem:[#allocation11 + $0x6fc] ss:$24 sps:$4 sm:$0xff]  }
 0x153   :  { %2279 = vmatpush1.bf16.msra.mxu1 %v7702_v39  ;;  %p9167_p5 = por %p9166_p4, %p9165_p3 }
 0x154   :  { %2433 = vmatpush1.bf16.msra.mxu0 %v7681_v37  ;;  %2280 = vmatprep.subr.bf16.mxu1 %v7703_v40  ;;  %v276_v29 = vrot.slane %v9614_v27, %v9612_v26  ;;  %v280_v30 = vrot.slane %v9614_v27, %v9617_v28  ;;  %v9627_v37 = vsub.s32 3, %v9609_v25 }
 0x155   :  { %2434 = vmatprep.subr.bf16.mxu0 %v7689_v38  ;;  %p9168_p6 = pnand %p9167_p5, %p9161_p2 }
 0x157   :  { %2281 = vmatpush1.bf16.msra.mxu1 %v7708_v43 }
 0x158   :  { %2435 = vmatpush1.bf16.msra.mxu0 %v7687_v41  ;;  %2282 = vmatprep.subr.bf16.mxu1 %v7709_v44  ;;  %v7757_v41 = vld [vmem:[#allocation11 + $0x300] ss:$24 sps:$4 sm:$0xff]   ;;  %v288_v44 = vrot.slane %v9614_v27, %v9627_v37 }
 0x159   :  { %2436 = vmatprep.subr.bf16.mxu0 %v7695_v42  ;;  %v284_v42 = vrot.slane %v9614_v27, %v9624_v34 }
 0x15b   :  { %2283 = vmatpush1.bf16.msra.mxu1 %v7714_v47 }
 0x15c   :  { %2437 = vmatpush1.bf16.msra.mxu0 %v7693_v45  ;;  %2284 = vmatprep.subr.bf16.mxu1 %v7715_v48  ;;  %v7763_v48 = vld [vmem:[#allocation11 + $0x330] ss:$24 sps:$4 sm:$0xff]  }
 0x15d   :  { %2438 = vmatprep.subr.bf16.mxu0 %v7701_v46  ;;  %v7765_v46 = vld [vmem:[#allocation11 + $0x334] ss:$24 sps:$4 sm:$0xff]  }
 0x15f   :  { %2285 = vmatpush1.bf16.msra.mxu1 %v7720_v51 }
 0x160   :  { %2439 = vmatpush1.bf16.msra.mxu0 %v7699_v49  ;;  %2286 = vmatprep.subr.bf16.mxu1 %v7721_v52  ;;  %v7771_v52 = vld [vmem:[#allocation11 + $0x364] ss:$24 sps:$4 sm:$0xff]  }
 0x161   :  { %2440 = vmatprep.subr.bf16.mxu0 %v7707_v50 }
 0x163   :  { %2287 = vmatpush1.bf16.msra.mxu1 %v7726_v55 }
 0x164   :  { %2441 = vmatpush1.bf16.msra.mxu0 %v7705_v53  ;;  %2288 = vmatprep.subr.bf16.mxu1 %v7727_v56 }
 0x165   :  { %2442 = vmatprep.subr.bf16.mxu0 %v7713_v54  ;;  %v9640_v54 = vsub.s32 5, %v9609_v25 }
 0x167   :  { %2289 = vmatpush1.bf16.msra.mxu1 %v7732_v59  ;;  %v7772_v59 = vld [vmem:[#allocation11 + $0x608] ss:$24 sps:$4 sm:$0xff]  }
 0x168   :  { %2443 = vmatpush1.bf16.msra.mxu0 %v7711_v57  ;;  %2290 = vmatprep.subr.bf16.mxu1 %v7733_v60 }
 0x169   :  { %2444 = vmatprep.subr.bf16.mxu0 %v7719_v58  ;;  %v7769_v58 = vld [vmem:[#allocation11 + $0x360] ss:$24 sps:$4 sm:$0xff]  }
 0x16b   :  { %2291 = vmatpush1.bf16.msra.mxu1 %v7738_v63  ;;  %v7780_v63 = vld [vmem:[#allocation11 + $0x63c] ss:$24 sps:$4 sm:$0xff]  }
 0x16c   :  { %2445 = vmatpush1.bf16.msra.mxu0 %v7717_v61  ;;  %2292 = vmatprep.subr.bf16.mxu1 %v7739_v1  ;;  %v296_v1 = vrot.slane %v9614_v27, %v9640_v54 }
 0x16d   :  { %2446 = vmatprep.subr.bf16.mxu0 %v7725_v62  ;;  %v7777_v62 = vld [vmem:[#allocation11 + $0x394] ss:$24 sps:$4 sm:$0xff]  }
 0x16f   :  { %2293 = vmatpush1.bf16.msra.mxu1 %v7744_v4 }
 0x170   :  { %2447 = vmatpush1.bf16.msra.mxu0 %v7723_v2  ;;  %2294 = vmatprep.subr.bf16.mxu1 %v7745_v10  ;;  %v7775_v2 = vld [vmem:[#allocation11 + $0x390] ss:$24 sps:$4 sm:$0xff]  }
 0x171   :  { %2448 = vmatprep.subr.bf16.mxu0 %v7731_v3  ;;  %v7778_v3 = vld [vmem:[#allocation11 + $0x638] ss:$24 sps:$4 sm:$0xff]  }
 0x173   :  { %2295 = vmatpush1.bf16.msra.mxu1 %v7750_v13 }
 0x174   :  { %2449 = vmatpush1.bf16.msra.mxu0 %v7729_v5  ;;  %2296 = vmatprep.subr.bf16.mxu1 %v7751_v14  ;;  %v7789_v14 = vld [vmem:[#allocation11 + $0x3f4] ss:$24 sps:$4 sm:$0xff]  }
 0x175   :  { %2450 = vmatprep.subr.bf16.mxu0 %v7737_v6  ;;  %v7783_v6 = vld [vmem:[#allocation11 + $0x3c4] ss:$24 sps:$4 sm:$0xff]  }
 0x177   :  { %2297 = vmatpush1.bf16.msra.mxu1 %v7756_v17  ;;  %v7787_v17 = vld [vmem:[#allocation11 + $0x3f0] ss:$24 sps:$4 sm:$0xff]  }
 0x178   :  { %2451 = vmatpush1.bf16.msra.mxu0 %v7735_v7  ;;  %2307 = vmatprep.subr.bf16.mxu1 %v7759_v18  ;;  %v7786_v7 = vld [vmem:[#allocation11 + $0x66c] ss:$24 sps:$4 sm:$0xff]   ;;  %v7790_v18 = vld [vmem:[#allocation11 + $0x698] ss:$24 sps:$4 sm:$0xff]  }
 0x179   :  { %2452 = vmatprep.subr.bf16.mxu0 %v7743_v8 }
 0x17c   :  { %2453 = vmatpush1.bf16.msra.mxu0 %v7741_v9 }
 0x17d   :  { %2454 = vmatprep.subr.bf16.mxu0 %v7749_v11  ;;  %v7781_v11 = vld [vmem:[#allocation11 + $0x3c0] ss:$24 sps:$4 sm:$0xff]  }
 0x180   :  { %2455 = vmatpush1.bf16.msra.mxu0 %v7747_v12  ;;  %v7784_v12 = vld [vmem:[#allocation11 + $0x668] ss:$24 sps:$4 sm:$0xff]  }
 0x181   :  { %2456 = vmatprep.subr.bf16.mxu0 %v7755_v15  ;;  %v7792_v15 = vld [vmem:[#allocation11 + $0x69c] ss:$24 sps:$4 sm:$0xff]  }
 0x184   :  { %2457 = vmatpush1.bf16.msra.mxu0 %v7753_v16 }
 0x185   :  { %2458 = vmatprep.subr.bf16.mxu0 %v7762_v19  ;;  %v7795_v19 = vld [vmem:[#allocation11 + $0x424] ss:$24 sps:$4 sm:$0xff]  }
 0x188   :  { %2459 = vmatpush1.bf16.msra.mxu0 %v7760_v20  ;;  %v7798_v20 = vld [vmem:[#allocation11 + $0x6cc] ss:$24 sps:$4 sm:$0xff]  }
 0x189   :  { %2460 = vmatprep.subr.bf16.mxu0 %v7768_v21  ;;  %v7793_v21 = vld [vmem:[#allocation11 + $0x420] ss:$24 sps:$4 sm:$0xff]  }
 0x18c   :  { %2461 = vmatpush1.bf16.msra.mxu0 %v7766_v22  ;;  %v7796_v22 = vld [vmem:[#allocation11 + $0x6c8] ss:$24 sps:$4 sm:$0xff]  }
 0x18d   :  { %2471 = vmatprep.subr.bf16.mxu0 %v7774_v23  ;;  %v7801_v23 = vld [vmem:[#allocation11 + $0x454] ss:$24 sps:$4 sm:$0xff]  }
 0x212   :  { %v405_v31 = vpop.f32.mrb[0].mxu0 }
 0x213   :  { %v406_v32 = vadd.f32 %v405_v31, %v276_v29  ;;  %v407_v33 = vpop.f32.mrb[1].mxu0  ;;  %v7799_v29 = vld [vmem:[#allocation11 + $0x450] ss:$24 sps:$4 sm:$0xff]   ;;  %v7807_v31 = vld [vmem:[#allocation11 + $0x484] ss:$24 sps:$4 sm:$0xff]  }
 0x214   :  { %v408_v35 = vadd.f32 %v407_v33, %v280_v30  ;;  %v409_v36 = vpop.f32.mrb[2].mxu0  ;;  %v7802_v30 = vld [vmem:[#allocation11 + $0x6f8] ss:$24 sps:$4 sm:$0xff]  }
 0x215   :  { %v494_v38 = vmax.f32 %v406_v32, 0.0  ;;  %v410_v39 = vpop.f32.mrb[3].mxu0  ;;  %v7810_v32 = vld [vmem:[#allocation11 + $0x72c] ss:$24 sps:$4 sm:$0xff]   ;;  %v7805_v33 = vld [vmem:[#allocation11 + $0x480] ss:$24 sps:$4 sm:$0xff]  }
 0x216   :  { %v495_v40 = vmax.f32 %v408_v35, 0.0  ;;  %v7808_v35 = vld [vmem:[#allocation11 + $0x728] ss:$24 sps:$4 sm:$0xff]   ;;  %v7813_v36 = vld [vmem:[#allocation11 + $0x4b4] ss:$24 sps:$4 sm:$0xff]  }
 0x217   :  { %v9635_v45 = vpack.c.bf16 %v494_v38, %v494_v38  ;;  %v7816_v38 = vld [vmem:[#allocation11 + $0x75c] ss:$24 sps:$4 sm:$0xff]   ;;  %v7811_v39 = vld [vmem:[#allocation11 + $0x4b0] ss:$24 sps:$4 sm:$0xff]  }
 0x218   :  { %v9631_v43 = vpack.c.bf16 %v495_v40, %v495_v40  ;;  %v7814_v40 = vld [vmem:[#allocation11 + $0x758] ss:$24 sps:$4 sm:$0xff]  }
 0x21a   :  { %v446_v47 = vpop.f32.mrb[4].mxu0  ;;  %2298 = vmatprep.mubr.bf16.mxu1 %v9631_v43 }
 0x21b   :  { %v447_v49 = vadd.f32 %v446_v47, %v284_v42  ;;  %v448_v50 = vpop.f32.mrb[5].mxu0  ;;  %2299 = vmatmul.mubr.bf16.vlgmr.msra.gmra.mrb[0].mxu1 %v9635_v45  ;;  %v7822_v42 = vld [vmem:[#allocation11 + $0x78c] ss:$24 sps:$4 sm:$0xff]  }
 0x21c   :  { %v449_v51 = vadd.f32 %v448_v50, %v288_v44  ;;  %2308 = vmatpush1.bf16.msra.mxu1 %v7757_v41  ;;  %v450_v53 = vpop.f32.mrb[6].mxu0  ;;  %v7819_v41 = vld [vmem:[#allocation11 + $0x4e4] ss:$24 sps:$4 sm:$0xff]   ;;  %v7817_v44 = vld [vmem:[#allocation11 + $0x4e0] ss:$24 sps:$4 sm:$0xff]  }
 0x21d   :  { %v496_v55 = vmax.f32 %v447_v49, 0.0  ;;  %2309 = vmatprep.subr.bf16.mxu1 %v7765_v46  ;;  %v451_v56 = vpop.f32.mrb[7].mxu0  ;;  %v7820_v46 = vld [vmem:[#allocation11 + $0x788] ss:$24 sps:$4 sm:$0xff]   ;;  %v7825_v47 = vld [vmem:[#allocation11 + $0x514] ss:$24 sps:$4 sm:$0xff]  }
 0x21e   :  { %v497_v57 = vmax.f32 %v449_v51, 0.0  ;;  %v7823_v49 = vld [vmem:[#allocation11 + $0x510] ss:$24 sps:$4 sm:$0xff]   ;;  %v7831_v51 = vld [vmem:[#allocation11 + $0x544] ss:$24 sps:$4 sm:$0xff]  }
 0x21f   :  { %v9642_v60 = vpack.c.bf16 %v496_v55, %v496_v55  ;;  %v7826_v50 = vld [vmem:[#allocation11 + $0x7b8] ss:$24 sps:$4 sm:$0xff]   ;;  %v7832_v55 = vld [vmem:[#allocation11 + $0x7e8] ss:$24 sps:$4 sm:$0xff]   ;;  %v7837_v56 = vld [vmem:[#allocation11 + $0x574] ss:$24 sps:$4 sm:$0xff]  }
 0x220   :  { %v9644_v61 = vpack.c.bf16 %v497_v57, %v497_v57  ;;  %2310 = vmatpush1.bf16.msra.mxu1 %v7763_v48  ;;  %v7828_v48 = vld [vmem:[#allocation11 + $0x7bc] ss:$24 sps:$4 sm:$0xff]   ;;  %v7829_v53 = vld [vmem:[#allocation11 + $0x540] ss:$24 sps:$4 sm:$0xff]  }
 0x221   :  { %2311 = vmatprep.subr.bf16.mxu1 %v7771_v52  ;;  %v7834_v52 = vld [vmem:[#allocation11 + $0x7ec] ss:$24 sps:$4 sm:$0xff]   ;;  %v7840_v57 = vld [vmem:[#allocation11 + $0x81c] ss:$24 sps:$4 sm:$0xff]  }
 0x222   :  { %2462 = vmatprep.mubr.bf16.mxu0 %v9644_v61  ;;  %v9649_v4 = vpop.f32.mrb[8].mxu0  ;;  %2339 = vmatprep.mubr.bf16.mxu1 %v9644_v61 }
 0x223   :  { %2463 = vmatmul.mubr.bf16.vlgmr.msra.gmra.mrb[12].mxu0 %v9642_v60  ;;  %v489_v5 = vpop.f32.mrb[9].mxu0 }
 0x224   :  { %2312 = vmatpush1.bf16.msra.mxu1 %v7769_v58  ;;  %2472 = vmatpush1.bf16.msra.mxu0 %v7772_v59  ;;  %v490_v8 = vadd.f32 %v489_v5, %v296_v1  ;;  %v491_v9 = vpop.f32.mrb[10].mxu0  ;;  %v7835_v58 = vld [vmem:[#allocation11 + $0x570] ss:$24 sps:$4 sm:$0xff]   ;;  %v7841_v1 = vld [vmem:[#allocation11 + $0x5a0] ss:$24 sps:$4 sm:$0xff]  }
 0x225   :  { %2313 = vmatprep.subr.bf16.mxu1 %v7777_v62  ;;  %2473 = vmatprep.subr.bf16.mxu0 %v7780_v63  ;;  %v492_v10 = vpop.f32.mrb[11].mxu0  ;;  %v7838_v59 = vld [vmem:[#allocation11 + $0x818] ss:$24 sps:$4 sm:$0xff]   ;;  %v7843_v62 = vld [vmem:[#allocation11 + $0x5a4] ss:$24 sps:$4 sm:$0xff]  }
 0x226   :  { %v499_v13 = vmax.f32 %v490_v8, 0.0  ;;  %v7846_v63 = vld [vmem:[#allocation11 + $0x84c] ss:$24 sps:$4 sm:$0xff]   ;;  %v7850_v8 = vld [vmem:[#allocation11 + $0x878] ss:$24 sps:$4 sm:$0xff]  }
 0x227   :  { %v7849_v5 = vld [vmem:[#allocation11 + $0x5d4] ss:$24 sps:$4 sm:$0xff]   ;;  %v7855_v10 = vld [vmem:[#allocation11 + $0x604] ss:$24 sps:$4 sm:$0xff]  }
 0x228   :  { %2314 = vmatpush1.bf16.msra.mxu1 %v7775_v2  ;;  %2474 = vmatpush1.bf16.msra.mxu0 %v7778_v3  ;;  %v9653_v16 = vpack.c.bf16 %v499_v13, %v499_v13  ;;  %v7844_v2 = vld [vmem:[#allocation11 + $0x848] ss:$24 sps:$4 sm:$0xff]   ;;  %v9657_v3 = vsub.s32 4, %v9609_v25 }
 0x229   :  { %2315 = vmatprep.subr.bf16.mxu1 %v7783_v6  ;;  %2475 = vmatprep.subr.bf16.mxu0 %v7786_v7  ;;  %v7852_v6 = vld [vmem:[#allocation11 + $0x87c] ss:$24 sps:$4 sm:$0xff]   ;;  %v7847_v7 = vld [vmem:[#allocation11 + $0x5d0] ss:$24 sps:$4 sm:$0xff]  }
 0x22a   :  { %2503 = vmatprep.mubr.bf16.mxu0 %v9653_v16  ;;  %v292_v9 = vrot.slane %v9614_v27, %v9657_v3  ;;  %v7856_v25 = vld [vmem:[#allocation11 + $0x8a8] ss:$24 sps:$4 sm:$0xff]   ;;  %v7862_v27 = vld [vmem:[#allocation11 + $0x8d8] ss:$24 sps:$4 sm:$0xff]  }
 0x22c   :  { %2316 = vmatpush1.bf16.msra.mxu1 %v7781_v11  ;;  %2476 = vmatpush1.bf16.msra.mxu0 %v7784_v12  ;;  %v7858_v11 = vld [vmem:[#allocation11 + $0x8ac] ss:$24 sps:$4 sm:$0xff]   ;;  %v7853_v12 = vld [vmem:[#allocation11 + $0x600] ss:$24 sps:$4 sm:$0xff]   ;;  %v488_v13 = vadd.f32 %v9649_v4, %v292_v9 }
 0x22d   :  { %2317 = vmatprep.subr.bf16.mxu1 %v7789_v14  ;;  %2477 = vmatprep.subr.bf16.mxu0 %v7792_v15  ;;  %v7861_v14 = vld [vmem:[#allocation11 + $0x634] ss:$24 sps:$4 sm:$0xff]   ;;  %v7865_v4 = vld [vmem:[#allocation11 + $0x660] ss:$24 sps:$4 sm:$0xff]  }
 0x22e   :  { %v7864_v15 = vld [vmem:[#allocation11 + $0x8dc] ss:$24 sps:$4 sm:$0xff]   ;;  %v7927_v9 = vld [vmem:[#allocation11 + $0x12c] ss:$24 sps:$4 sm:$0xff]  }
 0x230   :  { %2318 = vmatpush1.bf16.msra.mxu1 %v7787_v17  ;;  %2478 = vmatpush1.bf16.msra.mxu0 %v7790_v18  ;;  %v7859_v17 = vld [vmem:[#allocation11 + $0x630] ss:$24 sps:$4 sm:$0xff]   ;;  %v498_v18 = vmax.f32 %v488_v13, 0.0 }
 0x231   :  { %2319 = vmatprep.subr.bf16.mxu1 %v7795_v19  ;;  %2479 = vmatprep.subr.bf16.mxu0 %v7798_v20  ;;  %v7867_v19 = vld [vmem:[#allocation11 + $0x664] ss:$24 sps:$4 sm:$0xff]   ;;  %v8029_v13 = vld [vmem:[#allocation14 + $0x4] ss:$8 sps:$4 sm:$0xff]  }
 0x232   :  { %v9664_v20 = vpack.c.bf16 %v498_v18, %v498_v18  ;;  %v8033_v18 = vld [vmem:[#allocation14 + $0x10] ss:$8 sps:$4 sm:$0xff]  }
 0x234   :  { %2320 = vmatpush1.bf16.msra.mxu1 %v7793_v21  ;;  %2480 = vmatpush1.bf16.msra.mxu0 %v7796_v22  ;;  %v7870_v21 = vld [vmem:[#allocation11 + $0x694] ss:$24 sps:$4 sm:$0xff]   ;;  %v7868_v22 = vld [vmem:[#allocation11 + $0x690] ss:$24 sps:$4 sm:$0xff]  }
 0x235   :  { %2321 = vmatprep.subr.bf16.mxu1 %v7801_v23  ;;  %2481 = vmatprep.subr.bf16.mxu0 %v7804_v24  ;;  %v7873_v23 = vld [vmem:[#allocation11 + $0x6c4] ss:$24 sps:$4 sm:$0xff]   ;;  %v7871_v24 = vld [vmem:[#allocation11 + $0x6c0] ss:$24 sps:$4 sm:$0xff]  }
 0x238   :  { %2322 = vmatpush1.bf16.msra.mxu1 %v7799_v29  ;;  %2482 = vmatpush1.bf16.msra.mxu0 %v7802_v30  ;;  %v7876_v29 = vld [vmem:[#allocation11 + $0x6f4] ss:$24 sps:$4 sm:$0xff]   ;;  %v7874_v30 = vld [vmem:[#allocation11 + $0x6f0] ss:$24 sps:$4 sm:$0xff]  }
 0x239   :  { %2323 = vmatprep.subr.bf16.mxu1 %v7807_v31  ;;  %2483 = vmatprep.subr.bf16.mxu0 %v7810_v32  ;;  %v7879_v31 = vld [vmem:[#allocation11 + $0x724] ss:$24 sps:$4 sm:$0xff]   ;;  %v7877_v32 = vld [vmem:[#allocation11 + $0x720] ss:$24 sps:$4 sm:$0xff]  }
 0x23c   :  { %2324 = vmatpush1.bf16.msra.mxu1 %v7805_v33  ;;  %2484 = vmatpush1.bf16.msra.mxu0 %v7808_v35  ;;  %v7882_v33 = vld [vmem:[#allocation11 + $0x754] ss:$24 sps:$4 sm:$0xff]   ;;  %v7880_v35 = vld [vmem:[#allocation11 + $0x750] ss:$24 sps:$4 sm:$0xff]  }
 0x23d   :  { %2325 = vmatprep.subr.bf16.mxu1 %v7813_v36  ;;  %2485 = vmatprep.subr.bf16.mxu0 %v7816_v38  ;;  %v7885_v36 = vld [vmem:[#allocation11 + $0x784] ss:$24 sps:$4 sm:$0xff]   ;;  %v7883_v38 = vld [vmem:[#allocation11 + $0x780] ss:$24 sps:$4 sm:$0xff]  }
 0x240   :  { %2326 = vmatpush1.bf16.msra.mxu1 %v7811_v39  ;;  %2486 = vmatpush1.bf16.msra.mxu0 %v7814_v40  ;;  %v7888_v39 = vld [vmem:[#allocation11 + $0x7b4] ss:$24 sps:$4 sm:$0xff]   ;;  %v7886_v40 = vld [vmem:[#allocation11 + $0x7b0] ss:$24 sps:$4 sm:$0xff]  }
 0x241   :  { %2327 = vmatprep.subr.bf16.mxu1 %v7819_v41  ;;  %2487 = vmatprep.subr.bf16.mxu0 %v7822_v42  ;;  %v7891_v41 = vld [vmem:[#allocation11 + $0x7e4] ss:$24 sps:$4 sm:$0xff]   ;;  %v7889_v42 = vld [vmem:[#allocation11 + $0x7e0] ss:$24 sps:$4 sm:$0xff]  }
 0x244   :  { %2328 = vmatpush1.bf16.msra.mxu1 %v7817_v44  ;;  %2488 = vmatpush1.bf16.msra.mxu0 %v7820_v46  ;;  %v7894_v44 = vld [vmem:[#allocation11 + $0x814] ss:$24 sps:$4 sm:$0xff]   ;;  %v7892_v46 = vld [vmem:[#allocation11 + $0x810] ss:$24 sps:$4 sm:$0xff]  }
 0x245   :  { %2329 = vmatprep.subr.bf16.mxu1 %v7825_v47  ;;  %2489 = vmatprep.subr.bf16.mxu0 %v7828_v48  ;;  %v7897_v47 = vld [vmem:[#allocation11 + $0x844] ss:$24 sps:$4 sm:$0xff]   ;;  %v7895_v48 = vld [vmem:[#allocation11 + $0x840] ss:$24 sps:$4 sm:$0xff]  }
 0x248   :  { %2330 = vmatpush1.bf16.msra.mxu1 %v7823_v49  ;;  %2490 = vmatpush1.bf16.msra.mxu0 %v7826_v50  ;;  %v7900_v49 = vld [vmem:[#allocation11 + $0x874] ss:$24 sps:$4 sm:$0xff]   ;;  %v7898_v50 = vld [vmem:[#allocation11 + $0x870] ss:$24 sps:$4 sm:$0xff]  }
 0x249   :  { %2331 = vmatprep.subr.bf16.mxu1 %v7831_v51  ;;  %2491 = vmatprep.subr.bf16.mxu0 %v7834_v52  ;;  %v7903_v51 = vld [vmem:[#allocation11 + $0x8a4] ss:$24 sps:$4 sm:$0xff]   ;;  %v7901_v52 = vld [vmem:[#allocation11 + $0x8a0] ss:$24 sps:$4 sm:$0xff]  }
 0x24c   :  { %2332 = vmatpush1.bf16.msra.mxu1 %v7829_v53  ;;  %2492 = vmatpush1.bf16.msra.mxu0 %v7832_v55  ;;  %v7906_v53 = vld [vmem:[#allocation11 + $0x8d4] ss:$24 sps:$4 sm:$0xff]   ;;  %v7904_v55 = vld [vmem:[#allocation11 + $0x8d0] ss:$24 sps:$4 sm:$0xff]  }
 0x24d   :  { %2333 = vmatprep.subr.bf16.mxu1 %v7837_v56  ;;  %2493 = vmatprep.subr.bf16.mxu0 %v7840_v57  ;;  %v7909_v56 = vld [vmem:[#allocation11 + $0xc] ss:$24 sps:$4 sm:$0xff]   ;;  %v7907_v57 = vld [vmem:[#allocation11 + $0x8] ss:$24 sps:$4 sm:$0xff]  }
 0x250   :  { %2334 = vmatpush1.bf16.msra.mxu1 %v7835_v58  ;;  %2494 = vmatpush1.bf16.msra.mxu0 %v7838_v59  ;;  %v7912_v58 = vld [vmem:[#allocation11 + $0x3c] ss:$24 sps:$4 sm:$0xff]   ;;  %v7910_v59 = vld [vmem:[#allocation11 + $0x38] ss:$24 sps:$4 sm:$0xff]  }
 0x251   :  { %2335 = vmatprep.subr.bf16.mxu1 %v7843_v62  ;;  %2495 = vmatprep.subr.bf16.mxu0 %v7846_v63  ;;  %v7915_v62 = vld [vmem:[#allocation11 + $0x6c] ss:$24 sps:$4 sm:$0xff]   ;;  %v7913_v63 = vld [vmem:[#allocation11 + $0x68] ss:$24 sps:$4 sm:$0xff]  }
 0x254   :  { %2336 = vmatpush1.bf16.msra.mxu1 %v7841_v1  ;;  %2496 = vmatpush1.bf16.msra.mxu0 %v7844_v2  ;;  %v7918_v1 = vld [vmem:[#allocation11 + $0x9c] ss:$24 sps:$4 sm:$0xff]   ;;  %v7916_v2 = vld [vmem:[#allocation11 + $0x98] ss:$24 sps:$4 sm:$0xff]  }
 0x255   :  { %2337 = vmatprep.subr.bf16.mxu1 %v7849_v5  ;;  %2497 = vmatprep.subr.bf16.mxu0 %v7852_v6  ;;  %v7921_v5 = vld [vmem:[#allocation11 + $0xcc] ss:$24 sps:$4 sm:$0xff]   ;;  %v7919_v6 = vld [vmem:[#allocation11 + $0xc8] ss:$24 sps:$4 sm:$0xff]  }
 0x258   :  { %2338 = vmatpush1.bf16.msra.mxu1 %v7847_v7  ;;  %2498 = vmatpush1.bf16.msra.mxu0 %v7850_v8  ;;  %v7924_v7 = vld [vmem:[#allocation11 + $0xfc] ss:$24 sps:$4 sm:$0xff]   ;;  %v7922_v8 = vld [vmem:[#allocation11 + $0xf8] ss:$24 sps:$4 sm:$0xff]  }
 0x259   :  { %2348 = vmatprep.subr.bf16.mxu1 %v7855_v10  ;;  %2499 = vmatprep.subr.bf16.mxu0 %v7858_v11  ;;  %v7925_v10 = vld [vmem:[#allocation11 + $0x128] ss:$24 sps:$4 sm:$0xff]   ;;  %v7930_v11 = vld [vmem:[#allocation11 + $0x15c] ss:$24 sps:$4 sm:$0xff]  }
 0x25b   :  { %2340 = vmatmul.mubr.bf16.vlgmr.msra.gmra.mrb[0].mxu1 %v9642_v60 }
 0x25c   :  { %2349 = vmatpush1.bf16.msra.mxu1 %v7853_v12  ;;  %2500 = vmatpush1.bf16.msra.mxu0 %v7856_v25  ;;  %v7928_v12 = vld [vmem:[#allocation11 + $0x158] ss:$24 sps:$4 sm:$0xff]   ;;  %v7933_v25 = vld [vmem:[#allocation11 + $0x18c] ss:$24 sps:$4 sm:$0xff]  }
 0x25d   :  { %2350 = vmatprep.subr.bf16.mxu1 %v7861_v14  ;;  %2501 = vmatprep.subr.bf16.mxu0 %v7864_v15  ;;  %v8027_v14 = vld [vmem:[#allocation14] ss:$8 sps:$4 sm:$0xff]  }
 0x25e   :  { %2380 = vmatprep.mubr.bf16.mxu1 %v9653_v16  ;;  %v7931_v15 = vld [vmem:[#allocation11 + $0x188] ss:$24 sps:$4 sm:$0xff]  }
 0x260   :  { %2351 = vmatpush1.bf16.msra.mxu1 %v7859_v17  ;;  %2502 = vmatpush1.bf16.msra.mxu0 %v7862_v27  ;;  %v7936_v17 = vld [vmem:[#allocation11 + $0x1bc] ss:$24 sps:$4 sm:$0xff]  }
 0x261   :  { %2352 = vmatprep.subr.bf16.mxu1 %v7867_v19  ;;  %3235 = vmatprep.subr.bf16.mxu0 %v8029_v13  ;;  %v8035_v27 = vld [vmem:[#allocation14 + $0x14] ss:$8 sps:$4 sm:$0xff]   ;;  %v8105_v13 = vld [vmem:[#allocation14 + $0xd0] ss:$8 sps:$4 sm:$0xff]  }
 0x262   :  { %v7934_v19 = vld [vmem:[#allocation11 + $0x1b8] ss:$24 sps:$4 sm:$0xff]  }
 0x263   :  { %2504 = vmatmul.mubr.bf16.vlgmr.msra.gmra.mrb[12].mxu0 %v9664_v20 }
 0x264   :  { %2353 = vmatpush1.bf16.msra.mxu1 %v7865_v4  ;;  %3236 = vmatpush1.bf16.msra.mxu0 %v8027_v14  ;;  %v7939_v4 = vld [vmem:[#allocation11 + $0x1ec] ss:$24 sps:$4 sm:$0xff]  }
 0x265   :  { %2354 = vmatprep.subr.bf16.mxu1 %v7870_v21  ;;  %3237 = vmatprep.subr.bf16.mxu0 %v8035_v27  ;;  %v8039_v21 = vld [vmem:[#allocation14 + $0x20] ss:$8 sps:$4 sm:$0xff]   ;;  %v8107_v14 = vld [vmem:[#allocation14 + $0xd4] ss:$8 sps:$4 sm:$0xff]  }
 0x266   :  { %v8111_v27 = vld [vmem:[#allocation14 + $0xe0] ss:$8 sps:$4 sm:$0xff]  }
 0x268   :  { %2355 = vmatpush1.bf16.msra.mxu1 %v7868_v22  ;;  %3238 = vmatpush1.bf16.msra.mxu0 %v8033_v18  ;;  %v8041_v22 = vld [vmem:[#allocation14 + $0x24] ss:$8 sps:$4 sm:$0xff]  }
 0x269   :  { %2356 = vmatprep.subr.bf16.mxu1 %v7873_v23  ;;  %3239 = vmatprep.subr.bf16.mxu0 %v8041_v22  ;;  %v7937_v23 = vld [vmem:[#allocation11 + $0x1e8] ss:$24 sps:$4 sm:$0xff]  }
 0x26a   :  { %v8113_v18 = vld [vmem:[#allocation14 + $0xe4] ss:$8 sps:$4 sm:$0xff]   ;;  %v8117_v22 = vld [vmem:[#allocation14 + $0xf0] ss:$8 sps:$4 sm:$0xff]  }
 0x26c   :  { %2357 = vmatpush1.bf16.msra.mxu1 %v7871_v24  ;;  %v7942_v24 = vld [vmem:[#allocation11 + $0x21c] ss:$24 sps:$4 sm:$0xff]   ;;  %3240 = vmatpush1.bf16.msra.mxu0 %v8039_v21 }
 0x26d   :  { %2358 = vmatprep.subr.bf16.mxu1 %v7876_v29  ;;  %v8045_v29 = vld [vmem:[#allocation14 + $0x30] ss:$8 sps:$4 sm:$0xff]   ;;  %v8119_v21 = vld [vmem:[#allocation14 + $0xf4] ss:$8 sps:$4 sm:$0xff]  }
 0x270   :  { %2359 = vmatpush1.bf16.msra.mxu1 %v7874_v30  ;;  %v8047_v30 = vld [vmem:[#allocation14 + $0x34] ss:$8 sps:$4 sm:$0xff]  }
 0x271   :  { %2360 = vmatprep.subr.bf16.mxu1 %v7879_v31  ;;  %3241 = vmatprep.subr.bf16.mxu0 %v8047_v30  ;;  %v7940_v31 = vld [vmem:[#allocation11 + $0x218] ss:$24 sps:$4 sm:$0xff]  }
 0x272   :  { %3242 = vmatpush1.bf16.msra.mxu0 %v8045_v29  ;;  %v8125_v29 = vld [vmem:[#allocation14 + $0x104] ss:$8 sps:$4 sm:$0xff]  }
 0x273   :  { %v7979_v30 = vld [vmem:[#allocation11 + $0x190] ss:$24 sps:$4 sm:$0xff]  }
 0x274   :  { %2361 = vmatpush1.bf16.msra.mxu1 %v7877_v32  ;;  %v7945_v32 = vld [vmem:[#allocation11 + $0x24c] ss:$24 sps:$4 sm:$0xff]  }
 0x275   :  { %2362 = vmatprep.subr.bf16.mxu1 %v7882_v33  ;;  %v8051_v33 = vld [vmem:[#allocation14 + $0x40] ss:$8 sps:$4 sm:$0xff]  }
 0x278   :  { %2363 = vmatpush1.bf16.msra.mxu1 %v7880_v35  ;;  %v8053_v35 = vld [vmem:[#allocation14 + $0x44] ss:$8 sps:$4 sm:$0xff]  }
 0x279   :  { %2364 = vmatprep.subr.bf16.mxu1 %v7885_v36  ;;  %3243 = vmatprep.subr.bf16.mxu0 %v8053_v35  ;;  %v7943_v36 = vld [vmem:[#allocation11 + $0x248] ss:$24 sps:$4 sm:$0xff]  }
 0x27a   :  { %3244 = vmatpush1.bf16.msra.mxu0 %v8051_v33  ;;  %v7987_v33 = vld [vmem:[#allocation11 + $0x1f4] ss:$24 sps:$4 sm:$0xff]   ;;  %v7985_v35 = vld [vmem:[#allocation11 + $0x1f0] ss:$24 sps:$4 sm:$0xff]  }
 0x27c   :  { %2365 = vmatpush1.bf16.msra.mxu1 %v7883_v38  ;;  %v7948_v38 = vld [vmem:[#allocation11 + $0x27c] ss:$24 sps:$4 sm:$0xff]  }
 0x27d   :  { %2366 = vmatprep.subr.bf16.mxu1 %v7888_v39  ;;  %v8057_v39 = vld [vmem:[#allocation14 + $0x50] ss:$8 sps:$4 sm:$0xff]  }
 0x280   :  { %2367 = vmatpush1.bf16.msra.mxu1 %v7886_v40  ;;  %v8059_v40 = vld [vmem:[#allocation14 + $0x54] ss:$8 sps:$4 sm:$0xff]  }
 0x281   :  { %2368 = vmatprep.subr.bf16.mxu1 %v7891_v41  ;;  %3245 = vmatprep.subr.bf16.mxu0 %v8059_v40  ;;  %v7946_v41 = vld [vmem:[#allocation11 + $0x278] ss:$24 sps:$4 sm:$0xff]  }
 0x282   :  { %3246 = vmatpush1.bf16.msra.mxu0 %v8057_v39  ;;  %v7993_v39 = vld [vmem:[#allocation11 + $0x254] ss:$24 sps:$4 sm:$0xff]   ;;  %v7991_v40 = vld [vmem:[#allocation11 + $0x250] ss:$24 sps:$4 sm:$0xff]  }
 0x284   :  { %2369 = vmatpush1.bf16.msra.mxu1 %v7889_v42  ;;  %v7951_v42 = vld [vmem:[#allocation11 + $0x2ac] ss:$24 sps:$4 sm:$0xff]  }
 0x285   :  { %2370 = vmatprep.subr.bf16.mxu1 %v7894_v44  ;;  %v8063_v44 = vld [vmem:[#allocation14 + $0x60] ss:$8 sps:$4 sm:$0xff]  }
 0x288   :  { %2371 = vmatpush1.bf16.msra.mxu1 %v7892_v46  ;;  %v8065_v46 = vld [vmem:[#allocation14 + $0x64] ss:$8 sps:$4 sm:$0xff]  }
 0x289   :  { %2372 = vmatprep.subr.bf16.mxu1 %v7897_v47  ;;  %3247 = vmatprep.subr.bf16.mxu0 %v8065_v46  ;;  %v7949_v47 = vld [vmem:[#allocation11 + $0x2a8] ss:$24 sps:$4 sm:$0xff]  }
 0x28a   :  { %3248 = vmatpush1.bf16.msra.mxu0 %v8063_v44  ;;  %v7999_v44 = vld [vmem:[#allocation11 + $0x2b4] ss:$24 sps:$4 sm:$0xff]   ;;  %v7997_v46 = vld [vmem:[#allocation11 + $0x2b0] ss:$24 sps:$4 sm:$0xff]  }
 0x28c   :  { %2373 = vmatpush1.bf16.msra.mxu1 %v7895_v48  ;;  %v7954_v48 = vld [vmem:[#allocation11 + $0x2dc] ss:$24 sps:$4 sm:$0xff]  }
 0x28d   :  { %2374 = vmatprep.subr.bf16.mxu1 %v7900_v49  ;;  %v8069_v49 = vld [vmem:[#allocation14 + $0x70] ss:$8 sps:$4 sm:$0xff]  }
 0x290   :  { %2375 = vmatpush1.bf16.msra.mxu1 %v7898_v50  ;;  %v8071_v50 = vld [vmem:[#allocation14 + $0x74] ss:$8 sps:$4 sm:$0xff]  }
 0x291   :  { %2376 = vmatprep.subr.bf16.mxu1 %v7903_v51  ;;  %3249 = vmatprep.subr.bf16.mxu0 %v8071_v50  ;;  %v7952_v51 = vld [vmem:[#allocation11 + $0x2d8] ss:$24 sps:$4 sm:$0xff]  }
 0x292   :  { %3250 = vmatpush1.bf16.msra.mxu0 %v8069_v49  ;;  %v8005_v49 = vld [vmem:[#allocation11 + $0x314] ss:$24 sps:$4 sm:$0xff]   ;;  %v8003_v50 = vld [vmem:[#allocation11 + $0x310] ss:$24 sps:$4 sm:$0xff]  }
 0x294   :  { %2377 = vmatpush1.bf16.msra.mxu1 %v7901_v52  ;;  %v7957_v52 = vld [vmem:[#allocation11 + $0x14] ss:$24 sps:$4 sm:$0xff]  }
 0x295   :  { %2378 = vmatprep.subr.bf16.mxu1 %v7906_v53  ;;  %v8075_v53 = vld [vmem:[#allocation14 + $0x80] ss:$8 sps:$4 sm:$0xff]  }
 0x298   :  { %2379 = vmatpush1.bf16.msra.mxu1 %v7904_v55  ;;  %v8077_v55 = vld [vmem:[#allocation14 + $0x84] ss:$8 sps:$4 sm:$0xff]  }
 0x299   :  { %2389 = vmatprep.subr.bf16.mxu1 %v7909_v56  ;;  %3251 = vmatprep.subr.bf16.mxu0 %v8077_v55  ;;  %v7955_v56 = vld [vmem:[#allocation11 + $0x10] ss:$24 sps:$4 sm:$0xff]  }
 0x29a   :  { %3252 = vmatpush1.bf16.msra.mxu0 %v8075_v53  ;;  %v8011_v53 = vld [vmem:[#allocation11 + $0x374] ss:$24 sps:$4 sm:$0xff]   ;;  %v8009_v55 = vld [vmem:[#allocation11 + $0x370] ss:$24 sps:$4 sm:$0xff]  }
 0x29b   :  { %2381 = vmatmul.mubr.bf16.vlgmr.msra.gmra.mrb[0].mxu1 %v9664_v20 }
 0x29c   :  { %2390 = vmatpush1.bf16.msra.mxu1 %v7907_v57  ;;  %2421 = vmatprep.mubr.bf16.mxu1 %v9631_v43  ;;  %v7960_v57 = vld [vmem:[#allocation11 + $0x44] ss:$24 sps:$4 sm:$0xff]  }
 0x29d   :  { %2391 = vmatprep.subr.bf16.mxu1 %v7912_v58  ;;  %v8083_v58 = vld [vmem:[#allocation14 + $0x94] ss:$8 sps:$4 sm:$0xff]  }
 0x29e   :  { %3253 = vmatprep.subr.bf16.mxu0 %v8083_v58  ;;  %v8017_v58 = vld [vmem:[#allocation11 + $0x3d4] ss:$24 sps:$4 sm:$0xff]  }
 0x2a0   :  { %2392 = vmatpush1.bf16.msra.mxu1 %v7910_v59  ;;  %v8081_v59 = vld [vmem:[#allocation14 + $0x90] ss:$8 sps:$4 sm:$0xff]  }
 0x2a1   :  { %2393 = vmatprep.subr.bf16.mxu1 %v7915_v62  ;;  %v7958_v62 = vld [vmem:[#allocation11 + $0x40] ss:$24 sps:$4 sm:$0xff]   ;;  %3254 = vmatpush1.bf16.msra.mxu0 %v8081_v59  ;;  %v8015_v59 = vld [vmem:[#allocation11 + $0x3d0] ss:$24 sps:$4 sm:$0xff]  }
 0x2a4   :  { %2394 = vmatpush1.bf16.msra.mxu1 %v7913_v63  ;;  %v7963_v63 = vld [vmem:[#allocation11 + $0x74] ss:$24 sps:$4 sm:$0xff]  }
 0x2a5   :  { %2395 = vmatprep.subr.bf16.mxu1 %v7918_v1  ;;  %v8087_v1 = vld [vmem:[#allocation14 + $0xa0] ss:$8 sps:$4 sm:$0xff]  }
 0x2a8   :  { %2396 = vmatpush1.bf16.msra.mxu1 %v7916_v2  ;;  %v8089_v2 = vld [vmem:[#allocation14 + $0xa4] ss:$8 sps:$4 sm:$0xff]  }
 0x2a9   :  { %2397 = vmatprep.subr.bf16.mxu1 %v7921_v5  ;;  %3255 = vmatprep.subr.bf16.mxu0 %v8089_v2  ;;  %v7961_v5 = vld [vmem:[#allocation11 + $0x70] ss:$24 sps:$4 sm:$0xff]   ;;  %v8024_v2 = vld [vmem:[#allocation11 + $0x460] ss:$24 sps:$4 sm:$0xff]  }
 0x2aa   :  { %3256 = vmatpush1.bf16.msra.mxu0 %v8087_v1  ;;  %v8026_v1 = vld [vmem:[#allocation11 + $0x464] ss:$24 sps:$4 sm:$0xff]  }
 0x2ac   :  { %2398 = vmatpush1.bf16.msra.mxu1 %v7919_v6  ;;  %v7966_v6 = vld [vmem:[#allocation11 + $0xa4] ss:$24 sps:$4 sm:$0xff]  }
 0x2ad   :  { %2399 = vmatprep.subr.bf16.mxu1 %v7924_v7  ;;  %v8093_v7 = vld [vmem:[#allocation14 + $0xb0] ss:$8 sps:$4 sm:$0xff]  }
 0x2b0   :  { %2400 = vmatpush1.bf16.msra.mxu1 %v7922_v8  ;;  %v8095_v8 = vld [vmem:[#allocation14 + $0xb4] ss:$8 sps:$4 sm:$0xff]  }
 0x2b1   :  { %2401 = vmatprep.subr.bf16.mxu1 %v7927_v9  ;;  %3257 = vmatprep.subr.bf16.mxu0 %v8095_v8  ;;  %v7964_v9 = vld [vmem:[#allocation11 + $0xa0] ss:$24 sps:$4 sm:$0xff]  }
 0x2b2   :  { %3258 = vmatpush1.bf16.msra.mxu0 %v8093_v7 }
 0x2b4   :  { %2402 = vmatpush1.bf16.msra.mxu1 %v7925_v10  ;;  %v7969_v10 = vld [vmem:[#allocation11 + $0xd4] ss:$24 sps:$4 sm:$0xff]  }
 0x2b5   :  { %2403 = vmatprep.subr.bf16.mxu1 %v7930_v11  ;;  %v8101_v11 = vld [vmem:[#allocation14 + $0xc4] ss:$8 sps:$4 sm:$0xff]  }
 0x2b6   :  { %3259 = vmatprep.subr.bf16.mxu0 %v8101_v11  ;;  %v8036_v11 = vld [vmem:[#allocation11 + $0x4c0] ss:$24 sps:$4 sm:$0xff]  }
 0x2b8   :  { %2404 = vmatpush1.bf16.msra.mxu1 %v7928_v12  ;;  %v7967_v12 = vld [vmem:[#allocation11 + $0xd0] ss:$24 sps:$4 sm:$0xff]  }
 0x2b9   :  { %2405 = vmatprep.subr.bf16.mxu1 %v7933_v25  ;;  %v7972_v25 = vld [vmem:[#allocation11 + $0x104] ss:$24 sps:$4 sm:$0xff]  }
 0x2bc   :  { %2406 = vmatpush1.bf16.msra.mxu1 %v7931_v15  ;;  %v7970_v15 = vld [vmem:[#allocation11 + $0x100] ss:$24 sps:$4 sm:$0xff]  }
 0x2bd   :  { %2407 = vmatprep.subr.bf16.mxu1 %v7936_v17  ;;  %v7975_v17 = vld [vmem:[#allocation11 + $0x134] ss:$24 sps:$4 sm:$0xff]  }
 0x2c0   :  { %2408 = vmatpush1.bf16.msra.mxu1 %v7934_v19  ;;  %v7973_v19 = vld [vmem:[#allocation11 + $0x130] ss:$24 sps:$4 sm:$0xff]  }
 0x2c1   :  { %2409 = vmatprep.subr.bf16.mxu1 %v7939_v4  ;;  %v7978_v4 = vld [vmem:[#allocation11 + $0x164] ss:$24 sps:$4 sm:$0xff]  }
 0x2c4   :  { %2410 = vmatpush1.bf16.msra.mxu1 %v7937_v23  ;;  %v7976_v23 = vld [vmem:[#allocation11 + $0x160] ss:$24 sps:$4 sm:$0xff]  }
 0x2c5   :  { %2411 = vmatprep.subr.bf16.mxu1 %v7942_v24  ;;  %v7981_v24 = vld [vmem:[#allocation11 + $0x194] ss:$24 sps:$4 sm:$0xff]  }
 0x2c8   :  { %2412 = vmatpush1.bf16.msra.mxu1 %v7940_v31  ;;  %v7984_v31 = vld [vmem:[#allocation11 + $0x1c4] ss:$24 sps:$4 sm:$0xff]  }
 0x2c9   :  { %2413 = vmatprep.subr.bf16.mxu1 %v7945_v32  ;;  %v7982_v32 = vld [vmem:[#allocation11 + $0x1c0] ss:$24 sps:$4 sm:$0xff]  }
 0x2cc   :  { %2414 = vmatpush1.bf16.msra.mxu1 %v7943_v36  ;;  %v7990_v36 = vld [vmem:[#allocation11 + $0x224] ss:$24 sps:$4 sm:$0xff]  }
 0x2cd   :  { %2415 = vmatprep.subr.bf16.mxu1 %v7948_v38  ;;  %v7988_v38 = vld [vmem:[#allocation11 + $0x220] ss:$24 sps:$4 sm:$0xff]  }
 0x2d0   :  { %2416 = vmatpush1.bf16.msra.mxu1 %v7946_v41  ;;  %v7996_v41 = vld [vmem:[#allocation11 + $0x284] ss:$24 sps:$4 sm:$0xff]  }
 0x2d1   :  { %2417 = vmatprep.subr.bf16.mxu1 %v7951_v42  ;;  %v7994_v42 = vld [vmem:[#allocation11 + $0x280] ss:$24 sps:$4 sm:$0xff]  }
 0x2d4   :  { %2418 = vmatpush1.bf16.msra.mxu1 %v7949_v47  ;;  %v8002_v47 = vld [vmem:[#allocation11 + $0x2e4] ss:$24 sps:$4 sm:$0xff]  }
 0x2d5   :  { %2419 = vmatprep.subr.bf16.mxu1 %v7954_v48  ;;  %v8000_v48 = vld [vmem:[#allocation11 + $0x2e0] ss:$24 sps:$4 sm:$0xff]  }
 0x2d8   :  { %2420 = vmatpush1.bf16.msra.mxu1 %v7952_v51  ;;  %v8008_v51 = vld [vmem:[#allocation11 + $0x344] ss:$24 sps:$4 sm:$0xff]  }
 0x2d9   :  { %2512 = vmatprep.subr.bf16.mxu1 %v7957_v52  ;;  %v8006_v52 = vld [vmem:[#allocation11 + $0x340] ss:$24 sps:$4 sm:$0xff]  }
 0x2db   :  { %2422 = vmatmul.mubr.bf16.vlgmr.msra.gmra.mrb[4].mxu1 %v9635_v45 }
 0x2dc   :  { %2513 = vmatpush1.bf16.msra.mxu1 %v7955_v56  ;;  %2544 = vmatprep.mubr.bf16.mxu1 %v9631_v43  ;;  %v8099_v43 = vld [vmem:[#allocation14 + $0xc0] ss:$8 sps:$4 sm:$0xff]  }
 0x2dd   :  { %2514 = vmatprep.subr.bf16.mxu1 %v7960_v57  ;;  %3260 = vmatpush1.bf16.msra.mxu0 %v8099_v43  ;;  %v8014_v56 = vld [vmem:[#allocation11 + $0x3a4] ss:$24 sps:$4 sm:$0xff]   ;;  %v8012_v57 = vld [vmem:[#allocation11 + $0x3a0] ss:$24 sps:$4 sm:$0xff]  }
 0x2de   :  { %3261 = vmatprep.subr.bf16.mxu0 %v8107_v14  ;;  %v8038_v43 = vld [vmem:[#allocation11 + $0x4c4] ss:$24 sps:$4 sm:$0xff]   ;;  %v8048_v14 = vld [vmem:[#allocation11 + $0x520] ss:$24 sps:$4 sm:$0xff]  }
 0x2e0   :  { %2515 = vmatpush1.bf16.msra.mxu1 %v7958_v62  ;;  %v8020_v62 = vld [vmem:[#allocation11 + $0x404] ss:$24 sps:$4 sm:$0xff]  }
 0x2e1   :  { %2516 = vmatprep.subr.bf16.mxu1 %v7963_v63  ;;  %3262 = vmatpush1.bf16.msra.mxu0 %v8105_v13  ;;  %v8023_v63 = vld [vmem:[#allocation11 + $0x434] ss:$24 sps:$4 sm:$0xff]   ;;  %v8050_v13 = vld [vmem:[#allocation11 + $0x524] ss:$24 sps:$4 sm:$0xff]  }
 0x2e2   :  { %3263 = vmatprep.subr.bf16.mxu0 %v8113_v18  ;;  %v8062_v18 = vld [vmem:[#allocation11 + $0x584] ss:$24 sps:$4 sm:$0xff]  }
 0x2e4   :  { %2517 = vmatpush1.bf16.msra.mxu1 %v7961_v5  ;;  %v8032_v5 = vld [vmem:[#allocation11 + $0x494] ss:$24 sps:$4 sm:$0xff]  }
 0x2e5   :  { %2518 = vmatprep.subr.bf16.mxu1 %v7966_v6  ;;  %3264 = vmatpush1.bf16.msra.mxu0 %v8111_v27  ;;  %v8060_v27 = vld [vmem:[#allocation11 + $0x580] ss:$24 sps:$4 sm:$0xff]  }
 0x2e6   :  { %3265 = vmatprep.subr.bf16.mxu0 %v8119_v21  ;;  %v8074_v21 = vld [vmem:[#allocation11 + $0x5e4] ss:$24 sps:$4 sm:$0xff]  }
 0x2e8   :  { %2519 = vmatpush1.bf16.msra.mxu1 %v7964_v9  ;;  %v8030_v9 = vld [vmem:[#allocation11 + $0x490] ss:$24 sps:$4 sm:$0xff]  }
 0x2e9   :  { %2520 = vmatprep.subr.bf16.mxu1 %v7969_v10  ;;  %3266 = vmatpush1.bf16.msra.mxu0 %v8117_v22  ;;  %v8072_v22 = vld [vmem:[#allocation11 + $0x5e0] ss:$24 sps:$4 sm:$0xff]  }
 0x2ea   :  { %3276 = vmatprep.subr.bf16.mxu0 %v8125_v29  ;;  %v8086_v29 = vld [vmem:[#allocation11 + $0x644] ss:$24 sps:$4 sm:$0xff]  }
 0x2ec   :  { %2521 = vmatpush1.bf16.msra.mxu1 %v7967_v12  ;;  %v8044_v12 = vld [vmem:[#allocation11 + $0x4f4] ss:$24 sps:$4 sm:$0xff]  }
 0x2ed   :  { %2522 = vmatprep.subr.bf16.mxu1 %v7972_v25  ;;  %v8042_v25 = vld [vmem:[#allocation11 + $0x4f0] ss:$24 sps:$4 sm:$0xff]  }
 0x2f0   :  { %2523 = vmatpush1.bf16.msra.mxu1 %v7970_v15  ;;  %v8056_v15 = vld [vmem:[#allocation11 + $0x554] ss:$24 sps:$4 sm:$0xff]  }
 0x2f1   :  { %2524 = vmatprep.subr.bf16.mxu1 %v7975_v17  ;;  %v8054_v17 = vld [vmem:[#allocation11 + $0x550] ss:$24 sps:$4 sm:$0xff]  }
 0x2f4   :  { %2525 = vmatpush1.bf16.msra.mxu1 %v7973_v19  ;;  %v8068_v19 = vld [vmem:[#allocation11 + $0x5b4] ss:$24 sps:$4 sm:$0xff]  }
 0x2f5   :  { %2526 = vmatprep.subr.bf16.mxu1 %v7978_v4  ;;  %v8066_v4 = vld [vmem:[#allocation11 + $0x5b0] ss:$24 sps:$4 sm:$0xff]  }
 0x2f8   :  { %2527 = vmatpush1.bf16.msra.mxu1 %v7976_v23  ;;  %v8080_v23 = vld [vmem:[#allocation11 + $0x614] ss:$24 sps:$4 sm:$0xff]  }
 0x2f9   :  { %2528 = vmatprep.subr.bf16.mxu1 %v7981_v24  ;;  %v8078_v24 = vld [vmem:[#allocation11 + $0x610] ss:$24 sps:$4 sm:$0xff]  }
 0x2fc   :  { %2529 = vmatpush1.bf16.msra.mxu1 %v7979_v30  ;;  %v8084_v30 = vld [vmem:[#allocation11 + $0x640] ss:$24 sps:$4 sm:$0xff]  }
 0x2fd   :  { %2530 = vmatprep.subr.bf16.mxu1 %v7984_v31  ;;  %v8092_v31 = vld [vmem:[#allocation11 + $0x674] ss:$24 sps:$4 sm:$0xff]  }
 0x300   :  { %2531 = vmatpush1.bf16.msra.mxu1 %v7982_v32  ;;  %v8090_v32 = vld [vmem:[#allocation11 + $0x670] ss:$24 sps:$4 sm:$0xff]  }
 0x301   :  { %2532 = vmatprep.subr.bf16.mxu1 %v7987_v33  ;;  %v8098_v33 = vld [vmem:[#allocation11 + $0x6a4] ss:$24 sps:$4 sm:$0xff]  }
 0x304   :  { %2533 = vmatpush1.bf16.msra.mxu1 %v7985_v35  ;;  %v8096_v35 = vld [vmem:[#allocation11 + $0x6a0] ss:$24 sps:$4 sm:$0xff]  }
 0x305   :  { %2534 = vmatprep.subr.bf16.mxu1 %v7990_v36  ;;  %v8104_v36 = vld [vmem:[#allocation11 + $0x6d4] ss:$24 sps:$4 sm:$0xff]  }
 0x308   :  { %2535 = vmatpush1.bf16.msra.mxu1 %v7988_v38  ;;  %v8102_v38 = vld [vmem:[#allocation11 + $0x6d0] ss:$24 sps:$4 sm:$0xff]  }
 0x309   :  { %2536 = vmatprep.subr.bf16.mxu1 %v7993_v39  ;;  %v9679_v39 = vld [vmem:[#allocation13] sm:$0x3f] }
 0x30c   :  { %2537 = vmatpush1.bf16.msra.mxu1 %v7991_v40  ;;  %v803_v40 = vrot.slane %v9679_v39, %v9617_v28 }
 0x30d   :  { %2538 = vmatprep.subr.bf16.mxu1 %v7996_v41  ;;  %v8108_v41 = vld [vmem:[#allocation11 + $0x700] ss:$24 sps:$4 sm:$0xff]  }
 0x310   :  { %2539 = vmatpush1.bf16.msra.mxu1 %v7994_v42  ;;  %v8116_v42 = vld [vmem:[#allocation11 + $0x734] ss:$24 sps:$4 sm:$0xff]  }
 0x311   :  { %2540 = vmatprep.subr.bf16.mxu1 %v7999_v44 }
 0x314   :  { %2541 = vmatpush1.bf16.msra.mxu1 %v7997_v46 }
 0x315   :  { %2542 = vmatprep.subr.bf16.mxu1 %v8002_v47 }
 0x318   :  { %2543 = vmatpush1.bf16.msra.mxu1 %v8000_v48 }
 0x319   :  { %2553 = vmatprep.subr.bf16.mxu1 %v8005_v49 }
 0x31b   :  { %2545 = vmatmul.mubr.bf16.vlgmr.msra.gmra.mrb[8].mxu1 %v9635_v45  ;;  %v8018_v45 = vld [vmem:[#allocation11 + $0x400] ss:$24 sps:$4 sm:$0xff]  }
 0x31c   :  { %2554 = vmatpush1.bf16.msra.mxu1 %v8003_v50  ;;  %2585 = vmatprep.mubr.bf16.mxu1 %v9644_v61  ;;  %v8021_v61 = vld [vmem:[#allocation11 + $0x430] ss:$24 sps:$4 sm:$0xff]  }
 0x31d   :  { %2555 = vmatprep.subr.bf16.mxu1 %v8008_v51  ;;  %v8114_v50 = vld [vmem:[#allocation11 + $0x730] ss:$24 sps:$4 sm:$0xff]  }
 0x320   :  { %2556 = vmatpush1.bf16.msra.mxu1 %v8006_v52 }
 0x321   :  { %2557 = vmatprep.subr.bf16.mxu1 %v8011_v53  ;;  %v8122_v53 = vld [vmem:[#allocation11 + $0x764] ss:$24 sps:$4 sm:$0xff]  }
 0x324   :  { %2558 = vmatpush1.bf16.msra.mxu1 %v8009_v55 }
 0x325   :  { %2559 = vmatprep.subr.bf16.mxu1 %v8014_v56 }
 0x328   :  { %2560 = vmatpush1.bf16.msra.mxu1 %v8012_v57  ;;  %v8120_v57 = vld [vmem:[#allocation11 + $0x760] ss:$24 sps:$4 sm:$0xff]  }
 0x329   :  { %2561 = vmatprep.subr.bf16.mxu1 %v8017_v58  ;;  %v8123_v58 = vld [vmem:[#allocation14 + $0x100] ss:$8 sps:$4 sm:$0xff]  }
 0x32c   :  { %2562 = vmatpush1.bf16.msra.mxu1 %v8015_v59 }
 0x32d   :  { %2563 = vmatprep.subr.bf16.mxu1 %v8020_v62  ;;  %v8128_v62 = vld [vmem:[#allocation11 + $0x794] ss:$24 sps:$4 sm:$0xff]  }
 0x330   :  { %2564 = vmatpush1.bf16.msra.mxu1 %v8018_v45  ;;  %v8131_v45 = vld [vmem:[#allocation14 + $0x114] ss:$8 sps:$4 sm:$0xff]  }
 0x331   :  { %2565 = vmatprep.subr.bf16.mxu1 %v8023_v63  ;;  %v8126_v63 = vld [vmem:[#allocation11 + $0x790] ss:$24 sps:$4 sm:$0xff]  }
 0x334   :  { %2566 = vmatpush1.bf16.msra.mxu1 %v8021_v61  ;;  %v8129_v61 = vld [vmem:[#allocation14 + $0x110] ss:$8 sps:$4 sm:$0xff]  }
 0x335   :  { %2567 = vmatprep.subr.bf16.mxu1 %v8026_v1  ;;  %v8134_v1 = vld [vmem:[#allocation11 + $0x7c4] ss:$24 sps:$4 sm:$0xff]  }
 0x336   :  { %v9673_v6 = vpop.f32.mrb[12].mxu0 }
 0x337   :  { %v9675_v7 = vpop.f32.mrb[13].mxu0 }
 0x338   :  { %v2509_v8 = vpop.f32.mrb[14].mxu0  ;;  %2568 = vmatpush1.bf16.msra.mxu1 %v8024_v2  ;;  %v8137_v2 = vld [vmem:[#allocation14 + $0x124] ss:$8 sps:$4 sm:$0xff]  }
 0x339   :  { %v2510_v10 = vpop.f32.mrb[15].mxu0  ;;  %2569 = vmatprep.subr.bf16.mxu1 %v8032_v5  ;;  %v8132_v5 = vld [vmem:[#allocation11 + $0x7c0] ss:$24 sps:$4 sm:$0xff]   ;;  %v8135_v8 = vld [vmem:[#allocation14 + $0x120] ss:$8 sps:$4 sm:$0xff]  }
 0x33a   :  { %v8143_v10 = vld [vmem:[#allocation14 + $0x134] ss:$8 sps:$4 sm:$0xff]  }
 0x33c   :  { %2570 = vmatpush1.bf16.msra.mxu1 %v8030_v9  ;;  %v8140_v9 = vld [vmem:[#allocation11 + $0x7f4] ss:$24 sps:$4 sm:$0xff]  }
 0x33d   :  { %2571 = vmatprep.subr.bf16.mxu1 %v8038_v43  ;;  %v8138_v43 = vld [vmem:[#allocation11 + $0x7f0] ss:$24 sps:$4 sm:$0xff]  }
 0x340   :  { %2572 = vmatpush1.bf16.msra.mxu1 %v8036_v11  ;;  %v8141_v11 = vld [vmem:[#allocation14 + $0x130] ss:$8 sps:$4 sm:$0xff]  }
 0x341   :  { %2573 = vmatprep.subr.bf16.mxu1 %v8044_v12  ;;  %v8146_v12 = vld [vmem:[#allocation11 + $0x824] ss:$24 sps:$4 sm:$0xff]  }
 0x344   :  { %2574 = vmatpush1.bf16.msra.mxu1 %v8042_v25  ;;  %v8149_v25 = vld [vmem:[#allocation14 + $0x144] ss:$8 sps:$4 sm:$0xff]  }
 0x345   :  { %2575 = vmatprep.subr.bf16.mxu1 %v8050_v13  ;;  %v8144_v13 = vld [vmem:[#allocation11 + $0x820] ss:$24 sps:$4 sm:$0xff]  }
 0x348   :  { %2576 = vmatpush1.bf16.msra.mxu1 %v8048_v14  ;;  %v8147_v14 = vld [vmem:[#allocation14 + $0x140] ss:$8 sps:$4 sm:$0xff]  }
 0x349   :  { %2577 = vmatprep.subr.bf16.mxu1 %v8056_v15  ;;  %v8152_v15 = vld [vmem:[#allocation11 + $0x854] ss:$24 sps:$4 sm:$0xff]  }
 0x34c   :  { %2578 = vmatpush1.bf16.msra.mxu1 %v8054_v17  ;;  %v8155_v17 = vld [vmem:[#allocation14 + $0x154] ss:$8 sps:$4 sm:$0xff]  }
 0x34d   :  { %2579 = vmatprep.subr.bf16.mxu1 %v8062_v18  ;;  %v8150_v18 = vld [vmem:[#allocation11 + $0x850] ss:$24 sps:$4 sm:$0xff]  }
 0x350   :  { %2580 = vmatpush1.bf16.msra.mxu1 %v8060_v27  ;;  %v8153_v27 = vld [vmem:[#allocation14 + $0x150] ss:$8 sps:$4 sm:$0xff]  }
 0x351   :  { %2581 = vmatprep.subr.bf16.mxu1 %v8068_v19  ;;  %v8158_v19 = vld [vmem:[#allocation11 + $0x884] ss:$24 sps:$4 sm:$0xff]  }
 0x354   :  { %2582 = vmatpush1.bf16.msra.mxu1 %v8066_v4  ;;  %v8161_v4 = vld [vmem:[#allocation14 + $0x164] ss:$8 sps:$4 sm:$0xff]  }
 0x355   :  { %2583 = vmatprep.subr.bf16.mxu1 %v8074_v21  ;;  %v8156_v21 = vld [vmem:[#allocation11 + $0x880] ss:$24 sps:$4 sm:$0xff]  }
 0x358   :  { %2584 = vmatpush1.bf16.msra.mxu1 %v8072_v22  ;;  %v8159_v22 = vld [vmem:[#allocation14 + $0x160] ss:$8 sps:$4 sm:$0xff]  }
 0x359   :  { %2594 = vmatprep.subr.bf16.mxu1 %v8080_v23  ;;  %v8164_v23 = vld [vmem:[#allocation11 + $0x8b4] ss:$24 sps:$4 sm:$0xff]  }
 0x35b   :  { %2586 = vmatmul.mubr.bf16.vlgmr.msra.gmra.mrb[8].mxu1 %v9642_v60  ;;  %v8110_v60 = vld [vmem:[#allocation11 + $0x704] ss:$24 sps:$4 sm:$0xff]  }
 0x35c   :  { %2595 = vmatpush1.bf16.msra.mxu1 %v8078_v24  ;;  %2626 = vmatprep.mubr.bf16.mxu1 %v9653_v16  ;;  %v799_v16 = vrot.slane %v9679_v39, %v9612_v26  ;;  %v8167_v24 = vld [vmem:[#allocation14 + $0x174] ss:$8 sps:$4 sm:$0xff]  }
 0x35d   :  { %2596 = vmatprep.subr.bf16.mxu1 %v8086_v29  ;;  %v8162_v29 = vld [vmem:[#allocation11 + $0x8b0] ss:$24 sps:$4 sm:$0xff]  }
 0x360   :  { %2597 = vmatpush1.bf16.msra.mxu1 %v8084_v30  ;;  %v8165_v30 = vld [vmem:[#allocation14 + $0x170] ss:$8 sps:$4 sm:$0xff]  }
 0x361   :  { %2598 = vmatprep.subr.bf16.mxu1 %v8092_v31  ;;  %v8170_v31 = vld [vmem:[#allocation11 + $0x8e4] ss:$24 sps:$4 sm:$0xff]  }
 0x364   :  { %2599 = vmatpush1.bf16.msra.mxu1 %v8090_v32  ;;  %v8173_v32 = vld [vmem:[#allocation14 + $0x184] ss:$8 sps:$4 sm:$0xff]  }
 0x365   :  { %2600 = vmatprep.subr.bf16.mxu1 %v8098_v33  ;;  %v8168_v33 = vld [vmem:[#allocation11 + $0x8e0] ss:$24 sps:$4 sm:$0xff]  }
 0x368   :  { %2601 = vmatpush1.bf16.msra.mxu1 %v8096_v35  ;;  %v8171_v35 = vld [vmem:[#allocation14 + $0x180] ss:$8 sps:$4 sm:$0xff]  }
 0x369   :  { %2602 = vmatprep.subr.bf16.mxu1 %v8104_v36  ;;  %v8176_v36 = vld [vmem:[#allocation14 + $0x194] ss:$8 sps:$4 sm:$0xff]  }
 0x36c   :  { %2603 = vmatpush1.bf16.msra.mxu1 %v8102_v38  ;;  %v8174_v38 = vld [vmem:[#allocation14 + $0x190] ss:$8 sps:$4 sm:$0xff]  }
 0x36d   :  { %2604 = vmatprep.subr.bf16.mxu1 %v8110_v60  ;;  %v8179_v60 = vld [vmem:[#allocation14 + $0x1a4] ss:$8 sps:$4 sm:$0xff]  }
 0x36e   :  { %v2382_v44 = vpop.f32.mrb[0].mxu1 }
 0x36f   :  { %v7558_v46 = vadd.f32 %v2382_v44, %v799_v16  ;;  %v2384_v47 = vpop.f32.mrb[1].mxu1  ;;  %v8177_v16 = vld [vmem:[#allocation14 + $0x1a0] ss:$8 sps:$4 sm:$0xff]  }
 0x370   :  { %v7559_v48 = vadd.f32 %v2384_v47, %v803_v40  ;;  %v2386_v49 = vpop.f32.mrb[2].mxu1  ;;  %2605 = vmatpush1.bf16.msra.mxu1 %v8108_v41  ;;  %v8182_v40 = vld [vmem:[#allocation14 + $0x1b4] ss:$8 sps:$4 sm:$0xff]   ;;  %v8180_v41 = vld [vmem:[#allocation14 + $0x1b0] ss:$8 sps:$4 sm:$0xff]  }
 0x371   :  { %v2635_v51 = vmax.f32 %v7558_v46, 0.0  ;;  %v2387_v52 = vpop.f32.mrb[3].mxu1  ;;  %2606 = vmatprep.subr.bf16.mxu1 %v8116_v42  ;;  %v8185_v42 = vld [vmem:[#allocation14 + $0x1c4] ss:$8 sps:$4 sm:$0xff]   ;;  %v8183_v44 = vld [vmem:[#allocation14 + $0x1c0] ss:$8 sps:$4 sm:$0xff]   ;;  %v811_v49 = vrot.slane %v9679_v39, %v9627_v37 }
 0x372   :  { %v2636_v55 = vmax.f32 %v7559_v48, 0.0  ;;  %v8188_v46 = vld [vmem:[#allocation14 + $0x1d4] ss:$8 sps:$4 sm:$0xff]   ;;  %v8186_v47 = vld [vmem:[#allocation14 + $0x1d0] ss:$8 sps:$4 sm:$0xff]  }
 0x373   :  { %v2641_v59 = vpack.c.bf16 %v2635_v51, %v2635_v51  ;;  %v8191_v48 = vld [vmem:[#allocation14 + $0x1e4] ss:$8 sps:$4 sm:$0xff]   ;;  %v8194_v51 = vld [vmem:[#allocation14 + $0x1f4] ss:$8 sps:$4 sm:$0xff]  }
 0x374   :  { %v2642_v56 = vpack.c.bf16 %v2636_v55, %v2636_v55  ;;  %2607 = vmatpush1.bf16.msra.mxu1 %v8114_v50  ;;  %v8189_v50 = vld [vmem:[#allocation14 + $0x1e0] ss:$8 sps:$4 sm:$0xff]  }
 0x375   :  { %2608 = vmatprep.subr.bf16.mxu1 %v8122_v53 }
 0x376   :  { %3267 = vmatprep.mubr.bf16.mxu0 %v2642_v56 }
 0x377   :  { %3268 = vmatmul.mubr.bf16.vlgmr.msra.gmra.mrb[16].mxu0 %v2641_v59 }
 0x378   :  { %2609 = vmatpush1.bf16.msra.mxu1 %v8120_v57  ;;  %3277 = vmatpush1.bf16.msra.mxu0 %v8123_v58  ;;  %v8192_v58 = vld [vmem:[#allocation14 + $0x1f0] ss:$8 sps:$4 sm:$0xff]  }
 0x379   :  { %2610 = vmatprep.subr.bf16.mxu1 %v8128_v62  ;;  %3278 = vmatprep.subr.bf16.mxu0 %v8131_v45  ;;  %v8197_v45 = vld [vmem:[#allocation14 + $0x204] ss:$8 sps:$4 sm:$0xff]  }
 0x37c   :  { %2611 = vmatpush1.bf16.msra.mxu1 %v8126_v63  ;;  %3279 = vmatpush1.bf16.msra.mxu0 %v8129_v61 }
 0x37d   :  { %2612 = vmatprep.subr.bf16.mxu1 %v8134_v1  ;;  %3280 = vmatprep.subr.bf16.mxu0 %v8137_v2 }
 0x380   :  { %2613 = vmatpush1.bf16.msra.mxu1 %v8132_v5  ;;  %3281 = vmatpush1.bf16.msra.mxu0 %v8135_v8  ;;  %v8195_v5 = vld [vmem:[#allocation14 + $0x200] ss:$8 sps:$4 sm:$0xff]  }
 0x381   :  { %2614 = vmatprep.subr.bf16.mxu1 %v8140_v9  ;;  %3282 = vmatprep.subr.bf16.mxu0 %v8143_v10  ;;  %v8200_v9 = vld [vmem:[#allocation14 + $0x214] ss:$8 sps:$4 sm:$0xff]   ;;  %v8198_v10 = vld [vmem:[#allocation14 + $0x210] ss:$8 sps:$4 sm:$0xff]  }
 0x384   :  { %2615 = vmatpush1.bf16.msra.mxu1 %v8138_v43  ;;  %3283 = vmatpush1.bf16.msra.mxu0 %v8141_v11  ;;  %v8203_v43 = vld [vmem:[#allocation14 + $0x224] ss:$8 sps:$4 sm:$0xff]   ;;  %v8206_v11 = vld [vmem:[#allocation14 + $0x234] ss:$8 sps:$4 sm:$0xff]  }
 0x385   :  { %2616 = vmatprep.subr.bf16.mxu1 %v8146_v12  ;;  %3284 = vmatprep.subr.bf16.mxu0 %v8149_v25  ;;  %v8209_v12 = vld [vmem:[#allocation14 + $0x244] ss:$8 sps:$4 sm:$0xff]   ;;  %v8207_v25 = vld [vmem:[#allocation14 + $0x240] ss:$8 sps:$4 sm:$0xff]  }
 0x388   :  { %2617 = vmatpush1.bf16.msra.mxu1 %v8144_v13  ;;  %3285 = vmatpush1.bf16.msra.mxu0 %v8147_v14  ;;  %v8212_v13 = vld [vmem:[#allocation14 + $0x254] ss:$8 sps:$4 sm:$0xff]   ;;  %v8210_v14 = vld [vmem:[#allocation14 + $0x250] ss:$8 sps:$4 sm:$0xff]  }
 0x389   :  { %2618 = vmatprep.subr.bf16.mxu1 %v8152_v15  ;;  %3286 = vmatprep.subr.bf16.mxu0 %v8155_v17  ;;  %v8215_v15 = vld [vmem:[#allocation14 + $0x264] ss:$8 sps:$4 sm:$0xff]   ;;  %v8213_v17 = vld [vmem:[#allocation14 + $0x260] ss:$8 sps:$4 sm:$0xff]  }
 0x38c   :  { %2619 = vmatpush1.bf16.msra.mxu1 %v8150_v18  ;;  %3287 = vmatpush1.bf16.msra.mxu0 %v8153_v27  ;;  %v8218_v18 = vld [vmem:[#allocation14 + $0x274] ss:$8 sps:$4 sm:$0xff]   ;;  %v8216_v27 = vld [vmem:[#allocation14 + $0x270] ss:$8 sps:$4 sm:$0xff]  }
 0x38d   :  { %2620 = vmatprep.subr.bf16.mxu1 %v8158_v19  ;;  %3288 = vmatprep.subr.bf16.mxu0 %v8161_v4  ;;  %v8221_v19 = vld [vmem:[#allocation14 + $0x284] ss:$8 sps:$4 sm:$0xff]   ;;  %v8219_v4 = vld [vmem:[#allocation14 + $0x280] ss:$8 sps:$4 sm:$0xff]  }
 0x390   :  { %2621 = vmatpush1.bf16.msra.mxu1 %v8156_v21  ;;  %3289 = vmatpush1.bf16.msra.mxu0 %v8159_v22  ;;  %v8224_v21 = vld [vmem:[#allocation14 + $0x294] ss:$8 sps:$4 sm:$0xff]   ;;  %v8222_v22 = vld [vmem:[#allocation14 + $0x290] ss:$8 sps:$4 sm:$0xff]  }
 0x391   :  { %2622 = vmatprep.subr.bf16.mxu1 %v8164_v23  ;;  %3290 = vmatprep.subr.bf16.mxu0 %v8167_v24  ;;  %v8227_v23 = vld [vmem:[#allocation14 + $0x2a4] ss:$8 sps:$4 sm:$0xff]   ;;  %v8225_v24 = vld [vmem:[#allocation14 + $0x2a0] ss:$8 sps:$4 sm:$0xff]  }
 0x394   :  { %2623 = vmatpush1.bf16.msra.mxu1 %v8162_v29  ;;  %3291 = vmatpush1.bf16.msra.mxu0 %v8165_v30  ;;  %v8230_v29 = vld [vmem:[#allocation14 + $0x2b4] ss:$8 sps:$4 sm:$0xff]   ;;  %v8228_v30 = vld [vmem:[#allocation14 + $0x2b0] ss:$8 sps:$4 sm:$0xff]  }
 0x395   :  { %2624 = vmatprep.subr.bf16.mxu1 %v8170_v31  ;;  %3292 = vmatprep.subr.bf16.mxu0 %v8173_v32  ;;  %v8233_v31 = vld [vmem:[#allocation14 + $0x2c4] ss:$8 sps:$4 sm:$0xff]   ;;  %v8231_v32 = vld [vmem:[#allocation14 + $0x2c0] ss:$8 sps:$4 sm:$0xff]  }
 0x398   :  { %2625 = vmatpush1.bf16.msra.mxu1 %v8168_v33  ;;  %3293 = vmatpush1.bf16.msra.mxu0 %v8171_v35  ;;  %v8236_v33 = vld [vmem:[#allocation14 + $0x2d4] ss:$8 sps:$4 sm:$0xff]   ;;  %v8234_v35 = vld [vmem:[#allocation14 + $0x2d0] ss:$8 sps:$4 sm:$0xff]  }
 0x399   :  { %3294 = vmatprep.subr.bf16.mxu0 %v8176_v36  ;;  %v8239_v36 = vld [vmem:[#allocation14 + $0x2e4] ss:$8 sps:$4 sm:$0xff]  }
 0x39b   :  { %2627 = vmatmul.mubr.bf16.vlgmr.msra.gmra.mrb[8].mxu1 %v9664_v20  ;;  %v807_v20 = vrot.slane %v9679_v39, %v9624_v34 }
 0x39c   :  { %3295 = vmatpush1.bf16.msra.mxu0 %v8174_v38  ;;  %3692 = vmatprep.mubr.bf16.mxu1 %v9270_v0  ;;  %v8237_v38 = vld [vmem:[#allocation14 + $0x2e0] ss:$8 sps:$4 sm:$0xff]  }
 0x39d   :  { %3296 = vmatprep.subr.bf16.mxu0 %v8179_v60  ;;  %v8242_v60 = vld [vmem:[#allocation14 + $0x2f4] ss:$8 sps:$4 sm:$0xff]  }
 0x3a0   :  { %3297 = vmatpush1.bf16.msra.mxu0 %v8177_v16  ;;  %v8240_v16 = vld [vmem:[#allocation14 + $0x2f0] ss:$8 sps:$4 sm:$0xff]  }
 0x3a1   :  { %3298 = vmatprep.subr.bf16.mxu0 %v8182_v40  ;;  %v8243_v40 = vld [vmem:[#allocation19] ss:$24 sps:$4 sm:$0xff]  }
 0x3a4   :  { %3299 = vmatpush1.bf16.msra.mxu0 %v8180_v41  ;;  %v8245_v41 = vld [vmem:[#allocation19 + $0x4] ss:$24 sps:$4 sm:$0xff]  }
 0x3a5   :  { %3300 = vmatprep.subr.bf16.mxu0 %v8185_v42  ;;  %v8248_v42 = vld [vmem:[#allocation19 + $0xc] ss:$24 sps:$4 sm:$0xff]   ;;  %3660 = vmatprep.subr.bf16.mxu1 %v8245_v41  ;;  %v3362_v41 = vld [vmem:[#allocation7] sm:$0xff] }
 0x3a6   :  { %3661 = vmatpush1.bf16.msra.mxu1 %v8243_v40 }
 0x3a8   :  { %3301 = vmatpush1.bf16.msra.mxu0 %v8183_v44  ;;  %v8251_v44 = vld [vmem:[#allocation19 + $0x34] ss:$24 sps:$4 sm:$0xff]  }
 0x3a9   :  { %3302 = vmatprep.subr.bf16.mxu0 %v8188_v46  ;;  %v8249_v46 = vld [vmem:[#allocation19 + $0x30] ss:$24 sps:$4 sm:$0xff]   ;;  %3662 = vmatprep.subr.bf16.mxu1 %v8251_v44 }
 0x3aa   :  { %3663 = vmatpush1.bf16.msra.mxu1 %v8249_v46 }
 0x3ac   :  { %3303 = vmatpush1.bf16.msra.mxu0 %v8186_v47  ;;  %v815_v47 = vrot.slane %v9679_v39, %v9657_v3 }
 0x3ad   :  { %3304 = vmatprep.subr.bf16.mxu0 %v8191_v48  ;;  %v819_v48 = vrot.slane %v9679_v39, %v9640_v54  ;;  %v8257_v39 = vld [vmem:[#allocation19 + $0x64] ss:$24 sps:$4 sm:$0xff]  }
 0x3ae   :  { %v2423_v52 = vpop.f32.mrb[4].mxu1  ;;  %3664 = vmatprep.subr.bf16.mxu1 %v8257_v39  ;;  %v8309_v39 = vld [vmem:[#allocation19 + $0xd0] ss:$24 sps:$4 sm:$0xff]  }
 0x3af   :  { %v2424_v53 = vadd.f32 %v2423_v52, %v807_v20  ;;  %v2425_v55 = vpop.f32.mrb[5].mxu1 }
 0x3b0   :  { %v2426_v56 = vadd.f32 %v2425_v55, %v811_v49  ;;  %v2427_v57 = vpop.f32.mrb[6].mxu1  ;;  %3305 = vmatpush1.bf16.msra.mxu0 %v8189_v50 }
 0x3b1   :  { %v7561_v59 = vadd.f32 %v9673_v6, %v2424_v53  ;;  %v2428_v62 = vpop.f32.mrb[7].mxu1  ;;  %3306 = vmatprep.subr.bf16.mxu0 %v8194_v51  ;;  %v8201_v6 = vld [vmem:[#allocation14 + $0x220] ss:$8 sps:$4 sm:$0xff]  }
 0x3b2   :  { %v7563_v63 = vadd.f32 %v9675_v7, %v2426_v56  ;;  %v8204_v7 = vld [vmem:[#allocation14 + $0x230] ss:$8 sps:$4 sm:$0xff]  }
 0x3b3   :  { %v2637_v61 = vmax.f32 %v7561_v59, 0.0  ;;  %v8254_v62 = vld [vmem:[#allocation19 + $0x3c] ss:$24 sps:$4 sm:$0xff]  }
 0x3b4   :  { %v2638_v1 = vmax.f32 %v7563_v63, 0.0  ;;  %3307 = vmatpush1.bf16.msra.mxu0 %v8192_v58  ;;  %v8246_v58 = vld [vmem:[#allocation19 + $0x8] ss:$24 sps:$4 sm:$0xff]  }
 0x3b5   :  { %3317 = vmatprep.subr.bf16.mxu0 %v8197_v45  ;;  %v2643_v8 = vpack.c.bf16 %v2637_v61, %v2637_v61  ;;  %v8252_v45 = vld [vmem:[#allocation19 + $0x38] ss:$24 sps:$4 sm:$0xff]   ;;  %v8260_v61 = vld [vmem:[#allocation19 + $0x6c] ss:$24 sps:$4 sm:$0xff]  }
 0x3b6   :  { %v2644_v2 = vpack.c.bf16 %v2638_v1, %v2638_v1  ;;  %v8255_v63 = vld [vmem:[#allocation19 + $0x60] ss:$24 sps:$4 sm:$0xff]  }
 0x3b7   :  { %v8258_v1 = vld [vmem:[#allocation19 + $0x68] ss:$24 sps:$4 sm:$0xff]   ;;  %3665 = vmatpush1.bf16.msra.mxu1 %v8255_v63 }
 0x3b8   :  { %3308 = vmatprep.mubr.bf16.mxu0 %v2644_v2  ;;  %v8263_v2 = vld [vmem:[#allocation19 + $0x94] ss:$24 sps:$4 sm:$0xff]   ;;  %v8321_v63 = vld [vmem:[#allocation17 + $0x10] ss:$24 sps:$4 sm:$0xff]  }
 0x3b9   :  { %3309 = vmatmul.mubr.bf16.vlgmr.msra.gmra.mrb[16].mxu0 %v2643_v8  ;;  %v8266_v8 = vld [vmem:[#allocation19 + $0x9c] ss:$24 sps:$4 sm:$0xff]   ;;  %3666 = vmatprep.subr.bf16.mxu1 %v8263_v2  ;;  %v8312_v2 = vld [vmem:[#allocation19 + $0x100] ss:$24 sps:$4 sm:$0xff]  }
 0x3ba   :  { %3318 = vmatpush1.bf16.msra.mxu0 %v8195_v5  ;;  %v8261_v5 = vld [vmem:[#allocation19 + $0x90] ss:$24 sps:$4 sm:$0xff]  }
 0x3bb   :  { %3319 = vmatprep.subr.bf16.mxu0 %v8200_v9  ;;  %v8264_v9 = vld [vmem:[#allocation19 + $0x98] ss:$24 sps:$4 sm:$0xff]   ;;  %3667 = vmatpush1.bf16.msra.mxu1 %v8261_v5  ;;  %v8317_v5 = vld [vmem:[#allocation19 + $0x134] ss:$24 sps:$4 sm:$0xff]  }
 0x3be   :  { %3320 = vmatpush1.bf16.msra.mxu0 %v8198_v10  ;;  %v8269_v10 = vld [vmem:[#allocation19 + $0xc4] ss:$24 sps:$4 sm:$0xff]  }
 0x3bf   :  { %3321 = vmatprep.subr.bf16.mxu0 %v8203_v43  ;;  %v8267_v43 = vld [vmem:[#allocation19 + $0xc0] ss:$24 sps:$4 sm:$0xff]   ;;  %3668 = vmatprep.subr.bf16.mxu1 %v8269_v10  ;;  %v8320_v10 = vld [vmem:[#allocation19 + $0x164] ss:$24 sps:$4 sm:$0xff]  }
 0x3c0   :  { %3669 = vmatpush1.bf16.msra.mxu1 %v8267_v43  ;;  %v8332_v43 = vld [vmem:[#allocation22 + $0x34] ss:$24 sps:$4 sm:$0xff]  }
 0x3c2   :  { %3322 = vmatpush1.bf16.msra.mxu0 %v8201_v6  ;;  %v8272_v6 = vld [vmem:[#allocation19 + $0xcc] ss:$24 sps:$4 sm:$0xff]  }
 0x3c3   :  { %3323 = vmatprep.subr.bf16.mxu0 %v8206_v11  ;;  %v8270_v11 = vld [vmem:[#allocation19 + $0xc8] ss:$24 sps:$4 sm:$0xff]  }
 0x3c6   :  { %3324 = vmatpush1.bf16.msra.mxu0 %v8204_v7  ;;  %v8275_v7 = vld [vmem:[#allocation19 + $0xf4] ss:$24 sps:$4 sm:$0xff]  }
 0x3c7   :  { %3325 = vmatprep.subr.bf16.mxu0 %v8209_v12  ;;  %v8273_v12 = vld [vmem:[#allocation19 + $0xf0] ss:$24 sps:$4 sm:$0xff]   ;;  %3670 = vmatprep.subr.bf16.mxu1 %v8275_v7 }
 0x3c8   :  { %3671 = vmatpush1.bf16.msra.mxu1 %v8273_v12  ;;  %v8329_v7 = vld [vmem:[#allocation22 + $0xc] ss:$24 sps:$4 sm:$0xff]  }
 0x3c9   :  { %v8338_v12 = vld [vmem:[#allocation22 + $0x64] ss:$24 sps:$4 sm:$0xff]  }
 0x3ca   :  { %3326 = vmatpush1.bf16.msra.mxu0 %v8207_v25  ;;  %v8278_v25 = vld [vmem:[#allocation19 + $0xfc] ss:$24 sps:$4 sm:$0xff]  }
 0x3cb   :  { %3327 = vmatprep.subr.bf16.mxu0 %v8212_v13  ;;  %v8276_v13 = vld [vmem:[#allocation19 + $0xf8] ss:$24 sps:$4 sm:$0xff]  }
 0x3ce   :  { %3328 = vmatpush1.bf16.msra.mxu0 %v8210_v14  ;;  %v8281_v14 = vld [vmem:[#allocation19 + $0x124] ss:$24 sps:$4 sm:$0xff]  }
 0x3cf   :  { %3329 = vmatprep.subr.bf16.mxu0 %v8215_v15  ;;  %v8279_v15 = vld [vmem:[#allocation19 + $0x120] ss:$24 sps:$4 sm:$0xff]   ;;  %3672 = vmatprep.subr.bf16.mxu1 %v8281_v14 }
 0x3d0   :  { %3673 = vmatpush1.bf16.msra.mxu1 %v8279_v15  ;;  %v8344_v14 = vld [vmem:[#allocation22 + $0x94] ss:$24 sps:$4 sm:$0xff]   ;;  %v8333_v15 = vld [vmem:[#allocation22 + $0x38] ss:$24 sps:$4 sm:$0xff]  }
 0x3d2   :  { %3330 = vmatpush1.bf16.msra.mxu0 %v8213_v17  ;;  %v8284_v17 = vld [vmem:[#allocation19 + $0x12c] ss:$24 sps:$4 sm:$0xff]  }
 0x3d3   :  { %3331 = vmatprep.subr.bf16.mxu0 %v8218_v18  ;;  %v8282_v18 = vld [vmem:[#allocation19 + $0x128] ss:$24 sps:$4 sm:$0xff]  }
 0x3d6   :  { %3332 = vmatpush1.bf16.msra.mxu0 %v8216_v27  ;;  %v8287_v27 = vld [vmem:[#allocation19 + $0x154] ss:$24 sps:$4 sm:$0xff]  }
 0x3d7   :  { %3333 = vmatprep.subr.bf16.mxu0 %v8221_v19  ;;  %v8285_v19 = vld [vmem:[#allocation19 + $0x150] ss:$24 sps:$4 sm:$0xff]   ;;  %3674 = vmatprep.subr.bf16.mxu1 %v8287_v27 }
 0x3d8   :  { %3675 = vmatpush1.bf16.msra.mxu1 %v8285_v19  ;;  %v8350_v27 = vld [vmem:[#allocation22 + $0xc4] ss:$24 sps:$4 sm:$0xff]   ;;  %v8339_v19 = vld [vmem:[#allocation22 + $0x68] ss:$24 sps:$4 sm:$0xff]  }
 0x3da   :  { %3334 = vmatpush1.bf16.msra.mxu0 %v8219_v4  ;;  %v8288_v4 = vld [vmem:[#allocation19 + $0x158] ss:$24 sps:$4 sm:$0xff]  }
 0x3db   :  { %3335 = vmatprep.subr.bf16.mxu0 %v8224_v21  ;;  %v8290_v21 = vld [vmem:[#allocation19 + $0x15c] ss:$24 sps:$4 sm:$0xff]  }
 0x3de   :  { %3336 = vmatpush1.bf16.msra.mxu0 %v8222_v22  ;;  %v8293_v22 = vld [vmem:[#allocation19 + $0x14] ss:$24 sps:$4 sm:$0xff]  }
 0x3df   :  { %3337 = vmatprep.subr.bf16.mxu0 %v8227_v23  ;;  %v8296_v23 = vld [vmem:[#allocation17 + $0x4] ss:$24 sps:$4 sm:$0xff]   ;;  %3742 = vmatprep.subr.bf16.mxu1 %v8293_v22 }
 0x3e0   :  { %v8356_v22 = vld [vmem:[#allocation22 + $0xf4] ss:$24 sps:$4 sm:$0xff]  }
 0x3e2   :  { %3338 = vmatpush1.bf16.msra.mxu0 %v8225_v24  ;;  %v2743_v24 = vld [vmem:[#allocation16] sm:$0x3] }
 0x3e3   :  { %3339 = vmatprep.subr.bf16.mxu0 %v8230_v29  ;;  %v2748_v29 = vrot.slane %v2743_v24, %v9612_v26 }
 0x3e6   :  { %3340 = vmatpush1.bf16.msra.mxu0 %v8228_v30  ;;  %v2752_v30 = vrot.slane %v2743_v24, %v9617_v28  ;;  %v8354_v24 = vld [vmem:[#allocation22 + $0xf0] ss:$24 sps:$4 sm:$0xff]  }
 0x3e7   :  { %3341 = vmatprep.subr.bf16.mxu0 %v8233_v31 }
 0x3ea   :  { %3342 = vmatpush1.bf16.msra.mxu0 %v8231_v32 }
 0x3eb   :  { %3343 = vmatprep.subr.bf16.mxu0 %v8236_v33 }
 0x3ee   :  { %3344 = vmatpush1.bf16.msra.mxu0 %v8234_v35 }
 0x3ef   :  { %3345 = vmatprep.subr.bf16.mxu0 %v8239_v36 }
 0x3f2   :  { %3346 = vmatpush1.bf16.msra.mxu0 %v8237_v38 }
 0x3f3   :  { %3347 = vmatprep.subr.bf16.mxu0 %v8242_v60 }
 0x3f6   :  { %3348 = vmatpush1.bf16.msra.mxu0 %v8240_v16 }
 0x3f7   :  { %3701 = vmatprep.subr.bf16.mxu0 %v8248_v42 }
 0x46e   :  { %v2628_v20 = vpop.f32.mrb[8].mxu1 }
 0x46f   :  { %v7564_v49 = vadd.f32 %v2628_v20, %v815_v47  ;;  %v2630_v50 = vpop.f32.mrb[9].mxu1  ;;  %v8291_v47 = vld [vmem:[#allocation19 + $0x10] ss:$24 sps:$4 sm:$0xff]  }
 0x470   :  { %v7565_v51 = vadd.f32 %v2630_v50, %v819_v48  ;;  %v2632_v52 = vpop.f32.mrb[10].mxu1  ;;  %v8294_v48 = vld [vmem:[#allocation17] ss:$24 sps:$4 sm:$0xff]   ;;  %v8308_v50 = vld [vmem:[#allocation17 + $0xc] ss:$24 sps:$4 sm:$0xff]  }
 0x471   :  { %v2639_v53 = vmax.f32 %v7564_v49, 0.0  ;;  %v2633_v55 = vpop.f32.mrb[11].mxu1  ;;  %v8299_v49 = vld [vmem:[#allocation19 + $0x44] ss:$24 sps:$4 sm:$0xff]   ;;  %v260_v52 = vld [vmem:[#allocation5] sm:$0xff] }
 0x472   :  { %v2640_v56 = vmax.f32 %v7565_v51, 0.0  ;;  %v8297_v51 = vld [vmem:[#allocation19 + $0x40] ss:$24 sps:$4 sm:$0xff]   ;;  %v261_v55 = vpack.c.bf16 %v260_v52, %v260_v52 }
 0x473   :  { %v2645_v59 = vpack.c.bf16 %v2639_v53, %v2639_v53  ;;  %v8302_v53 = vld [vmem:[#allocation19 + $0x74] ss:$24 sps:$4 sm:$0xff]  }
 0x474   :  { %v2646_v57 = vpack.c.bf16 %v2640_v56, %v2640_v56  ;;  %v8300_v56 = vld [vmem:[#allocation19 + $0x70] ss:$24 sps:$4 sm:$0xff]  }
 0x475   :  { %v8392_v52 = vld [vmem:[#allocation22 + $0x214] ss:$24 sps:$4 sm:$0xff]  }
 0x476   :  { %3349 = vmatprep.mubr.bf16.mxu0 %v2646_v57  ;;  %v8306_v57 = vld [vmem:[#allocation17 + $0x8] ss:$24 sps:$4 sm:$0xff]  }
 0x477   :  { %3350 = vmatmul.mubr.bf16.vlgmr.msra.gmra.mrb[16].mxu0 %v2645_v59  ;;  %v8323_v59 = vld [vmem:[#allocation17 + $0x14] ss:$24 sps:$4 sm:$0xff]  }
 0x478   :  { %3702 = vmatpush1.bf16.msra.mxu0 %v8246_v58  ;;  %3733 = vmatprep.mubr.bf16.mxu0 %v9270_v0  ;;  %v8305_v58 = vld [vmem:[#allocation19 + $0xa4] ss:$24 sps:$4 sm:$0xff]  }
 0x479   :  { %3703 = vmatprep.subr.bf16.mxu0 %v8254_v62  ;;  %v8303_v62 = vld [vmem:[#allocation19 + $0xa0] ss:$24 sps:$4 sm:$0xff]  }
 0x47c   :  { %3704 = vmatpush1.bf16.msra.mxu0 %v8252_v45  ;;  %v8311_v45 = vld [vmem:[#allocation19 + $0xd4] ss:$24 sps:$4 sm:$0xff]  }
 0x47d   :  { %3705 = vmatprep.subr.bf16.mxu0 %v8260_v61  ;;  %v8314_v61 = vld [vmem:[#allocation19 + $0x104] ss:$24 sps:$4 sm:$0xff]  }
 0x480   :  { %3706 = vmatpush1.bf16.msra.mxu0 %v8258_v1  ;;  %v8326_v1 = vld [vmem:[#allocation22 + $0x4] ss:$24 sps:$4 sm:$0xff]  }
 0x481   :  { %3707 = vmatprep.subr.bf16.mxu0 %v8266_v8  ;;  %v8315_v8 = vld [vmem:[#allocation19 + $0x130] ss:$24 sps:$4 sm:$0xff]  }
 0x484   :  { %3708 = vmatpush1.bf16.msra.mxu0 %v8264_v9  ;;  %v8324_v9 = vld [vmem:[#allocation22] ss:$24 sps:$4 sm:$0xff]  }
 0x485   :  { %3709 = vmatprep.subr.bf16.mxu0 %v8272_v6  ;;  %v8318_v6 = vld [vmem:[#allocation19 + $0x160] ss:$24 sps:$4 sm:$0xff]  }
 0x488   :  { %3710 = vmatpush1.bf16.msra.mxu0 %v8270_v11  ;;  %v8330_v11 = vld [vmem:[#allocation22 + $0x30] ss:$24 sps:$4 sm:$0xff]  }
 0x489   :  { %3711 = vmatprep.subr.bf16.mxu0 %v8278_v25  ;;  %v8327_v25 = vld [vmem:[#allocation22 + $0x8] ss:$24 sps:$4 sm:$0xff]  }
 0x48c   :  { %3712 = vmatpush1.bf16.msra.mxu0 %v8276_v13  ;;  %v8335_v13 = vld [vmem:[#allocation22 + $0x3c] ss:$24 sps:$4 sm:$0xff]  }
 0x48d   :  { %3713 = vmatprep.subr.bf16.mxu0 %v8284_v17  ;;  %v8342_v17 = vld [vmem:[#allocation22 + $0x90] ss:$24 sps:$4 sm:$0xff]  }
 0x490   :  { %3714 = vmatpush1.bf16.msra.mxu0 %v8282_v18  ;;  %v8341_v18 = vld [vmem:[#allocation22 + $0x6c] ss:$24 sps:$4 sm:$0xff]  }
 0x491   :  { %3715 = vmatprep.subr.bf16.mxu0 %v8290_v21  ;;  %v8347_v21 = vld [vmem:[#allocation22 + $0x9c] ss:$24 sps:$4 sm:$0xff]  }
 0x494   :  { %3716 = vmatpush1.bf16.msra.mxu0 %v8288_v4  ;;  %v8348_v4 = vld [vmem:[#allocation22 + $0xc0] ss:$24 sps:$4 sm:$0xff]  }
 0x495   :  { %3817 = vmatprep.subr.bf16.mxu0 %v8296_v23  ;;  %v8345_v23 = vld [vmem:[#allocation22 + $0x98] ss:$24 sps:$4 sm:$0xff]  }
 0x54a   :  { %v3351_v31 = vpop.f32.mrb[16].mxu0 }
 0x54b   :  { %v7566_v32 = vadd.f32 %v3351_v31, %v2748_v29  ;;  %v3353_v33 = vpop.f32.mrb[17].mxu0  ;;  %v8353_v29 = vld [vmem:[#allocation22 + $0xcc] ss:$24 sps:$4 sm:$0xff]   ;;  %v8351_v31 = vld [vmem:[#allocation22 + $0xc8] ss:$24 sps:$4 sm:$0xff]  }
 0x54c   :  { %v7567_v35 = vadd.f32 %v3353_v33, %v2752_v30  ;;  %v3355_v36 = vpop.f32.mrb[18].mxu0  ;;  %v8362_v30 = vld [vmem:[#allocation22 + $0x124] ss:$24 sps:$4 sm:$0xff]  }
 0x54d   :  { %6644 = vst [vmem:[#allocation29] sm:$0xff] %v7566_v32  ;;  %v3356_v38 = vpop.f32.mrb[19].mxu0  ;;  %v8359_v33 = vld [vmem:[#allocation22 + $0xfc] ss:$24 sps:$4 sm:$0xff]   ;;  %v8357_v36 = vld [vmem:[#allocation22 + $0xf8] ss:$24 sps:$4 sm:$0xff]  }
 0x54e   :  { %v3358_v60 = vmax.f32 %v7567_v35, -4.0  ;;  %v8368_v35 = vld [vmem:[#allocation22 + $0x154] ss:$24 sps:$4 sm:$0xff]   ;;  %v8366_v38 = vld [vmem:[#allocation22 + $0x150] ss:$24 sps:$4 sm:$0xff]  }
 0x550   :  { %v3359_v16 = vmin.f32 %v3358_v60, 15.0  ;;  %v8365_v60 = vld [vmem:[#allocation22 + $0x12c] ss:$24 sps:$4 sm:$0xff]  }
 0x552   :  { %v3360_v40 = vmul.f32 1.442695, %v3359_v16  ;;  %v8374_v16 = vld [vmem:[#allocation22 + $0x184] ss:$24 sps:$4 sm:$0xff]  }
 0x554   :  { %8804 = vpow2.f32 %v3360_v40  ;;  %v8363_v40 = vld [vmem:[#allocation22 + $0x128] ss:$24 sps:$4 sm:$0xff]  }
 0x55e   :  { %v8805_v42 = vpop.eup %8804 }
 0x55f   :  { %6645 = vst [vmem:[#allocation31] sm:$0xff] %v8805_v42  ;;  %v3363_v44 = vmul.f32 %v8805_v42, %v3362_v41  ;;  %v8372_v41 = vld [vmem:[#allocation22 + $0x180] ss:$24 sps:$4 sm:$0xff]   ;;  %v8371_v42 = vld [vmem:[#allocation22 + $0x15c] ss:$24 sps:$4 sm:$0xff]  }
 0x561   :  { %v3364_v46 = vadd.f32 %v7566_v32, %v3363_v44  ;;  %v8360_v32 = vld [vmem:[#allocation22 + $0x120] ss:$24 sps:$4 sm:$0xff]   ;;  %v8380_v44 = vld [vmem:[#allocation22 + $0x1b4] ss:$24 sps:$4 sm:$0xff]  }
 0x563   :  { %v9700_v20 = vpack.c.bf16 %v3364_v46, %v3364_v46  ;;  %v8369_v46 = vld [vmem:[#allocation22 + $0x158] ss:$24 sps:$4 sm:$0xff]  }
 0x565   :  { %3693 = vmatmul.mubr.bf16.vlgmr.msra.gmra.mrb[12].mxu1 %v9700_v20  ;;  %3734 = vmatmul.mubr.bf16.vlgmr.msra.gmra.mrb[20].mxu0 %v9700_v20 }
 0x566   :  { %3743 = vmatpush1.bf16.msra.mxu1 %v8291_v47  ;;  %3818 = vmatpush1.bf16.msra.mxu0 %v8294_v48  ;;  %v8378_v47 = vld [vmem:[#allocation22 + $0x1b0] ss:$24 sps:$4 sm:$0xff]   ;;  %v8377_v48 = vld [vmem:[#allocation22 + $0x18c] ss:$24 sps:$4 sm:$0xff]  }
 0x567   :  { %3744 = vmatprep.subr.bf16.mxu1 %v8299_v49  ;;  %3849 = vmatprep.mubr.bf16.mxu0 %v9270_v0  ;;  %v8375_v49 = vld [vmem:[#allocation22 + $0x188] ss:$24 sps:$4 sm:$0xff]  }
 0x568   :  { %3858 = vmatprep.subr.bf16.mxu0 %v8308_v50  ;;  %3774 = vmatprep.mubr.bf16.mxu1 %v9270_v0  ;;  %v8384_v50 = vld [vmem:[#allocation22 + $0x1e0] ss:$24 sps:$4 sm:$0xff]  }
 0x56a   :  { %3745 = vmatpush1.bf16.msra.mxu1 %v8297_v51  ;;  %v8383_v51 = vld [vmem:[#allocation22 + $0x1bc] ss:$24 sps:$4 sm:$0xff]  }
 0x56b   :  { %3746 = vmatprep.subr.bf16.mxu1 %v8302_v53  ;;  %v8381_v53 = vld [vmem:[#allocation22 + $0x1b8] ss:$24 sps:$4 sm:$0xff]  }
 0x56d   :  { %7152 = vmatmul.mubr.msk.bf16.vlgmr.msra.gmra.mrb[24].mxu0 %vm3813_vm2, %v261_v55 }
 0x56e   :  { %3747 = vmatpush1.bf16.msra.mxu1 %v8300_v56  ;;  %3859 = vmatpush1.bf16.msra.mxu0 %v8306_v57  ;;  %v8389_v56 = vld [vmem:[#allocation22 + $0x1ec] ss:$24 sps:$4 sm:$0xff]   ;;  %v8387_v57 = vld [vmem:[#allocation22 + $0x1e8] ss:$24 sps:$4 sm:$0xff]  }
 0x56f   :  { %3748 = vmatprep.subr.bf16.mxu1 %v8305_v58  ;;  %3890 = vmatprep.mubr.bf16.mxu0 %v9270_v0  ;;  %v8395_v58 = vld [vmem:[#allocation22 + $0x21c] ss:$24 sps:$4 sm:$0xff]  }
 0x570   :  { %3899 = vmatprep.subr.bf16.mxu0 %v8323_v59  ;;  %v8393_v59 = vld [vmem:[#allocation22 + $0x218] ss:$24 sps:$4 sm:$0xff]  }
 0x572   :  { %3749 = vmatpush1.bf16.msra.mxu1 %v8303_v62  ;;  %v8398_v62 = vld [vmem:[#allocation22 + $0x244] ss:$24 sps:$4 sm:$0xff]  }
 0x573   :  { %3750 = vmatprep.subr.bf16.mxu1 %v8311_v45  ;;  %v8401_v45 = vld [vmem:[#allocation22 + $0x24c] ss:$24 sps:$4 sm:$0xff]  }
 0x575   :  { %7153 = vmatmul.mubr.msk.bf16.vlgmr.msra.gmra.mrb[28].mxu0 %vm3813_vm2, %v261_v55 }
 0x576   :  { %3751 = vmatpush1.bf16.msra.mxu1 %v8309_v39  ;;  %3900 = vmatpush1.bf16.msra.mxu0 %v8321_v63  ;;  %v8396_v39 = vld [vmem:[#allocation22 + $0x240] ss:$24 sps:$4 sm:$0xff]  }
 0x577   :  { %3752 = vmatprep.subr.bf16.mxu1 %v8314_v61  ;;  %3931 = vmatprep.mubr.bf16.mxu0 %v9270_v0  ;;  %v8336_v0 = vld [vmem:[#allocation22 + $0x60] ss:$24 sps:$4 sm:$0xff]   ;;  %v8404_v61 = vld [vmem:[#allocation22 + $0x274] ss:$24 sps:$4 sm:$0xff]  }
 0x578   :  { %5750 = vmatprep.subr.bf16.mxu0 %v8326_v1  ;;  %v8399_v63 = vld [vmem:[#allocation22 + $0x248] ss:$24 sps:$4 sm:$0xff]  }
 0x579   :  { %v8402_v1 = vld [vmem:[#allocation22 + $0x270] ss:$24 sps:$4 sm:$0xff]  }
 0x57a   :  { %3753 = vmatpush1.bf16.msra.mxu1 %v8312_v2  ;;  %v8405_v2 = vld [vmem:[#allocation22 + $0x278] ss:$24 sps:$4 sm:$0xff]  }
 0x57b   :  { %3754 = vmatprep.subr.bf16.mxu1 %v8317_v5  ;;  %v8407_v5 = vld [vmem:[#allocation22 + $0x27c] ss:$24 sps:$4 sm:$0xff]  }
 0x57d   :  { %7154 = vmatmul.mubr.msk.bf16.vlgmr.msra.gmra.mrb[32].mxu0 %vm3813_vm2, %v261_v55  ;;  %v8390_v55 = vld [vmem:[#allocation22 + $0x210] ss:$24 sps:$4 sm:$0xff]  }
 0x57e   :  { %3755 = vmatpush1.bf16.msra.mxu1 %v8315_v8  ;;  %5751 = vmatpush1.bf16.msra.mxu0 %v8324_v9  ;;  %v8410_v8 = vld [vmem:[#allocation22 + $0x2a4] ss:$24 sps:$4 sm:$0xff]  }
 0x57f   :  { %3756 = vmatprep.subr.bf16.mxu1 %v8320_v10  ;;  %5752 = vmatprep.subr.bf16.mxu0 %v8332_v43  ;;  %v8413_v9 = vld [vmem:[#allocation22 + $0x2ac] ss:$24 sps:$4 sm:$0xff]   ;;  %v8408_v10 = vld [vmem:[#allocation22 + $0x2a0] ss:$24 sps:$4 sm:$0xff]  }
 0x580   :  { %v8411_v43 = vld [vmem:[#allocation22 + $0x2a8] ss:$24 sps:$4 sm:$0xff]  }
 0x582   :  { %3757 = vmatpush1.bf16.msra.mxu1 %v8318_v6  ;;  %5753 = vmatpush1.bf16.msra.mxu0 %v8330_v11  ;;  %v8416_v6 = vld [vmem:[#allocation22 + $0x2d4] ss:$24 sps:$4 sm:$0xff]  }
 0x583   :  { %5873 = vmatprep.subr.bf16.mxu1 %v8329_v7  ;;  %5754 = vmatprep.subr.bf16.mxu0 %v8338_v12  ;;  %v8419_v11 = vld [vmem:[#allocation22 + $0x2dc] ss:$24 sps:$4 sm:$0xff]   ;;  %v8414_v7 = vld [vmem:[#allocation22 + $0x2d0] ss:$24 sps:$4 sm:$0xff]  }
 0x584   :  { %v8417_v12 = vld [vmem:[#allocation22 + $0x2d8] ss:$24 sps:$4 sm:$0xff]  }
 0x585   :  { %3775 = vmatmul.mubr.bf16.vlgmr.msra.gmra.mrb[16].mxu1 %v9700_v20  ;;  %v8386_v20 = vld [vmem:[#allocation22 + $0x1e4] ss:$24 sps:$4 sm:$0xff]  }
 0x586   :  { %5874 = vmatpush1.bf16.msra.mxu1 %v8327_v25  ;;  %5755 = vmatpush1.bf16.msra.mxu0 %v8336_v0  ;;  %v8422_v25 = vld [vmem:[#allocation22 + $0x304] ss:$24 sps:$4 sm:$0xff]  }
 0x587   :  { %5875 = vmatprep.subr.bf16.mxu1 %v8335_v13  ;;  %5756 = vmatprep.subr.bf16.mxu0 %v8344_v14  ;;  %v8425_v0 = vld [vmem:[#allocation22 + $0x30c] ss:$24 sps:$4 sm:$0xff]  }
 0x58a   :  { %5876 = vmatpush1.bf16.msra.mxu1 %v8333_v15  ;;  %5757 = vmatpush1.bf16.msra.mxu0 %v8342_v17 }
 0x58b   :  { %5877 = vmatprep.subr.bf16.mxu1 %v8341_v18  ;;  %5758 = vmatprep.subr.bf16.mxu0 %v8350_v27 }
 0x58e   :  { %5878 = vmatpush1.bf16.msra.mxu1 %v8339_v19  ;;  %5759 = vmatpush1.bf16.msra.mxu0 %v8348_v4 }
 0x58f   :  { %5879 = vmatprep.subr.bf16.mxu1 %v8347_v21  ;;  %5760 = vmatprep.subr.bf16.mxu0 %v8356_v22  ;;  %v9712_v21 = vld [vmem:[#allocation20] sm:$0x3f] }
 0x590   :  { %v3945_v22 = vrot.slane %v9712_v21, %v9612_v26 }
 0x592   :  { %5880 = vmatpush1.bf16.msra.mxu1 %v8345_v23  ;;  %5761 = vmatpush1.bf16.msra.mxu0 %v8354_v24  ;;  %v3949_v24 = vrot.slane %v9712_v21, %v9617_v28 }
 0x593   :  { %5881 = vmatprep.subr.bf16.mxu1 %v8353_v29  ;;  %5762 = vmatprep.subr.bf16.mxu0 %v8362_v30 }
 0x596   :  { %5882 = vmatpush1.bf16.msra.mxu1 %v8351_v31  ;;  %5763 = vmatpush1.bf16.msra.mxu0 %v8360_v32 }
 0x597   :  { %5883 = vmatprep.subr.bf16.mxu1 %v8359_v33  ;;  %5764 = vmatprep.subr.bf16.mxu0 %v8368_v35 }
 0x59a   :  { %5884 = vmatpush1.bf16.msra.mxu1 %v8357_v36  ;;  %5765 = vmatpush1.bf16.msra.mxu0 %v8366_v38 }
 0x59b   :  { %5885 = vmatprep.subr.bf16.mxu1 %v8365_v60  ;;  %5766 = vmatprep.subr.bf16.mxu0 %v8374_v16  ;;  %v3953_v16 = vrot.slane %v9712_v21, %v9624_v34 }
 0x59e   :  { %5886 = vmatpush1.bf16.msra.mxu1 %v8363_v40  ;;  %5767 = vmatpush1.bf16.msra.mxu0 %v8372_v41 }
 0x59f   :  { %5887 = vmatprep.subr.bf16.mxu1 %v8371_v42  ;;  %5768 = vmatprep.subr.bf16.mxu0 %v8380_v44  ;;  %v3957_v42 = vrot.slane %v9712_v21, %v9627_v37  ;;  %v8420_v44 = vld [vmem:[#allocation22 + $0x300] ss:$24 sps:$4 sm:$0xff]  }
 0x5a2   :  { %5888 = vmatpush1.bf16.msra.mxu1 %v8369_v46  ;;  %5769 = vmatpush1.bf16.msra.mxu0 %v8378_v47  ;;  %v8423_v46 = vld [vmem:[#allocation22 + $0x308] ss:$24 sps:$4 sm:$0xff]  }
 0x5a3   :  { %5889 = vmatprep.subr.bf16.mxu1 %v8377_v48  ;;  %5770 = vmatprep.subr.bf16.mxu0 %v8386_v20 }
 0x5a6   :  { %5890 = vmatpush1.bf16.msra.mxu1 %v8375_v49  ;;  %5771 = vmatpush1.bf16.msra.mxu0 %v8384_v50  ;;  %v8428_v49 = vld [vmem:[#allocation22 + $0x334] ss:$24 sps:$4 sm:$0xff]  }
 0x5a7   :  { %5891 = vmatprep.subr.bf16.mxu1 %v8383_v51  ;;  %5772 = vmatprep.subr.bf16.mxu0 %v8392_v52  ;;  %v8431_v50 = vld [vmem:[#allocation22 + $0x33c] ss:$24 sps:$4 sm:$0xff]  }
 0x5aa   :  { %5892 = vmatpush1.bf16.msra.mxu1 %v8381_v53  ;;  %5773 = vmatpush1.bf16.msra.mxu0 %v8390_v55 }
 0x5ab   :  { %5893 = vmatprep.subr.bf16.mxu1 %v8389_v56  ;;  %5774 = vmatprep.subr.bf16.mxu0 %v8398_v62  ;;  %v8437_v62 = vld [vmem:[#allocation22 + $0x36c] ss:$24 sps:$4 sm:$0xff]  }
 0x5ae   :  { %5894 = vmatpush1.bf16.msra.mxu1 %v8387_v57  ;;  %5775 = vmatpush1.bf16.msra.mxu0 %v8396_v39  ;;  %v8426_v57 = vld [vmem:[#allocation22 + $0x330] ss:$24 sps:$4 sm:$0xff]  }
 0x5af   :  { %5895 = vmatprep.subr.bf16.mxu1 %v8395_v58  ;;  %5776 = vmatprep.subr.bf16.mxu0 %v8404_v61  ;;  %v8429_v58 = vld [vmem:[#allocation22 + $0x338] ss:$24 sps:$4 sm:$0xff]   ;;  %v8435_v61 = vld [vmem:[#allocation22 + $0x368] ss:$24 sps:$4 sm:$0xff]  }
 0x5b2   :  { %5896 = vmatpush1.bf16.msra.mxu1 %v8393_v59  ;;  %5777 = vmatpush1.bf16.msra.mxu0 %v8402_v1  ;;  %v8434_v59 = vld [vmem:[#allocation22 + $0x364] ss:$24 sps:$4 sm:$0xff]  }
 0x5b3   :  { %5897 = vmatprep.subr.bf16.mxu1 %v8401_v45  ;;  %5778 = vmatprep.subr.bf16.mxu0 %v8410_v8 }
 0x5b6   :  { %5898 = vmatpush1.bf16.msra.mxu1 %v8399_v63  ;;  %5779 = vmatpush1.bf16.msra.mxu0 %v8408_v10  ;;  %v8432_v63 = vld [vmem:[#allocation22 + $0x360] ss:$24 sps:$4 sm:$0xff]  }
 0x5b7   :  { %5899 = vmatprep.subr.bf16.mxu1 %v8407_v5  ;;  %5780 = vmatprep.subr.bf16.mxu0 %v8416_v6  ;;  %v8443_v5 = vld [vmem:[#allocation22 + $0x39c] ss:$24 sps:$4 sm:$0xff]   ;;  %v8441_v6 = vld [vmem:[#allocation22 + $0x398] ss:$24 sps:$4 sm:$0xff]  }
 0x5ba   :  { %5900 = vmatpush1.bf16.msra.mxu1 %v8405_v2  ;;  %5781 = vmatpush1.bf16.msra.mxu0 %v8414_v7  ;;  %v8440_v2 = vld [vmem:[#allocation22 + $0x394] ss:$24 sps:$4 sm:$0xff]  }
 0x5bb   :  { %5901 = vmatprep.subr.bf16.mxu1 %v8413_v9  ;;  %5791 = vmatprep.subr.bf16.mxu0 %v8422_v25  ;;  %v8449_v7 = vld [vmem:[#allocation22 + $0x3cc] ss:$24 sps:$4 sm:$0xff]  }
 0x5be   :  { %5902 = vmatpush1.bf16.msra.mxu1 %v8411_v43  ;;  %v8438_v43 = vld [vmem:[#allocation22 + $0x390] ss:$24 sps:$4 sm:$0xff]  }
 0x5bf   :  { %5903 = vmatprep.subr.bf16.mxu1 %v8419_v11  ;;  %v8446_v11 = vld [vmem:[#allocation22 + $0x3c4] ss:$24 sps:$4 sm:$0xff]  }
 0x5c2   :  { %5904 = vmatpush1.bf16.msra.mxu1 %v8417_v12  ;;  %v3961_v12 = vrot.slane %v9712_v21, %v9657_v3 }
 0x5c3   :  { %5914 = vmatprep.subr.bf16.mxu1 %v8425_v0  ;;  %v3965_v0 = vrot.slane %v9712_v21, %v9640_v54  ;;  %v8458_v21 = vld [vmem:[#allocation22 + $0x424] ss:$24 sps:$4 sm:$0xff]  }
 0x638   :  { %v3694_v13 = vpop.f32.mrb[12].mxu1  ;;  %v3735_v14 = vpop.f32.mrb[20].mxu0 }
 0x639   :  { %v3696_v15 = vpop.f32.mrb[13].mxu1  ;;  %v3737_v17 = vpop.f32.mrb[21].mxu0 }
 0x63a   :  { %v3698_v18 = vpop.f32.mrb[14].mxu1  ;;  %v3739_v27 = vpop.f32.mrb[22].mxu0 }
 0x63b   :  { %v3699_v19 = vpop.f32.mrb[15].mxu1  ;;  %v3740_v4 = vpop.f32.mrb[23].mxu0  ;;  %v8452_v18 = vld [vmem:[#allocation22 + $0x3f4] ss:$24 sps:$4 sm:$0xff]  }
 0x63c   :  { %v8455_v27 = vld [vmem:[#allocation22 + $0x3fc] ss:$24 sps:$4 sm:$0xff]  }
 0x640   :  { %v3851_v23 = vpop.f32.mrb[24].mxu0 }
 0x641   :  { %v3852_v29 = vadd.f32 %v3851_v23, %v3694_v13  ;;  %v3853_v30 = vpop.f32.mrb[25].mxu0  ;;  %v8444_v13 = vld [vmem:[#allocation22 + $0x3c0] ss:$24 sps:$4 sm:$0xff]  }
 0x642   :  { %v3854_v31 = vadd.f32 %v3853_v30, %v3696_v15  ;;  %v3855_v32 = vpop.f32.mrb[26].mxu0  ;;  %v8453_v30 = vld [vmem:[#allocation22 + $0x3f8] ss:$24 sps:$4 sm:$0xff]  }
 0x643   :  { %v3972_v33 = vadd.f32 %v3945_v22, %v3852_v29  ;;  %v3856_v35 = vpop.f32.mrb[27].mxu0  ;;  %v8450_v29 = vld [vmem:[#allocation22 + $0x3f0] ss:$24 sps:$4 sm:$0xff]   ;;  %v8456_v32 = vld [vmem:[#allocation22 + $0x420] ss:$24 sps:$4 sm:$0xff]  }
 0x644   :  { %v3973_v36 = vadd.f32 %v3949_v24, %v3854_v31  ;;  %v8461_v31 = vld [vmem:[#allocation22 + $0x42c] ss:$24 sps:$4 sm:$0xff]  }
 0x645   :  { %v3978_v38 = vmax.f32 %v3972_v33, 0.0  ;;  %v8459_v33 = vld [vmem:[#allocation22 + $0x428] ss:$24 sps:$4 sm:$0xff]   ;;  %v8464_v35 = vld [vmem:[#allocation22 + $0x454] ss:$24 sps:$4 sm:$0xff]  }
 0x646   :  { %v3979_v60 = vmax.f32 %v3973_v36, 0.0  ;;  %v8467_v36 = vld [vmem:[#allocation22 + $0x45c] ss:$24 sps:$4 sm:$0xff]  }
 0x647   :  { %v9724_v47 = vpack.c.bf16 %v3978_v38, %v3978_v38  ;;  %v8462_v38 = vld [vmem:[#allocation22 + $0x450] ss:$24 sps:$4 sm:$0xff]  }
 0x648   :  { %v9720_v40 = vpack.c.bf16 %v3979_v60, %v3979_v60  ;;  %v3892_v41 = vpop.f32.mrb[28].mxu0  ;;  %v8465_v60 = vld [vmem:[#allocation22 + $0x458] ss:$24 sps:$4 sm:$0xff]  }
 0x649   :  { %v3893_v48 = vadd.f32 %v3892_v41, %v3735_v14  ;;  %v3894_v20 = vpop.f32.mrb[29].mxu0  ;;  %v8447_v14 = vld [vmem:[#allocation22 + $0x3c8] ss:$24 sps:$4 sm:$0xff]   ;;  %v8473_v41 = vld [vmem:[#allocation22 + $0x48c] ss:$24 sps:$4 sm:$0xff]  }
 0x64a   :  { %v3895_v51 = vadd.f32 %v3894_v20, %v3737_v17  ;;  %5782 = vmatprep.mubr.bf16.mxu0 %v9720_v40  ;;  %5905 = vmatprep.mubr.bf16.mxu1 %v9720_v40  ;;  %v3896_v52 = vpop.f32.mrb[30].mxu0  ;;  %v8474_v20 = vld [vmem:[#allocation22 + $0x4b0] ss:$24 sps:$4 sm:$0xff]  }
 0x64b   :  { %v9728_v53 = vadd.f32 %v3953_v16, %v3893_v48  ;;  %5783 = vmatmul.mubr.bf16.vlgmr.msra.gmra.mrb[36].mxu0 %v9724_v47  ;;  %5906 = vmatmul.mubr.bf16.vlgmr.msra.gmra.mrb[20].mxu1 %v9724_v47  ;;  %v3897_v55 = vpop.f32.mrb[31].mxu0  ;;  %v8470_v16 = vld [vmem:[#allocation22 + $0x484] ss:$24 sps:$4 sm:$0xff]   ;;  %v8480_v52 = vld [vmem:[#allocation22 + $0x4e0] ss:$24 sps:$4 sm:$0xff]  }
 0x64c   :  { %v3975_v56 = vadd.f32 %v3957_v42, %v3895_v51  ;;  %5792 = vmatpush1.bf16.msra.mxu0 %v8420_v44  ;;  %5915 = vmatpush1.bf16.msra.mxu1 %v8423_v46  ;;  %v8468_v42 = vld [vmem:[#allocation22 + $0x480] ss:$24 sps:$4 sm:$0xff]   ;;  %v8476_v46 = vld [vmem:[#allocation22 + $0x4b4] ss:$24 sps:$4 sm:$0xff]  }
 0x64d   :  { %5793 = vmatprep.subr.bf16.mxu0 %v8428_v49  ;;  %5916 = vmatprep.subr.bf16.mxu1 %v8431_v50  ;;  %v8471_v44 = vld [vmem:[#allocation22 + $0x488] ss:$24 sps:$4 sm:$0xff]   ;;  %v8479_v48 = vld [vmem:[#allocation22 + $0x4bc] ss:$24 sps:$4 sm:$0xff]   ;;  %v8477_v49 = vld [vmem:[#allocation22 + $0x4b8] ss:$24 sps:$4 sm:$0xff]  }
 0x64e   :  { %v3981_v45 = vmax.f32 %v3975_v56, 0.0  ;;  %v8482_v50 = vld [vmem:[#allocation22 + $0x4e4] ss:$24 sps:$4 sm:$0xff]   ;;  %v8483_v55 = vld [vmem:[#allocation22 + $0x4e8] ss:$24 sps:$4 sm:$0xff]  }
 0x64f   :  { %v8485_v51 = vld [vmem:[#allocation22 + $0x4ec] ss:$24 sps:$4 sm:$0xff]  }
 0x650   :  { %v9732_v39 = vpack.c.bf16 %v3981_v45, %v3981_v45  ;;  %5794 = vmatpush1.bf16.msra.mxu0 %v8426_v57  ;;  %5917 = vmatpush1.bf16.msra.mxu1 %v8429_v58  ;;  %v3933_v1 = vpop.f32.mrb[32].mxu0  ;;  %v8488_v56 = vld [vmem:[#allocation22 + $0x514] ss:$24 sps:$4 sm:$0xff]   ;;  %v8486_v58 = vld [vmem:[#allocation22 + $0x510] ss:$24 sps:$4 sm:$0xff]  }
 0x651   :  { %5795 = vmatprep.subr.bf16.mxu0 %v8434_v59  ;;  %5918 = vmatprep.subr.bf16.mxu1 %v8437_v62  ;;  %v3935_v8 = vpop.f32.mrb[33].mxu0  ;;  %v8491_v57 = vld [vmem:[#allocation22 + $0x51c] ss:$24 sps:$4 sm:$0xff]   ;;  %v8489_v59 = vld [vmem:[#allocation22 + $0x518] ss:$24 sps:$4 sm:$0xff]  }
 0x652   :  { %5823 = vmatprep.mubr.bf16.mxu0 %v9732_v39  ;;  %5946 = vmatprep.mubr.bf16.mxu1 %v9732_v39  ;;  %v3937_v9 = vpop.f32.mrb[34].mxu0  ;;  %v8494_v62 = vld [vmem:[#allocation22 + $0x544] ss:$24 sps:$4 sm:$0xff]  }
 0x653   :  { %v3938_v10 = vpop.f32.mrb[35].mxu0  ;;  %v8497_v45 = vld [vmem:[#allocation22 + $0x54c] ss:$24 sps:$4 sm:$0xff]  }
 0x654   :  { %5796 = vmatpush1.bf16.msra.mxu0 %v8432_v63  ;;  %5919 = vmatpush1.bf16.msra.mxu1 %v8435_v61  ;;  %v8492_v63 = vld [vmem:[#allocation22 + $0x540] ss:$24 sps:$4 sm:$0xff]   ;;  %v8506_v9 = vld [vmem:[#allocation22 + $0x5a4] ss:$24 sps:$4 sm:$0xff]  }
 0x655   :  { %5797 = vmatprep.subr.bf16.mxu0 %v8440_v2  ;;  %5920 = vmatprep.subr.bf16.mxu1 %v8443_v5  ;;  %v8495_v61 = vld [vmem:[#allocation22 + $0x548] ss:$24 sps:$4 sm:$0xff]   ;;  %v8503_v2 = vld [vmem:[#allocation22 + $0x57c] ss:$24 sps:$4 sm:$0xff]   ;;  %v8509_v10 = vld [vmem:[#allocation22 + $0x5ac] ss:$24 sps:$4 sm:$0xff]  }
 0x656   :  { %v8498_v5 = vld [vmem:[#allocation22 + $0x570] ss:$24 sps:$4 sm:$0xff]  }
 0x658   :  { %v3776_v25 = vpop.f32.mrb[16].mxu1  ;;  %5798 = vmatpush1.bf16.msra.mxu0 %v8438_v43  ;;  %5921 = vmatpush1.bf16.msra.mxu1 %v8441_v6  ;;  %v8504_v43 = vld [vmem:[#allocation22 + $0x5a0] ss:$24 sps:$4 sm:$0xff]  }
 0x659   :  { %v3934_v15 = vadd.f32 %v3933_v1, %v3776_v25  ;;  %v3778_v17 = vpop.f32.mrb[17].mxu1  ;;  %5799 = vmatprep.subr.bf16.mxu0 %v8446_v11  ;;  %5922 = vmatprep.subr.bf16.mxu1 %v8449_v7  ;;  %v8500_v1 = vld [vmem:[#allocation22 + $0x574] ss:$24 sps:$4 sm:$0xff]   ;;  %v8507_v6 = vld [vmem:[#allocation22 + $0x5a8] ss:$24 sps:$4 sm:$0xff]  }
 0x65a   :  { %v3936_v19 = vadd.f32 %v3935_v8, %v3778_v17  ;;  %v3780_v4 = vpop.f32.mrb[18].mxu1  ;;  %v8501_v8 = vld [vmem:[#allocation22 + $0x578] ss:$24 sps:$4 sm:$0xff]   ;;  %v8512_v11 = vld [vmem:[#allocation22 + $0x5d4] ss:$24 sps:$4 sm:$0xff]  }
 0x65b   :  { %v9740_v22 = vadd.f32 %v3961_v12, %v3934_v15  ;;  %v3781_v23 = vpop.f32.mrb[19].mxu1  ;;  %v8515_v7 = vld [vmem:[#allocation22 + $0x5dc] ss:$24 sps:$4 sm:$0xff]   ;;  %v8510_v12 = vld [vmem:[#allocation22 + $0x5d0] ss:$24 sps:$4 sm:$0xff]  }
 0x65c   :  { %v9742_v24 = vadd.f32 %v3965_v0, %v3936_v19  ;;  %5800 = vmatpush1.bf16.msra.mxu0 %v8444_v13  ;;  %5923 = vmatpush1.bf16.msra.mxu1 %v8447_v14  ;;  %v8513_v25 = vld [vmem:[#allocation22 + $0x5d8] ss:$24 sps:$4 sm:$0xff]   ;;  %v3980_v0 = vmax.f32 %v9728_v53, 0.0  ;;  %v8518_v13 = vld [vmem:[#allocation22 + $0x604] ss:$24 sps:$4 sm:$0xff]  }
 0x65d   :  { %5801 = vmatprep.subr.bf16.mxu0 %v8452_v18  ;;  %5924 = vmatprep.subr.bf16.mxu1 %v8455_v27  ;;  %v8521_v14 = vld [vmem:[#allocation22 + $0x60c] ss:$24 sps:$4 sm:$0xff]   ;;  %v8516_v17 = vld [vmem:[#allocation22 + $0x600] ss:$24 sps:$4 sm:$0xff]   ;;  %v8527_v23 = vld [vmem:[#allocation22 + $0x63c] ss:$24 sps:$4 sm:$0xff]  }
 0x65e   :  { %v3983_v15 = vmax.f32 %v9742_v24, 0.0  ;;  %v9746_v18 = vpack.c.bf16 %v3980_v0, %v3980_v0  ;;  %v8519_v27 = vld [vmem:[#allocation22 + $0x608] ss:$24 sps:$4 sm:$0xff]   ;;  %v8524_v4 = vld [vmem:[#allocation22 + $0x634] ss:$24 sps:$4 sm:$0xff]  }
 0x65f   :  { %v8522_v53 = vld [vmem:[#allocation22 + $0x630] ss:$24 sps:$4 sm:$0xff]   ;;  %v8588_v0 = vld [vmem:[#allocation22 + $0x840] ss:$24 sps:$4 sm:$0xff]  }
 0x660   :  { %5802 = vmatpush1.bf16.msra.mxu0 %v8450_v29  ;;  %5925 = vmatpush1.bf16.msra.mxu1 %v8453_v30  ;;  %v9748_v19 = vpack.c.bf16 %v3983_v15, %v3983_v15  ;;  %v8525_v24 = vld [vmem:[#allocation22 + $0x638] ss:$24 sps:$4 sm:$0xff]   ;;  %v8530_v29 = vld [vmem:[#allocation22 + $0x664] ss:$24 sps:$4 sm:$0xff]  }
 0x661   :  { %5803 = vmatprep.subr.bf16.mxu0 %v8458_v21  ;;  %5926 = vmatprep.subr.bf16.mxu1 %v8461_v31  ;;  %v8533_v30 = vld [vmem:[#allocation22 + $0x66c] ss:$24 sps:$4 sm:$0xff]   ;;  %v8528_v21 = vld [vmem:[#allocation22 + $0x660] ss:$24 sps:$4 sm:$0xff]   ;;  %v8599_v15 = vld [vmem:[#allocation22 + $0x87c] ss:$24 sps:$4 sm:$0xff]  }
 0x662   :  { %v8531_v31 = vld [vmem:[#allocation22 + $0x668] ss:$24 sps:$4 sm:$0xff]  }
 0x664   :  { %5804 = vmatpush1.bf16.msra.mxu0 %v8456_v32  ;;  %5927 = vmatpush1.bf16.msra.mxu1 %v8459_v33  ;;  %v8536_v32 = vld [vmem:[#allocation22 + $0x694] ss:$24 sps:$4 sm:$0xff]  }
 0x665   :  { %5805 = vmatprep.subr.bf16.mxu0 %v8464_v35  ;;  %5928 = vmatprep.subr.bf16.mxu1 %v8467_v36  ;;  %v8539_v33 = vld [vmem:[#allocation22 + $0x69c] ss:$24 sps:$4 sm:$0xff]   ;;  %v8534_v35 = vld [vmem:[#allocation22 + $0x690] ss:$24 sps:$4 sm:$0xff]  }
 0x666   :  { %v8537_v36 = vld [vmem:[#allocation22 + $0x698] ss:$24 sps:$4 sm:$0xff]  }
 0x668   :  { %5806 = vmatpush1.bf16.msra.mxu0 %v8462_v38  ;;  %5929 = vmatpush1.bf16.msra.mxu1 %v8465_v60  ;;  %v8542_v38 = vld [vmem:[#allocation22 + $0x6c4] ss:$24 sps:$4 sm:$0xff]  }
 0x669   :  { %5807 = vmatprep.subr.bf16.mxu0 %v8470_v16  ;;  %5930 = vmatprep.subr.bf16.mxu1 %v8473_v41  ;;  %v8545_v60 = vld [vmem:[#allocation22 + $0x6cc] ss:$24 sps:$4 sm:$0xff]   ;;  %v8540_v16 = vld [vmem:[#allocation22 + $0x6c0] ss:$24 sps:$4 sm:$0xff]  }
 0x66a   :  { %v8543_v41 = vld [vmem:[#allocation22 + $0x6c8] ss:$24 sps:$4 sm:$0xff]  }
 0x66c   :  { %5808 = vmatpush1.bf16.msra.mxu0 %v8468_v42  ;;  %5931 = vmatpush1.bf16.msra.mxu1 %v8471_v44  ;;  %v8548_v42 = vld [vmem:[#allocation22 + $0x6f4] ss:$24 sps:$4 sm:$0xff]  }
 0x66d   :  { %5809 = vmatprep.subr.bf16.mxu0 %v8476_v46  ;;  %5932 = vmatprep.subr.bf16.mxu1 %v8479_v48  ;;  %v8551_v44 = vld [vmem:[#allocation22 + $0x6fc] ss:$24 sps:$4 sm:$0xff]   ;;  %v8546_v46 = vld [vmem:[#allocation22 + $0x6f0] ss:$24 sps:$4 sm:$0xff]  }
 0x66e   :  { %v8549_v48 = vld [vmem:[#allocation22 + $0x6f8] ss:$24 sps:$4 sm:$0xff]  }
 0x670   :  { %5810 = vmatpush1.bf16.msra.mxu0 %v8474_v20  ;;  %5933 = vmatpush1.bf16.msra.mxu1 %v8477_v49  ;;  %v8554_v20 = vld [vmem:[#allocation22 + $0x724] ss:$24 sps:$4 sm:$0xff]  }
 0x671   :  { %5811 = vmatprep.subr.bf16.mxu0 %v8482_v50  ;;  %5934 = vmatprep.subr.bf16.mxu1 %v8485_v51  ;;  %v8557_v49 = vld [vmem:[#allocation22 + $0x72c] ss:$24 sps:$4 sm:$0xff]   ;;  %v8552_v50 = vld [vmem:[#allocation22 + $0x720] ss:$24 sps:$4 sm:$0xff]  }
 0x672   :  { %v8555_v51 = vld [vmem:[#allocation22 + $0x728] ss:$24 sps:$4 sm:$0xff]  }
 0x674   :  { %5812 = vmatpush1.bf16.msra.mxu0 %v8480_v52  ;;  %5935 = vmatpush1.bf16.msra.mxu1 %v8483_v55  ;;  %v8560_v52 = vld [vmem:[#allocation22 + $0x754] ss:$24 sps:$4 sm:$0xff]  }
 0x675   :  { %5813 = vmatprep.subr.bf16.mxu0 %v8488_v56  ;;  %5936 = vmatprep.subr.bf16.mxu1 %v8491_v57  ;;  %v8563_v55 = vld [vmem:[#allocation22 + $0x75c] ss:$24 sps:$4 sm:$0xff]   ;;  %v8558_v56 = vld [vmem:[#allocation22 + $0x750] ss:$24 sps:$4 sm:$0xff]  }
 0x676   :  { %v8561_v57 = vld [vmem:[#allocation22 + $0x758] ss:$24 sps:$4 sm:$0xff]  }
 0x678   :  { %5814 = vmatpush1.bf16.msra.mxu0 %v8486_v58  ;;  %5937 = vmatpush1.bf16.msra.mxu1 %v8489_v59  ;;  %v8566_v58 = vld [vmem:[#allocation22 + $0x784] ss:$24 sps:$4 sm:$0xff]  }
 0x679   :  { %5815 = vmatprep.subr.bf16.mxu0 %v8494_v62  ;;  %5938 = vmatprep.subr.bf16.mxu1 %v8497_v45  ;;  %v8569_v59 = vld [vmem:[#allocation22 + $0x78c] ss:$24 sps:$4 sm:$0xff]   ;;  %v8564_v62 = vld [vmem:[#allocation22 + $0x780] ss:$24 sps:$4 sm:$0xff]  }
 0x67a   :  { %v8567_v45 = vld [vmem:[#allocation22 + $0x788] ss:$24 sps:$4 sm:$0xff]  }
 0x67c   :  { %5816 = vmatpush1.bf16.msra.mxu0 %v8492_v63  ;;  %5939 = vmatpush1.bf16.msra.mxu1 %v8495_v61  ;;  %v8572_v63 = vld [vmem:[#allocation22 + $0x7b4] ss:$24 sps:$4 sm:$0xff]  }
 0x67d   :  { %5817 = vmatprep.subr.bf16.mxu0 %v8500_v1  ;;  %5940 = vmatprep.subr.bf16.mxu1 %v8503_v2  ;;  %v8575_v61 = vld [vmem:[#allocation22 + $0x7bc] ss:$24 sps:$4 sm:$0xff]   ;;  %v8570_v1 = vld [vmem:[#allocation22 + $0x7b0] ss:$24 sps:$4 sm:$0xff]  }
 0x67e   :  { %v8573_v2 = vld [vmem:[#allocation22 + $0x7b8] ss:$24 sps:$4 sm:$0xff]  }
 0x680   :  { %5818 = vmatpush1.bf16.msra.mxu0 %v8498_v5  ;;  %5941 = vmatpush1.bf16.msra.mxu1 %v8501_v8  ;;  %v8578_v5 = vld [vmem:[#allocation22 + $0x7e4] ss:$24 sps:$4 sm:$0xff]  }
 0x681   :  { %5819 = vmatprep.subr.bf16.mxu0 %v8506_v9  ;;  %5942 = vmatprep.subr.bf16.mxu1 %v8509_v10  ;;  %v8581_v8 = vld [vmem:[#allocation22 + $0x7ec] ss:$24 sps:$4 sm:$0xff]   ;;  %v8576_v9 = vld [vmem:[#allocation22 + $0x7e0] ss:$24 sps:$4 sm:$0xff]  }
 0x682   :  { %v8579_v10 = vld [vmem:[#allocation22 + $0x7e8] ss:$24 sps:$4 sm:$0xff]  }
 0x684   :  { %5820 = vmatpush1.bf16.msra.mxu0 %v8504_v43  ;;  %5943 = vmatpush1.bf16.msra.mxu1 %v8507_v6  ;;  %v8584_v43 = vld [vmem:[#allocation22 + $0x814] ss:$24 sps:$4 sm:$0xff]  }
 0x685   :  { %5821 = vmatprep.subr.bf16.mxu0 %v8512_v11  ;;  %5944 = vmatprep.subr.bf16.mxu1 %v8515_v7  ;;  %v8587_v6 = vld [vmem:[#allocation22 + $0x81c] ss:$24 sps:$4 sm:$0xff]   ;;  %v8582_v11 = vld [vmem:[#allocation22 + $0x810] ss:$24 sps:$4 sm:$0xff]  }
 0x686   :  { %v8585_v7 = vld [vmem:[#allocation22 + $0x818] ss:$24 sps:$4 sm:$0xff]  }
 0x688   :  { %5822 = vmatpush1.bf16.msra.mxu0 %v8510_v12  ;;  %5945 = vmatpush1.bf16.msra.mxu1 %v8513_v25  ;;  %v8590_v12 = vld [vmem:[#allocation22 + $0x844] ss:$24 sps:$4 sm:$0xff]  }
 0x689   :  { %5832 = vmatprep.subr.bf16.mxu0 %v8518_v13  ;;  %5955 = vmatprep.subr.bf16.mxu1 %v8521_v14  ;;  %v8593_v25 = vld [vmem:[#allocation22 + $0x84c] ss:$24 sps:$4 sm:$0xff]   ;;  %v8591_v13 = vld [vmem:[#allocation22 + $0x848] ss:$24 sps:$4 sm:$0xff]  }
 0x68a   :  { %v8596_v14 = vld [vmem:[#allocation22 + $0x874] ss:$24 sps:$4 sm:$0xff]  }
 0x68b   :  { %5824 = vmatmul.mubr.bf16.vlgmr.msra.gmra.mrb[36].mxu0 %v9746_v18  ;;  %5947 = vmatmul.mubr.bf16.vlgmr.msra.gmra.mrb[20].mxu1 %v9746_v18 }
 0x68c   :  { %5833 = vmatpush1.bf16.msra.mxu0 %v8516_v17  ;;  %5864 = vmatprep.mubr.bf16.mxu0 %v9748_v19  ;;  %v8594_v17 = vld [vmem:[#allocation22 + $0x870] ss:$24 sps:$4 sm:$0xff]  }
 0x68d   :  { %5956 = vmatpush1.bf16.msra.mxu1 %v8519_v27  ;;  %5987 = vmatprep.mubr.bf16.mxu1 %v9748_v19  ;;  %v8597_v27 = vld [vmem:[#allocation22 + $0x878] ss:$24 sps:$4 sm:$0xff]  }
 0x68e   :  { %5834 = vmatprep.subr.bf16.mxu0 %v8524_v4  ;;  %5957 = vmatprep.subr.bf16.mxu1 %v8527_v23  ;;  %v8602_v4 = vld [vmem:[#allocation22 + $0x8a4] ss:$24 sps:$4 sm:$0xff]  }
 0x68f   :  { %v8605_v23 = vld [vmem:[#allocation22 + $0x8ac] ss:$24 sps:$4 sm:$0xff]  }
 0x690   :  { %5835 = vmatpush1.bf16.msra.mxu0 %v8522_v53  ;;  %v8600_v53 = vld [vmem:[#allocation22 + $0x8a0] ss:$24 sps:$4 sm:$0xff]  }
 0x691   :  { %5958 = vmatpush1.bf16.msra.mxu1 %v8525_v24  ;;  %5836 = vmatprep.subr.bf16.mxu0 %v8530_v29  ;;  %v8603_v24 = vld [vmem:[#allocation22 + $0x8a8] ss:$24 sps:$4 sm:$0xff]   ;;  %v8608_v29 = vld [vmem:[#allocation22 + $0x8d4] ss:$24 sps:$4 sm:$0xff]  }
 0x692   :  { %5959 = vmatprep.subr.bf16.mxu1 %v8533_v30  ;;  %v8611_v30 = vld [vmem:[#allocation22 + $0x8dc] ss:$24 sps:$4 sm:$0xff]  }
 0x694   :  { %5837 = vmatpush1.bf16.msra.mxu0 %v8528_v21  ;;  %v8606_v21 = vld [vmem:[#allocation22 + $0x8d0] ss:$24 sps:$4 sm:$0xff]  }
 0x695   :  { %5960 = vmatpush1.bf16.msra.mxu1 %v8531_v31  ;;  %5838 = vmatprep.subr.bf16.mxu0 %v8536_v32  ;;  %v3982_v31 = vmax.f32 %v9740_v22, 0.0  ;;  %v8609_v32 = vld [vmem:[#allocation22 + $0x8d8] ss:$24 sps:$4 sm:$0xff]   ;;  %v8620_v22 = vld [vmem:[#allocation22 + $0x74] ss:$24 sps:$4 sm:$0xff]  }
 0x696   :  { %5961 = vmatprep.subr.bf16.mxu1 %v8539_v33  ;;  %v8614_v33 = vld [vmem:[#allocation22 + $0x14] ss:$24 sps:$4 sm:$0xff]  }
 0x698   :  { %5839 = vmatpush1.bf16.msra.mxu0 %v8534_v35  ;;  %v8612_v35 = vld [vmem:[#allocation22 + $0x10] ss:$24 sps:$4 sm:$0xff]  }
 0x699   :  { %5962 = vmatpush1.bf16.msra.mxu1 %v8537_v36  ;;  %5840 = vmatprep.subr.bf16.mxu0 %v8542_v38  ;;  %v9755_v36 = vpack.c.bf16 %v3982_v31, %v3982_v31  ;;  %v8617_v38 = vld [vmem:[#allocation22 + $0x44] ss:$24 sps:$4 sm:$0xff]  }
 0x69a   :  { %5963 = vmatprep.subr.bf16.mxu1 %v8545_v60  ;;  %v8615_v60 = vld [vmem:[#allocation22 + $0x40] ss:$24 sps:$4 sm:$0xff]   ;;  %v8677_v31 = vld [vmem:[#allocation22 + $0x404] ss:$24 sps:$4 sm:$0xff]  }
 0x69c   :  { %5841 = vmatpush1.bf16.msra.mxu0 %v8540_v16  ;;  %v8618_v16 = vld [vmem:[#allocation22 + $0x70] ss:$24 sps:$4 sm:$0xff]  }
 0x69d   :  { %5964 = vmatpush1.bf16.msra.mxu1 %v8543_v41  ;;  %5842 = vmatprep.subr.bf16.mxu0 %v8548_v42  ;;  %v8623_v41 = vld [vmem:[#allocation22 + $0xa4] ss:$24 sps:$4 sm:$0xff]   ;;  %v8621_v42 = vld [vmem:[#allocation22 + $0xa0] ss:$24 sps:$4 sm:$0xff]  }
 0x69e   :  { %5965 = vmatprep.subr.bf16.mxu1 %v8551_v44  ;;  %v8626_v44 = vld [vmem:[#allocation22 + $0xd4] ss:$24 sps:$4 sm:$0xff]  }
 0x6a0   :  { %5843 = vmatpush1.bf16.msra.mxu0 %v8546_v46  ;;  %v8624_v46 = vld [vmem:[#allocation22 + $0xd0] ss:$24 sps:$4 sm:$0xff]  }
 0x6a1   :  { %5966 = vmatpush1.bf16.msra.mxu1 %v8549_v48  ;;  %5844 = vmatprep.subr.bf16.mxu0 %v8554_v20  ;;  %v8629_v48 = vld [vmem:[#allocation22 + $0x104] ss:$24 sps:$4 sm:$0xff]   ;;  %v8627_v20 = vld [vmem:[#allocation22 + $0x100] ss:$24 sps:$4 sm:$0xff]  }
 0x6a2   :  { %5967 = vmatprep.subr.bf16.mxu1 %v8557_v49  ;;  %v8632_v49 = vld [vmem:[#allocation22 + $0x134] ss:$24 sps:$4 sm:$0xff]  }
 0x6a4   :  { %5845 = vmatpush1.bf16.msra.mxu0 %v8552_v50  ;;  %v8635_v50 = vld [vmem:[#allocation22 + $0x164] ss:$24 sps:$4 sm:$0xff]  }
 0x6a5   :  { %5968 = vmatpush1.bf16.msra.mxu1 %v8555_v51  ;;  %5846 = vmatprep.subr.bf16.mxu0 %v8560_v52  ;;  %v8633_v51 = vld [vmem:[#allocation22 + $0x160] ss:$24 sps:$4 sm:$0xff]   ;;  %v8638_v52 = vld [vmem:[#allocation22 + $0x194] ss:$24 sps:$4 sm:$0xff]  }
 0x6a6   :  { %5969 = vmatprep.subr.bf16.mxu1 %v8563_v55  ;;  %v8636_v55 = vld [vmem:[#allocation22 + $0x190] ss:$24 sps:$4 sm:$0xff]  }
 0x6a8   :  { %5847 = vmatpush1.bf16.msra.mxu0 %v8558_v56  ;;  %v8641_v56 = vld [vmem:[#allocation22 + $0x1c4] ss:$24 sps:$4 sm:$0xff]  }
 0x6a9   :  { %5970 = vmatpush1.bf16.msra.mxu1 %v8561_v57  ;;  %5848 = vmatprep.subr.bf16.mxu0 %v8566_v58  ;;  %v8639_v57 = vld [vmem:[#allocation22 + $0x1c0] ss:$24 sps:$4 sm:$0xff]   ;;  %v8644_v58 = vld [vmem:[#allocation22 + $0x1f4] ss:$24 sps:$4 sm:$0xff]  }
 0x6aa   :  { %5971 = vmatprep.subr.bf16.mxu1 %v8569_v59  ;;  %v8642_v59 = vld [vmem:[#allocation22 + $0x1f0] ss:$24 sps:$4 sm:$0xff]  }
 0x6ac   :  { %5849 = vmatpush1.bf16.msra.mxu0 %v8564_v62  ;;  %v8647_v62 = vld [vmem:[#allocation22 + $0x224] ss:$24 sps:$4 sm:$0xff]  }
 0x6ad   :  { %5972 = vmatpush1.bf16.msra.mxu1 %v8567_v45  ;;  %5850 = vmatprep.subr.bf16.mxu0 %v8572_v63  ;;  %v8645_v45 = vld [vmem:[#allocation22 + $0x220] ss:$24 sps:$4 sm:$0xff]   ;;  %v8650_v63 = vld [vmem:[#allocation22 + $0x254] ss:$24 sps:$4 sm:$0xff]  }
 0x6ae   :  { %5973 = vmatprep.subr.bf16.mxu1 %v8575_v61  ;;  %v8648_v61 = vld [vmem:[#allocation22 + $0x250] ss:$24 sps:$4 sm:$0xff]  }
 0x6b0   :  { %5851 = vmatpush1.bf16.msra.mxu0 %v8570_v1  ;;  %v8653_v1 = vld [vmem:[#allocation22 + $0x284] ss:$24 sps:$4 sm:$0xff]  }
 0x6b1   :  { %5974 = vmatpush1.bf16.msra.mxu1 %v8573_v2  ;;  %5852 = vmatprep.subr.bf16.mxu0 %v8578_v5  ;;  %v8651_v2 = vld [vmem:[#allocation22 + $0x280] ss:$24 sps:$4 sm:$0xff]   ;;  %v8656_v5 = vld [vmem:[#allocation22 + $0x2b4] ss:$24 sps:$4 sm:$0xff]  }
 0x6b2   :  { %5975 = vmatprep.subr.bf16.mxu1 %v8581_v8  ;;  %v8654_v8 = vld [vmem:[#allocation22 + $0x2b0] ss:$24 sps:$4 sm:$0xff]  }
 0x6b4   :  { %5853 = vmatpush1.bf16.msra.mxu0 %v8576_v9  ;;  %v8659_v9 = vld [vmem:[#allocation22 + $0x2e4] ss:$24 sps:$4 sm:$0xff]  }
 0x6b5   :  { %5976 = vmatpush1.bf16.msra.mxu1 %v8579_v10  ;;  %5854 = vmatprep.subr.bf16.mxu0 %v8584_v43  ;;  %v8657_v10 = vld [vmem:[#allocation22 + $0x2e0] ss:$24 sps:$4 sm:$0xff]   ;;  %v8753_v43 = vld [vmem:[#allocation25 + $0x40] sm:$0xff]  }
 0x6b6   :  { %5977 = vmatprep.subr.bf16.mxu1 %v8587_v6  ;;  %v8662_v6 = vld [vmem:[#allocation22 + $0x314] ss:$24 sps:$4 sm:$0xff]  }
 0x6b8   :  { %5855 = vmatpush1.bf16.msra.mxu0 %v8582_v11  ;;  %v8757_v11 = vld [vmem:[#allocation25] sm:$0xff]  }
 0x6b9   :  { %5978 = vmatpush1.bf16.msra.mxu1 %v8585_v7  ;;  %5856 = vmatprep.subr.bf16.mxu0 %v8590_v12  ;;  %v8660_v7 = vld [vmem:[#allocation22 + $0x310] ss:$24 sps:$4 sm:$0xff]  }
 0x6ba   :  { %5979 = vmatprep.subr.bf16.mxu1 %v8593_v25  ;;  %v8758_v12 = vld [vmem:[#allocation25 + $0x48] sm:$0xff]   ;;  %v8665_v25 = vld [vmem:[#allocation22 + $0x344] ss:$24 sps:$4 sm:$0xff]  }
 0x6bc   :  { %5857 = vmatpush1.bf16.msra.mxu0 %v8588_v0  ;;  %v8759_v0 = vld [vmem:[#allocation25 + $0x8] sm:$0xff]  }
 0x6bd   :  { %5980 = vmatpush1.bf16.msra.mxu1 %v8591_v13  ;;  %5858 = vmatprep.subr.bf16.mxu0 %v8596_v14  ;;  %v8760_v13 = vld [vmem:[#allocation25 + $0x50] sm:$0xff]  }
 0x6be   :  { %5981 = vmatprep.subr.bf16.mxu1 %v8599_v15  ;;  %v8663_v14 = vld [vmem:[#allocation22 + $0x340] ss:$24 sps:$4 sm:$0xff]   ;;  %v8668_v15 = vld [vmem:[#allocation22 + $0x374] ss:$24 sps:$4 sm:$0xff]  }
 0x6c0   :  { %5859 = vmatpush1.bf16.msra.mxu0 %v8594_v17  ;;  %v8761_v17 = vld [vmem:[#allocation25 + $0x10] sm:$0xff]  }
 0x6c1   :  { %5982 = vmatpush1.bf16.msra.mxu1 %v8597_v27  ;;  %5860 = vmatprep.subr.bf16.mxu0 %v8602_v4  ;;  %v8762_v27 = vld [vmem:[#allocation25 + $0x58] sm:$0xff]   ;;  %v8666_v4 = vld [vmem:[#allocation22 + $0x370] ss:$24 sps:$4 sm:$0xff]  }
 0x6c2   :  { %5983 = vmatprep.subr.bf16.mxu1 %v8605_v23  ;;  %v8671_v23 = vld [vmem:[#allocation22 + $0x3a4] ss:$24 sps:$4 sm:$0xff]  }
 0x6c4   :  { %5861 = vmatpush1.bf16.msra.mxu0 %v8600_v53  ;;  %v8763_v53 = vld [vmem:[#allocation25 + $0x18] sm:$0xff]  }
 0x6c5   :  { %5984 = vmatpush1.bf16.msra.mxu1 %v8603_v24  ;;  %5862 = vmatprep.subr.bf16.mxu0 %v8608_v29  ;;  %v8764_v24 = vld [vmem:[#allocation25 + $0x60] sm:$0xff]  }
 0x6c6   :  { %5985 = vmatprep.subr.bf16.mxu1 %v8611_v30  ;;  %v8674_v29 = vld [vmem:[#allocation22 + $0x3d4] ss:$24 sps:$4 sm:$0xff]  }
 0x6c7   :  { %v8766_v30 = vld [vmem:[#allocation25 + $0x68] sm:$0xff]  }
 0x6c8   :  { %5863 = vmatpush1.bf16.msra.mxu0 %v8606_v21  ;;  %v8672_v21 = vld [vmem:[#allocation22 + $0x3d0] ss:$24 sps:$4 sm:$0xff]  }
 0x6c9   :  { %5986 = vmatpush1.bf16.msra.mxu1 %v8609_v32  ;;  %5996 = vmatprep.subr.bf16.mxu0 %v8614_v33  ;;  %v8767_v32 = vld [vmem:[#allocation25 + $0x28] sm:$0xff]   ;;  %v8675_v33 = vld [vmem:[#allocation22 + $0x400] ss:$24 sps:$4 sm:$0xff]  }
 0x6ca   :  { %7492 = vmatprep.subr.bf16.mxu1 %v8753_v43  ;;  %v8719_v43 = vld [vmem:[#allocation22 + $0x6a4] ss:$24 sps:$4 sm:$0xff]  }
 0x6cb   :  { %5865 = vmatmul.mubr.bf16.vlgmr.msra.gmra.mrb[36].mxu0 %v9755_v36 }
 0x6cc   :  { %5988 = vmatmul.mubr.bf16.vlgmr.msra.gmra.mrb[20].mxu1 %v9755_v36  ;;  %5997 = vmatpush1.bf16.msra.mxu0 %v8612_v35  ;;  %v8680_v35 = vld [vmem:[#allocation22 + $0x434] ss:$24 sps:$4 sm:$0xff]  }
 0x6cd   :  { %6028 = vmatprep.mubr.bf16.mxu0 %v9720_v40  ;;  %5998 = vmatprep.subr.bf16.mxu0 %v8617_v38  ;;  %v8630_v40 = vld [vmem:[#allocation22 + $0x130] ss:$24 sps:$4 sm:$0xff]   ;;  %v8768_v38 = vld [vmem:[#allocation25 + $0x70] sm:$0xff]  }
 0x6ce   :  { %7493 = vmatpush3.bf16.msra.mxu1 %v8757_v11  ;;  %v8722_v11 = vld [vmem:[#allocation22 + $0x6d4] ss:$24 sps:$4 sm:$0xff]  }
 0x6cf   :  { %7494 = vmatprep.subr.bf16.mxu1 %v8758_v12  ;;  %v8725_v12 = vld [vmem:[#allocation22 + $0x704] ss:$24 sps:$4 sm:$0xff]  }
 0x6d0   :  { %5999 = vmatpush1.bf16.msra.mxu0 %v8615_v60  ;;  %v8769_v60 = vld [vmem:[#allocation25 + $0x30] sm:$0xff]  }
 0x6d1   :  { %6000 = vmatprep.subr.bf16.mxu0 %v8620_v22  ;;  %v8678_v22 = vld [vmem:[#allocation22 + $0x430] ss:$24 sps:$4 sm:$0xff]  }
 0x6d2   :  { %7495 = vmatpush3.bf16.msra.mxu1 %v8759_v0  ;;  %v8731_v0 = vld [vmem:[#allocation22 + $0x764] ss:$24 sps:$4 sm:$0xff]  }
 0x6d3   :  { %7496 = vmatprep.subr.bf16.mxu1 %v8760_v13  ;;  %v8729_v13 = vld [vmem:[#allocation22 + $0x760] ss:$24 sps:$4 sm:$0xff]  }
 0x6d4   :  { %6001 = vmatpush1.bf16.msra.mxu0 %v8618_v16  ;;  %v8683_v16 = vld [vmem:[#allocation22 + $0x464] ss:$24 sps:$4 sm:$0xff]  }
 0x6d5   :  { %6002 = vmatprep.subr.bf16.mxu0 %v8623_v41  ;;  %v8770_v41 = vld [vmem:[#allocation25 + $0x78] sm:$0xff]  }
 0x6d6   :  { %7497 = vmatpush3.bf16.msra.mxu1 %v8761_v17  ;;  %v8737_v17 = vld [vmem:[#allocation22 + $0x7c4] ss:$24 sps:$4 sm:$0xff]  }
 0x6d7   :  { %7498 = vmatprep.subr.bf16.mxu1 %v8762_v27  ;;  %v8735_v27 = vld [vmem:[#allocation22 + $0x7c0] ss:$24 sps:$4 sm:$0xff]  }
 0x6d8   :  { %6003 = vmatpush1.bf16.msra.mxu0 %v8621_v42  ;;  %v8771_v42 = vld [vmem:[#allocation25 + $0x38] sm:$0xff]  }
 0x6d9   :  { %6004 = vmatprep.subr.bf16.mxu0 %v8626_v44  ;;  %v8681_v44 = vld [vmem:[#allocation22 + $0x460] ss:$24 sps:$4 sm:$0xff]  }
 0x6da   :  { %7499 = vmatpush3.bf16.msra.mxu1 %v8763_v53  ;;  %v8743_v53 = vld [vmem:[#allocation22 + $0x824] ss:$24 sps:$4 sm:$0xff]  }
 0x6db   :  { %7500 = vmatprep.subr.bf16.mxu1 %v8764_v24  ;;  %v8741_v24 = vld [vmem:[#allocation22 + $0x820] ss:$24 sps:$4 sm:$0xff]  }
 0x6dc   :  { %6005 = vmatpush1.bf16.msra.mxu0 %v8624_v46  ;;  %v8686_v46 = vld [vmem:[#allocation22 + $0x494] ss:$24 sps:$4 sm:$0xff]  }
 0x6dd   :  { %6006 = vmatprep.subr.bf16.mxu0 %v8629_v48  ;;  %v8772_v48 = vld [vmem:[#allocation25 + $0xc0] sm:$0xff]  }
 0x6e0   :  { %6007 = vmatpush1.bf16.msra.mxu0 %v8627_v20  ;;  %v8684_v20 = vld [vmem:[#allocation22 + $0x490] ss:$24 sps:$4 sm:$0xff]  }
 0x6e1   :  { %6008 = vmatprep.subr.bf16.mxu0 %v8632_v49  ;;  %v8689_v49 = vld [vmem:[#allocation22 + $0x4c4] ss:$24 sps:$4 sm:$0xff]  }
 0x6e4   :  { %6009 = vmatpush1.bf16.msra.mxu0 %v8630_v40  ;;  %v8687_v40 = vld [vmem:[#allocation22 + $0x4c0] ss:$24 sps:$4 sm:$0xff]  }
 0x6e5   :  { %6010 = vmatprep.subr.bf16.mxu0 %v8635_v50  ;;  %v8692_v50 = vld [vmem:[#allocation22 + $0x4f4] ss:$24 sps:$4 sm:$0xff]  }
 0x6e8   :  { %6011 = vmatpush1.bf16.msra.mxu0 %v8633_v51  ;;  %v8690_v51 = vld [vmem:[#allocation22 + $0x4f0] ss:$24 sps:$4 sm:$0xff]  }
 0x6e9   :  { %6012 = vmatprep.subr.bf16.mxu0 %v8638_v52  ;;  %v8695_v52 = vld [vmem:[#allocation22 + $0x524] ss:$24 sps:$4 sm:$0xff]  }
 0x6ec   :  { %6013 = vmatpush1.bf16.msra.mxu0 %v8636_v55  ;;  %v8693_v55 = vld [vmem:[#allocation22 + $0x520] ss:$24 sps:$4 sm:$0xff]  }
 0x6ed   :  { %6014 = vmatprep.subr.bf16.mxu0 %v8641_v56  ;;  %v8698_v56 = vld [vmem:[#allocation22 + $0x554] ss:$24 sps:$4 sm:$0xff]  }
 0x6f0   :  { %6015 = vmatpush1.bf16.msra.mxu0 %v8639_v57  ;;  %v8696_v57 = vld [vmem:[#allocation22 + $0x550] ss:$24 sps:$4 sm:$0xff]  }
 0x6f1   :  { %6016 = vmatprep.subr.bf16.mxu0 %v8644_v58  ;;  %v8701_v58 = vld [vmem:[#allocation22 + $0x584] ss:$24 sps:$4 sm:$0xff]  }
 0x6f4   :  { %6017 = vmatpush1.bf16.msra.mxu0 %v8642_v59  ;;  %v8699_v59 = vld [vmem:[#allocation22 + $0x580] ss:$24 sps:$4 sm:$0xff]  }
 0x6f5   :  { %6018 = vmatprep.subr.bf16.mxu0 %v8647_v62  ;;  %v8704_v62 = vld [vmem:[#allocation22 + $0x5b4] ss:$24 sps:$4 sm:$0xff]  }
 0x6f8   :  { %6019 = vmatpush1.bf16.msra.mxu0 %v8645_v45  ;;  %v8702_v45 = vld [vmem:[#allocation22 + $0x5b0] ss:$24 sps:$4 sm:$0xff]  }
 0x6f9   :  { %6020 = vmatprep.subr.bf16.mxu0 %v8650_v63  ;;  %v8707_v63 = vld [vmem:[#allocation22 + $0x5e4] ss:$24 sps:$4 sm:$0xff]  }
 0x6fc   :  { %6021 = vmatpush1.bf16.msra.mxu0 %v8648_v61  ;;  %v8705_v61 = vld [vmem:[#allocation22 + $0x5e0] ss:$24 sps:$4 sm:$0xff]  }
 0x6fd   :  { %6022 = vmatprep.subr.bf16.mxu0 %v8653_v1  ;;  %v8710_v1 = vld [vmem:[#allocation22 + $0x614] ss:$24 sps:$4 sm:$0xff]  }
 0x700   :  { %6023 = vmatpush1.bf16.msra.mxu0 %v8651_v2  ;;  %v8708_v2 = vld [vmem:[#allocation22 + $0x610] ss:$24 sps:$4 sm:$0xff]  }
 0x701   :  { %6024 = vmatprep.subr.bf16.mxu0 %v8656_v5  ;;  %v8713_v5 = vld [vmem:[#allocation22 + $0x644] ss:$24 sps:$4 sm:$0xff]  }
 0x704   :  { %6025 = vmatpush1.bf16.msra.mxu0 %v8654_v8  ;;  %v8711_v8 = vld [vmem:[#allocation22 + $0x640] ss:$24 sps:$4 sm:$0xff]  }
 0x705   :  { %6026 = vmatprep.subr.bf16.mxu0 %v8659_v9  ;;  %v8716_v9 = vld [vmem:[#allocation22 + $0x674] ss:$24 sps:$4 sm:$0xff]  }
 0x708   :  { %6027 = vmatpush1.bf16.msra.mxu0 %v8657_v10  ;;  %v8714_v10 = vld [vmem:[#allocation22 + $0x670] ss:$24 sps:$4 sm:$0xff]  }
 0x709   :  { %6037 = vmatprep.subr.bf16.mxu0 %v8662_v6  ;;  %v8717_v6 = vld [vmem:[#allocation22 + $0x6a0] ss:$24 sps:$4 sm:$0xff]  }
 0x70b   :  { %6029 = vmatmul.mubr.bf16.vlgmr.msra.gmra.mrb[40].mxu0 %v9724_v47  ;;  %v8669_v47 = vld [vmem:[#allocation22 + $0x3a0] ss:$24 sps:$4 sm:$0xff]  }
 0x70c   :  { %6038 = vmatpush1.bf16.msra.mxu0 %v8660_v7  ;;  %6069 = vmatprep.mubr.bf16.mxu0 %v9732_v39  ;;  %v8765_v39 = vld [vmem:[#allocation25 + $0x20] sm:$0xff]  }
 0x70d   :  { %6039 = vmatprep.subr.bf16.mxu0 %v8665_v25  ;;  %7501 = vmatpush3.bf16.msra.mxu1 %v8765_v39  ;;  %v8720_v7 = vld [vmem:[#allocation22 + $0x6d0] ss:$24 sps:$4 sm:$0xff]   ;;  %v8728_v25 = vld [vmem:[#allocation22 + $0x734] ss:$24 sps:$4 sm:$0xff]   ;;  %v8749_v39 = vld [vmem:[#allocation22 + $0x884] ss:$24 sps:$4 sm:$0xff]  }
 0x70e   :  { %7502 = vmatprep.subr.bf16.mxu1 %v8766_v30  ;;  %v8747_v30 = vld [vmem:[#allocation22 + $0x880] ss:$24 sps:$4 sm:$0xff]  }
 0x710   :  { %6040 = vmatpush1.bf16.msra.mxu0 %v8663_v14  ;;  %v8734_v14 = vld [vmem:[#allocation22 + $0x794] ss:$24 sps:$4 sm:$0xff]  }
 0x711   :  { %6041 = vmatprep.subr.bf16.mxu0 %v8668_v15  ;;  %7503 = vmatpush3.bf16.msra.mxu1 %v8767_v32  ;;  %v8732_v15 = vld [vmem:[#allocation22 + $0x790] ss:$24 sps:$4 sm:$0xff]   ;;  %v8756_v32 = vld [vmem:[#allocation22 + $0x8e4] ss:$24 sps:$4 sm:$0xff]  }
 0x712   :  { %7504 = vmatprep.subr.bf16.mxu1 %v8768_v38 }
 0x714   :  { %6042 = vmatpush1.bf16.msra.mxu0 %v8666_v4  ;;  %v8740_v4 = vld [vmem:[#allocation22 + $0x7f4] ss:$24 sps:$4 sm:$0xff]  }
 0x715   :  { %6043 = vmatprep.subr.bf16.mxu0 %v8671_v23  ;;  %7505 = vmatpush3.bf16.msra.mxu1 %v8769_v60  ;;  %v8738_v23 = vld [vmem:[#allocation22 + $0x7f0] ss:$24 sps:$4 sm:$0xff]  }
 0x716   :  { %7506 = vmatprep.subr.bf16.mxu1 %v8770_v41 }
 0x718   :  { %6044 = vmatpush1.bf16.msra.mxu0 %v8669_v47  ;;  %v8746_v47 = vld [vmem:[#allocation22 + $0x854] ss:$24 sps:$4 sm:$0xff]  }
 0x719   :  { %6045 = vmatprep.subr.bf16.mxu0 %v8674_v29  ;;  %7507 = vmatpush3.bf16.msra.mxu1 %v8771_v42  ;;  %v8744_v29 = vld [vmem:[#allocation22 + $0x850] ss:$24 sps:$4 sm:$0xff]  }
 0x71a   :  { %7514 = vmatprep.subr.bf16.mxu1 %v8772_v48 }
 0x71c   :  { %6046 = vmatpush1.bf16.msra.mxu0 %v8672_v21  ;;  %v8752_v21 = vld [vmem:[#allocation22 + $0x8b4] ss:$24 sps:$4 sm:$0xff]  }
 0x71d   :  { %6047 = vmatprep.subr.bf16.mxu0 %v8677_v31  ;;  %v8750_v31 = vld [vmem:[#allocation22 + $0x8b0] ss:$24 sps:$4 sm:$0xff]  }
 0x720   :  { %6048 = vmatpush1.bf16.msra.mxu0 %v8675_v33  ;;  %v8754_v33 = vld [vmem:[#allocation22 + $0x8e0] ss:$24 sps:$4 sm:$0xff]  }
 0x721   :  { %6049 = vmatprep.subr.bf16.mxu0 %v8680_v35  ;;  %v9765_v35 = vld [vmem:[#allocation23] sm:$0x3f] }
 0x722   :  { %v4283_v38 = vrot.slane %v9765_v35, %v9612_v26  ;;  %v4287_v60 = vrot.slane %v9765_v35, %v9617_v28 }
 0x724   :  { %6050 = vmatpush1.bf16.msra.mxu0 %v8678_v22  ;;  %v4295_v22 = vrot.slane %v9765_v35, %v9627_v37  ;;  %v8775_v37 = vld [vmem:[#allocation25 + $0x88] sm:$0xff]  }
 0x725   :  { %6051 = vmatprep.subr.bf16.mxu0 %v8683_v16 }
 0x728   :  { %6052 = vmatpush1.bf16.msra.mxu0 %v8681_v44 }
 0x729   :  { %6053 = vmatprep.subr.bf16.mxu0 %v8686_v46 }
 0x72c   :  { %6054 = vmatpush1.bf16.msra.mxu0 %v8684_v20 }
 0x72d   :  { %6055 = vmatprep.subr.bf16.mxu0 %v8689_v49 }
 0x730   :  { %6056 = vmatpush1.bf16.msra.mxu0 %v8687_v40 }
 0x731   :  { %6057 = vmatprep.subr.bf16.mxu0 %v8692_v50 }
 0x734   :  { %6058 = vmatpush1.bf16.msra.mxu0 %v8690_v51 }
 0x735   :  { %6059 = vmatprep.subr.bf16.mxu0 %v8695_v52 }
 0x738   :  { %6060 = vmatpush1.bf16.msra.mxu0 %v8693_v55 }
 0x739   :  { %6061 = vmatprep.subr.bf16.mxu0 %v8698_v56  ;;  %v8773_v56 = vld [vmem:[#allocation25 + $0x80] sm:$0xff]  }
 0x73c   :  { %6062 = vmatpush1.bf16.msra.mxu0 %v8696_v57  ;;  %v8774_v57 = vld [vmem:[#allocation25 + $0xc8] sm:$0xff]  }
 0x73d   :  { %6063 = vmatprep.subr.bf16.mxu0 %v8701_v58 }
 0x740   :  { %6064 = vmatpush1.bf16.msra.mxu0 %v8699_v59  ;;  %v8776_v59 = vld [vmem:[#allocation25 + $0xd0] sm:$0xff]  }
 0x741   :  { %6065 = vmatprep.subr.bf16.mxu0 %v8704_v62  ;;  %v8777_v62 = vld [vmem:[#allocation25 + $0x90] sm:$0xff]  }
 0x744   :  { %6066 = vmatpush1.bf16.msra.mxu0 %v8702_v45  ;;  %v8778_v45 = vld [vmem:[#allocation25 + $0xd8] sm:$0xff]  }
 0x745   :  { %6067 = vmatprep.subr.bf16.mxu0 %v8707_v63  ;;  %v8779_v63 = vld [vmem:[#allocation25 + $0x98] sm:$0xff]  }
 0x748   :  { %6068 = vmatpush1.bf16.msra.mxu0 %v8705_v61  ;;  %v8780_v61 = vld [vmem:[#allocation25 + $0xe0] sm:$0xff]  }
 0x749   :  { %6078 = vmatprep.subr.bf16.mxu0 %v8710_v1  ;;  %v8781_v1 = vld [vmem:[#allocation25 + $0xa0] sm:$0xff]  }
 0x74b   :  { %6070 = vmatmul.mubr.bf16.vlgmr.msra.gmra.mrb[40].mxu0 %v9746_v18  ;;  %v8723_v18 = vld [vmem:[#allocation22 + $0x700] ss:$24 sps:$4 sm:$0xff]  }
 0x74c   :  { %6079 = vmatpush1.bf16.msra.mxu0 %v8708_v2  ;;  %6110 = vmatprep.mubr.bf16.mxu0 %v9748_v19  ;;  %v8726_v19 = vld [vmem:[#allocation22 + $0x730] ss:$24 sps:$4 sm:$0xff]  }
 0x74d   :  { %6080 = vmatprep.subr.bf16.mxu0 %v8713_v5  ;;  %v8782_v2 = vld [vmem:[#allocation25 + $0xe8] sm:$0xff]  }
 0x74e   :  { %v8783_v5 = vld [vmem:[#allocation25 + $0xa8] sm:$0xff]  }
 0x750   :  { %6081 = vmatpush1.bf16.msra.mxu0 %v8711_v8  ;;  %v4291_v8 = vrot.slane %v9765_v35, %v9624_v34  ;;  %v8791_v34 = vld [vmem:[#allocation25 + $0x108] sm:$0xff]  }
 0x751   :  { %6082 = vmatprep.subr.bf16.mxu0 %v8716_v9  ;;  %v8784_v9 = vld [vmem:[#allocation25 + $0xf0] sm:$0xff]  }
 0x754   :  { %6083 = vmatpush1.bf16.msra.mxu0 %v8714_v10  ;;  %v8785_v10 = vld [vmem:[#allocation25 + $0xb0] sm:$0xff]  }
 0x755   :  { %6084 = vmatprep.subr.bf16.mxu0 %v8719_v43 }
 0x758   :  { %6085 = vmatpush1.bf16.msra.mxu0 %v8717_v6  ;;  %v8786_v6 = vld [vmem:[#allocation25 + $0xf8] sm:$0xff]  }
 0x759   :  { %6086 = vmatprep.subr.bf16.mxu0 %v8722_v11  ;;  %v8787_v11 = vld [vmem:[#allocation25 + $0xb8] sm:$0xff]  }
 0x75c   :  { %6087 = vmatpush1.bf16.msra.mxu0 %v8720_v7 }
 0x75d   :  { %6088 = vmatprep.subr.bf16.mxu0 %v8725_v12  ;;  %v8788_v12 = vld [vmem:[#allocation25 + $0x140] sm:$0xff]  }
 0x760   :  { %6089 = vmatpush1.bf16.msra.mxu0 %v8723_v18  ;;  %v8789_v18 = vld [vmem:[#allocation25 + $0x100] sm:$0xff]  }
 0x761   :  { %6090 = vmatprep.subr.bf16.mxu0 %v8728_v25 }
 0x764   :  { %6091 = vmatpush1.bf16.msra.mxu0 %v8726_v19  ;;  %v8790_v19 = vld [vmem:[#allocation25 + $0x148] sm:$0xff]  }
 0x765   :  { %6092 = vmatprep.subr.bf16.mxu0 %v8731_v0  ;;  %v8792_v0 = vld [vmem:[#allocation25 + $0x150] sm:$0xff]  }
 0x768   :  { %6093 = vmatpush1.bf16.msra.mxu0 %v8729_v13  ;;  %v8793_v13 = vld [vmem:[#allocation25 + $0x110] sm:$0xff]  }
 0x769   :  { %6094 = vmatprep.subr.bf16.mxu0 %v8734_v14  ;;  %v8794_v14 = vld [vmem:[#allocation25 + $0x158] sm:$0xff]  }
 0x76c   :  { %6095 = vmatpush1.bf16.msra.mxu0 %v8732_v15  ;;  %v8795_v15 = vld [vmem:[#allocation25 + $0x118] sm:$0xff]  }
 0x76d   :  { %6096 = vmatprep.subr.bf16.mxu0 %v8737_v17  ;;  %v8796_v17 = vld [vmem:[#allocation25 + $0x160] sm:$0xff]  }
 0x770   :  { %6097 = vmatpush1.bf16.msra.mxu0 %v8735_v27  ;;  %v8797_v27 = vld [vmem:[#allocation25 + $0x120] sm:$0xff]  }
 0x771   :  { %6098 = vmatprep.subr.bf16.mxu0 %v8740_v4  ;;  %v8798_v4 = vld [vmem:[#allocation25 + $0x168] sm:$0xff]  }
 0x774   :  { %6099 = vmatpush1.bf16.msra.mxu0 %v8738_v23  ;;  %v8799_v23 = vld [vmem:[#allocation25 + $0x128] sm:$0xff]  }
 0x775   :  { %6100 = vmatprep.subr.bf16.mxu0 %v8743_v53  ;;  %v8800_v53 = vld [vmem:[#allocation25 + $0x170] sm:$0xff]  }
 0x778   :  { %6101 = vmatpush1.bf16.msra.mxu0 %v8741_v24  ;;  %v8801_v24 = vld [vmem:[#allocation25 + $0x130] sm:$0xff]  }
 0x779   :  { %6102 = vmatprep.subr.bf16.mxu0 %v8746_v47  ;;  %v8802_v47 = vld [vmem:[#allocation25 + $0x178] sm:$0xff]  }
 0x77c   :  { %6103 = vmatpush1.bf16.msra.mxu0 %v8744_v29  ;;  %v8803_v29 = vld [vmem:[#allocation25 + $0x138] sm:$0xff]  }
 0x77d   :  { %6104 = vmatprep.subr.bf16.mxu0 %v8749_v39  ;;  %v4299_v39 = vrot.slane %v9765_v35, %v9657_v3 }
 0x780   :  { %6105 = vmatpush1.bf16.msra.mxu0 %v8747_v30  ;;  %v4303_v30 = vrot.slane %v9765_v35, %v9640_v54 }
 0x781   :  { %6106 = vmatprep.subr.bf16.mxu0 %v8752_v21 }
 0x784   :  { %6107 = vmatpush1.bf16.msra.mxu0 %v8750_v31 }
 0x785   :  { %6108 = vmatprep.subr.bf16.mxu0 %v8756_v32 }
 0x788   :  { %6109 = vmatpush1.bf16.msra.mxu0 %v8754_v33 }
 0x78b   :  { %6111 = vmatmul.mubr.bf16.vlgmr.msra.gmra.mrb[40].mxu0 %v9755_v36 }
 0x79e   :  { %v5866_v16 = vpop.f32.mrb[36].mxu0 }
 0x79f   :  { %v7568_v41 = vadd.f32 %v5866_v16, %v4283_v38  ;;  %v5989_v42 = vpop.f32.mrb[20].mxu1  ;;  %v5868_v44 = vpop.f32.mrb[37].mxu0 }
 0x7a0   :  { %v7569_v46 = vadd.f32 %v5868_v44, %v4287_v60  ;;  %v5991_v48 = vpop.f32.mrb[21].mxu1  ;;  %v5870_v20 = vpop.f32.mrb[38].mxu0  ;;  %v7570_v43 = vadd.f32 %v5989_v42, %v4291_v8 }
 0x7a1   :  { %v6119_v49 = vmax.f32 %v7568_v41, 0.0  ;;  %v7571_v36 = vadd.f32 %v5991_v48, %v4295_v22  ;;  %v5993_v40 = vpop.f32.mrb[22].mxu1  ;;  %v5871_v50 = vpop.f32.mrb[39].mxu0 }
 0x7a2   :  { %v6120_v51 = vmax.f32 %v7569_v46, 0.0  ;;  %v5994_v52 = vpop.f32.mrb[23].mxu1  ;;  %v6121_v7 = vmax.f32 %v7570_v43, 0.0 }
 0x7a3   :  { %v6122_v26 = vmax.f32 %v7571_v36, 0.0  ;;  %v6125_v28 = vpack.c.bf16 %v6119_v49, %v6119_v49  ;;  %v7443_v49 = vld [vmem:[#allocation26] ss:$0 sm:$0xff] }
 0x7a4   :  { %v6126_v55 = vpack.c.bf16 %v6120_v51, %v6120_v51  ;;  %v6127_v25 = vpack.c.bf16 %v6121_v7, %v6121_v7 }
 0x7a5   :  { %v6128_v58 = vpack.c.bf16 %v6122_v26, %v6122_v26 }
 0x7a6   :  { %6554 = vmatprep.mubr.bf16.mxu1 %v6126_v55 }
 0x7a7   :  { %6555 = vmatmul.mubr.bf16.vlgmr.msra.gmra.mrb[24].mxu1 %v6125_v28 }
 0x7a8   :  { %7515 = vmatpush3.bf16.msra.mxu1 %v8773_v56  ;;  %6594 = vmatprep.mubr.bf16.mxu1 %v6128_v58 }
 0x7a9   :  { %7516 = vmatprep.subr.bf16.mxu1 %v8774_v57 }
 0x7ac   :  { %7517 = vmatpush3.bf16.msra.mxu1 %v8775_v37 }
 0x7ad   :  { %7518 = vmatprep.subr.bf16.mxu1 %v8776_v59 }
 0x7b0   :  { %7519 = vmatpush3.bf16.msra.mxu1 %v8777_v62 }
 0x7b1   :  { %7520 = vmatprep.subr.bf16.mxu1 %v8778_v45 }
 0x7b4   :  { %7521 = vmatpush3.bf16.msra.mxu1 %v8779_v63 }
 0x7b5   :  { %7522 = vmatprep.subr.bf16.mxu1 %v8780_v61 }
 0x7b8   :  { %7523 = vmatpush3.bf16.msra.mxu1 %v8781_v1 }
 0x7b9   :  { %7524 = vmatprep.subr.bf16.mxu1 %v8782_v2 }
 0x7bc   :  { %7525 = vmatpush3.bf16.msra.mxu1 %v8783_v5 }
 0x7bd   :  { %7526 = vmatprep.subr.bf16.mxu1 %v8784_v9 }
 0x7c0   :  { %7527 = vmatpush3.bf16.msra.mxu1 %v8785_v10 }
 0x7c1   :  { %7528 = vmatprep.subr.bf16.mxu1 %v8786_v6 }
 0x7c4   :  { %7529 = vmatpush3.bf16.msra.mxu1 %v8787_v11 }
 0x7c5   :  { %7536 = vmatprep.subr.bf16.mxu1 %v8788_v12 }
 0x7c7   :  { %6595 = vmatmul.mubr.bf16.vlgmr.msra.gmra.mrb[28].mxu1 %v6127_v25 }
 0x7c8   :  { %7537 = vmatpush3.bf16.msra.mxu1 %v8789_v18 }
 0x7c9   :  { %7538 = vmatprep.subr.bf16.mxu1 %v8790_v19 }
 0x7cc   :  { %7539 = vmatpush3.bf16.msra.mxu1 %v8791_v34 }
 0x7cd   :  { %7540 = vmatprep.subr.bf16.mxu1 %v8792_v0 }
 0x7d0   :  { %7541 = vmatpush3.bf16.msra.mxu1 %v8793_v13 }
 0x7d1   :  { %7542 = vmatprep.subr.bf16.mxu1 %v8794_v14 }
 0x7d4   :  { %7543 = vmatpush3.bf16.msra.mxu1 %v8795_v15 }
 0x7d5   :  { %7544 = vmatprep.subr.bf16.mxu1 %v8796_v17 }
 0x7d8   :  { %7545 = vmatpush3.bf16.msra.mxu1 %v8797_v27 }
 0x7d9   :  { %7546 = vmatprep.subr.bf16.mxu1 %v8798_v4 }
 0x7dc   :  { %7547 = vmatpush3.bf16.msra.mxu1 %v8799_v23 }
 0x7dd   :  { %7548 = vmatprep.subr.bf16.mxu1 %v8800_v53 }
 0x7e0   :  { %7549 = vmatpush3.bf16.msra.mxu1 %v8801_v24 }
 0x7e1   :  { %7550 = vmatprep.subr.bf16.mxu1 %v8802_v47 }
 0x7e4   :  { %7551 = vmatpush3.bf16.msra.mxu1 %v8803_v29 }
 0x85e   :  { %v6112_v21 = vpop.f32.mrb[40].mxu0 }
 0x85f   :  { %v7572_v31 = vadd.f32 %v6112_v21, %v4299_v39  ;;  %v6114_v32 = vpop.f32.mrb[41].mxu0 }
 0x860   :  { %v7573_v33 = vadd.f32 %v6114_v32, %v4303_v30  ;;  %v6116_v38 = vpop.f32.mrb[42].mxu0 }
 0x861   :  { %v6123_v60 = vmax.f32 %v7572_v31, 0.0  ;;  %v6117_v22 = vpop.f32.mrb[43].mxu0 }
 0x862   :  { %v6124_v16 = vmax.f32 %v7573_v33, 0.0 }
 0x863   :  { %v6129_v42 = vpack.c.bf16 %v6123_v60, %v6123_v60 }
 0x864   :  { %v6130_v41 = vpack.c.bf16 %v6124_v16, %v6124_v16 }
 0x866   :  { %6634 = vmatprep.mubr.bf16.mxu1 %v6130_v41 }
 0x867   :  { %6635 = vmatmul.mubr.bf16.vlgmr.msra.gmra.mrb[32].mxu1 %v6129_v42 }
 0x87a   :  { %v7508_v44 = vpop.f32.mrb[24].mxu1 }
 0x87b   :  { %v7509_v46 = vpop.f32.mrb[25].mxu1 }
 0x87c   :  { %v7510_v48 = vadd.f32 %v7509_v46, %v7508_v44  ;;  %v7511_v20 = vpop.f32.mrb[26].mxu1 }
 0x87d   :  { %v7512_v3 = vpop.f32.mrb[27].mxu1 }
 0x87e   :  { %v6557_v35 = vadd.f32 %v7510_v48, %v7443_v49 }
 0x89a   :  { %v7530_v36 = vpop.f32.mrb[28].mxu1 }
 0x89b   :  { %v7531_v54 = vpop.f32.mrb[29].mxu1 }
 0x89c   :  { %v7532_v40 = vadd.f32 %v7531_v54, %v7530_v36  ;;  %v7533_v50 = vpop.f32.mrb[30].mxu1 }
 0x89d   :  { %v7534_v51 = vpop.f32.mrb[31].mxu1 }
 0x89e   :  { %v6597_v52 = vadd.f32 %v7532_v40, %v6557_v35 }
 0x89f   :  { %9171 = shalt.err (!%p9168_p6)
}
 0x8a0   :  { %s9172_s27 = scalar_lea.hbm %s9832_s17, 128 }
 0x8a1   :  { %p9173_p7 = scmp.ne.s32.totalorder %s9832_s17, %s9172_s27  ;;  %p9176_p8 = scmp.lt.u32.totalorder %s9172_s27, %s9832_s17 }
 0x8a3   :  { %p9178_p9 = pnand %p9176_p8, %p9173_p7 }
 0x8a5   :  { %9181 = shalt.err (!%p9178_p9)
}
 0x8a6   :  { %6665 = dma.vmem_to_hbm [thread:$0]  %s6663_s23, 128, %s9832_s17, [#allocation30]  }
 0x8a7   :  { %s9272_s12 = smov [#allocation31]  }
 0x8a8   :  { %s6672_s28 = sshll.u32 %s9272_s12, 4  ;;  %s6673_s28 = int_to_ptr.vmem [resolvable:$true] %s6672_s28 }
 0x8a9   :  { %s9182_s1 = scalar_lea.vmem %s6673_s28, 128  ;;  %p9187_p11 = scmp.lt.s32.totalorder %s6673_s28, %s6673_s28 }
 0x8aa   :  { %p9183_p10 = scmp.ne.s32.totalorder %s6673_s28, %s9182_s1  ;;  %p9188_p12 = scmp.lt.s32.totalorder %s9182_s1, %s9182_s1 }
 0x8ac   :  { %p9189_p13 = por %p9188_p12, %p9187_p11 }
 0x8ae   :  { %p9190_p0 = pnand %p9189_p13, %p9183_p10 }
 0x8b0   :  { %9193 = shalt.err (!%p9190_p0)
}
 0x8b1   :  { %s9194_s16 = scalar_lea.hbm %s9833_s18, 128 }
 0x8b2   :  { %p9195_p1 = scmp.ne.s32.totalorder %s9833_s18, %s9194_s16  ;;  %p9198_p2 = scmp.lt.u32.totalorder %s9194_s16, %s9833_s18 }
 0x8b4   :  { %p9200_p3 = pnand %p9198_p2, %p9195_p1 }
 0x8b6   :  { %9203 = shalt.err (!%p9200_p3)
}
 0x8b7   :  { %6675 = dma.vmem_to_hbm [thread:$0]  %s6673_s28, 128, %s9833_s18, [#allocation30]  }
 0x8b8   :  { %s9273_s26 = smov [#allocation28]  }
 0x8b9   :  { %s6652_s11 = sshll.u32 %s9273_s26, 4  ;;  %s6653_s11 = int_to_ptr.vmem [resolvable:$true] %s6652_s11 }
 0x8ba   :  { %s9204_s24 = scalar_lea.vmem %s6653_s11, 128  ;;  %p9209_p5 = scmp.lt.s32.totalorder %s6653_s11, %s6653_s11 }
 0x8bb   :  { %p9205_p4 = scmp.ne.s32.totalorder %s6653_s11, %s9204_s24  ;;  %p9210_p6 = scmp.lt.s32.totalorder %s9204_s24, %s9204_s24 }
 0x8bd   :  { %p9211_p7 = por %p9210_p6, %p9209_p5 }
 0x8bf   :  { %p9212_p8 = pnand %p9211_p7, %p9205_p4 }
 0x93a   :  { %v7552_v26 = vpop.f32.mrb[32].mxu1 }
 0x93b   :  { %v7553_v55 = vpop.f32.mrb[33].mxu1 }
 0x93c   :  { %v7554_v56 = vadd.f32 %v7553_v55, %v7552_v26  ;;  %v7555_v28 = vpop.f32.mrb[34].mxu1 }
 0x93d   :  { %v7556_v57 = vpop.f32.mrb[35].mxu1 }
 0x93e   :  { %v6637_v58 = vadd.f32 %v7554_v56, %v6597_v52 }
 0x940   :  { %8806 = vtanh.f32 %v6637_v58 }
 0x94a   :  { %v8807_v37 = vpop.eup %8806 }
 0x94b   :  { %6643 = vst [vmem:[#allocation28] sm:$0xff] %v8807_v37 }
 0x94c   :  { %9215 = shalt.err (!%p9212_p8)
}
 0x94d   :  { %s9845_s6 = sld [smem:[#allocation46_spill]] }
 0x953   :  { %s9216_s10 = scalar_lea.hbm %s9845_s6, 128 }
 0x954   :  { %p9217_p9 = scmp.ne.s32.totalorder %s9845_s6, %s9216_s10  ;;  %p9220_p10 = scmp.lt.u32.totalorder %s9216_s10, %s9845_s6 }
 0x956   :  { %p9222_p11 = pnand %p9220_p10, %p9217_p9 }
 0x958   :  { %9225 = shalt.err (!%p9222_p11)
}
 0x959   :  { %6655 = dma.vmem_to_hbm [thread:$0]  %s6653_s11, 128, %s9845_s6, [#allocation4]  }
 0x95a   :  { %9244 = dma.done.wait [#allocation4], 128  }
 0x95b   :  { %9245 = vsyncadd [#allocation4], 4294967168 }
 0x95c   :  { %9246 = dma.done.wait [#allocation30], 256  }
 0x95d   :  { %9247 = vsyncadd [#allocation30], 4294967040 }
 0x95e   :  { %6685 = vsyncpa [#allocation3], 1 }
 0x95f   :  { %6686 = vsyncpa [#allocation6], 1 }
 0x960   :  { %6687 = vsyncpa [#allocation9], 1 }
 0x961   :  { %6688 = vsyncpa [#allocation12], 1 }
 0x962   :  { %6689 = vsyncpa [#allocation15], 1 }
 0x963   :  { %6690 = vsyncpa [#allocation18], 1 }
 0x964   :  { %6691 = vsyncpa [#allocation21], 1 }
 0x965   :  { %6692 = vsyncpa [#allocation24], 1 }
 0x966   :  { %6693 = vsyncpa [#allocation27], 1 }
 0x967   :  { %6694 = vsyncpa [#allocation4], 1 }
 0x968   :  { %6695 = vsyncpa [#allocation30], 1 }

</bundles_post_ra>
